<compile_context>
chip_gen: v5e
topology: v5e:2x2
jax: 0.10.0
libtpu: 0.0.40
codegen_flags: <defaults>
</compile_context>

<pallas_src>
import functools
import math

import jax
import jax.numpy as jnp
from jax import lax
from jax.experimental import pallas as pl
from jax.experimental.pallas import tpu as pltpu

LANE = 128


def _round_up(v, m):
    return ((v + m - 1) // m) * m


def _pad2d(a, rows, cols):
    r, c = a.shape
    return jnp.pad(a, ((0, rows - r), (0, cols - c)))


def _tpu_kind():
    try:
        return jax.devices()[0].device_kind.lower()
    except Exception:  # pragma: no cover - CPU fallback / odd runtimes
        return ""


# ---------------------------------------------------------------------------
# Pallas kernel: one row-tile of a full SAGEConv layer (+ LN / ReLU / residual)
# ---------------------------------------------------------------------------
def sage_layer_kernel(a_ref, invdeg_ref, xfull_ref, wcat_ref, bl_ref,
                      gamma_ref, beta_ref, o_ref, *,
                      tm, f_out_real, normalize, apply_act, use_residual,
                      fuse_k):
    # a_ref:      (TM, Np)     bf16 / fp8  exact 0/1(+multiplicity) adjacency stripe
    # invdeg_ref: (TM, 1)      f32  1/max(deg, 1)
    # xfull_ref:  (Np, Fp)     bf16 full node features (resident, single-buffered)
    # wcat_ref:   (2*Fp, Fout) bf16 stacked [W_l ; W_r]
    f_in_pad = wcat_ref.shape[0] // 2

    # Self/residual rows come straight from the resident slab (no extra DMA).
    row0 = pl.multiple_of(pl.program_id(0) * tm, tm)
    x = xfull_ref[pl.ds(row0, tm), :]                                # (TM, Fp) bf16

    # --- mean aggregation: bf16 MXU matmul, degree-normalize the f32 acc ---
    a = a_ref[...]
    if a.dtype != jnp.bfloat16:
        a = a.astype(jnp.bfloat16)        # fp8 HBM stream -> bf16 MXU operand
    ssum = jnp.dot(a, xfull_ref[...], preferred_element_type=jnp.float32)
    agg = (ssum * invdeg_ref[...]).astype(jnp.bfloat16)              # (TM, Fp)

    # --- SAGEConv linear part: lin_l(agg) + b_l + lin_r(x), bf16 MXU, f32 acc ---
    if fuse_k:
        # Single K=2*Fp matmul fills the 256-wide MXU on v6e/v7x.
        h = jnp.dot(jnp.concatenate([agg, x], axis=-1), wcat_ref[...],
                    preferred_element_type=jnp.float32)
    else:
        h = jnp.dot(agg, wcat_ref[:f_in_pad, :],
                    preferred_element_type=jnp.float32)
        h = h + jnp.dot(x, wcat_ref[f_in_pad:, :],
                        preferred_element_type=jnp.float32)
    h = h + bl_ref[...]

    # --- L2 normalize + LayerNorm sharing one pair of lane reductions ---
    # Padded output lanes of h are exactly 0 (weights/bias zero-padded).
    sum_h = jnp.sum(h, axis=-1, keepdims=True)
    sq = jnp.sum(h * h, axis=-1, keepdims=True)
    inv_f = 1.0 / float(f_out_real)
    if normalize:
        r = lax.rsqrt(jnp.maximum(sq, 1e-24))          # (1e-12)**2, F.normalize eps
        h = h * r
        mu = sum_h * (r * inv_f)                       # mean of normalized h
        ex2 = sq * (r * r) * inv_f                     # E[h'^2] of normalized h
    else:
        mu = sum_h * inv_f
        ex2 = sq * inv_f
    var = jnp.maximum(ex2 - mu * mu, 0.0)
    h = (h - mu) * lax.rsqrt(var + 1e-5)
    h = h * gamma_ref[...] + beta_ref[...]   # gamma/beta zero-padded -> pad lanes -> 0

    # --- activation / dropout(p=0.0 -> identity) / residual ---
    if apply_act:
        h = jnp.maximum(h, 0.0)
        if use_residual:
            h = h + x.astype(jnp.float32)

    o_ref[...] = h.astype(o_ref.dtype)


def sage_layer(a_q, inv_deg, x_full, w_cat, b_l, gamma, beta, *,
               f_out_real, normalize, apply_act, use_residual, tm, fuse_k,
               out_dtype, vmem_cap):
    n_pad, f_in_pad = x_full.shape
    f_out_pad = w_cat.shape[1]
    grid = (n_pad // tm,)

    kernel = functools.partial(
        sage_layer_kernel, tm=tm, f_out_real=f_out_real, normalize=normalize,
        apply_act=apply_act, use_residual=use_residual, fuse_k=fuse_k)

    a_bytes = jnp.dtype(a_q.dtype).itemsize
    out_bytes = jnp.dtype(out_dtype).itemsize
    est = (2 * tm * n_pad * a_bytes            # A stripes (double-buffered)
           + n_pad * f_in_pad * 2              # resident X slab (Buffered(1), bf16)
           + 2 * tm * LANE * 4                 # 1/deg stripes (lane-padded)
           + 2 * tm * f_out_pad * out_bytes    # output stripes
           + 2 * f_in_pad * f_out_pad * 2      # stacked weights (Buffered(1), bf16)
           + 3 * 8 * f_out_pad * 4)            # bias / gamma / beta
    vmem_limit = int(min(vmem_cap, max(est + (8 << 20), 24 << 20)))

    resident = dict(pipeline_mode=pl.Buffered(1))   # constant-index blocks: 1 buffer
    return pl.pallas_call(
        kernel,
        out_shape=jax.ShapeDtypeStruct((n_pad, f_out_pad), out_dtype),
        grid=grid,
        in_specs=[
            pl.BlockSpec((tm, n_pad), lambda i: (i, 0)),                 # A stripe
            pl.BlockSpec((tm, 1), lambda i: (i, 0)),                     # 1/deg stripe
            pl.BlockSpec((n_pad, f_in_pad), lambda i: (0, 0), **resident),       # full X
            pl.BlockSpec((2 * f_in_pad, f_out_pad), lambda i: (0, 0), **resident),  # [Wl;Wr]
            pl.BlockSpec((1, f_out_pad), lambda i: (0, 0), **resident),  # b_l
            pl.BlockSpec((1, f_out_pad), lambda i: (0, 0), **resident),  # gamma
            pl.BlockSpec((1, f_out_pad), lambda i: (0, 0), **resident),  # beta
        ],
        out_specs=pl.BlockSpec((tm, f_out_pad), lambda i: (i, 0)),
        compiler_params=pltpu.CompilerParams(
            dimension_semantics=("parallel",),   # shards row tiles across v7x TCs
            vmem_limit_bytes=vmem_limit),
    )(a_q, inv_deg, x_full, w_cat, b_l, gamma, beta)


# ---------------------------------------------------------------------------
# Parameter construction (deterministic; matches nn.init.xavier_normal_(gain=.5))
# ---------------------------------------------------------------------------
def xavier_normal(key, fan_in, fan_out, gain):
    std = gain * math.sqrt(2.0 / (fan_in + fan_out))
    # stored as (fan_in, fan_out) == W^T so the kernel computes x @ W
    return std * jax.random.normal(key, (fan_in, fan_out), dtype=jnp.float32)


def init_backbone_params(key, in_channels, hidden_channels, out_channels,
                         num_layers):
    dims = [in_channels] + [hidden_channels] * (num_layers - 1) + [out_channels]
    params = []
    for i in range(num_layers):
        f_in, f_out = dims[i], dims[i + 1]
        key, k_l, k_r = jax.random.split(key, 3)
        params.append(dict(
            w_l=xavier_normal(k_l, f_in, f_out, gain=0.5),
            b_l=jnp.zeros((1, f_out), jnp.float32),
            w_r=xavier_normal(k_r, f_in, f_out, gain=0.5),
            gamma=jnp.ones((1, f_out), jnp.float32),   # LayerNorm weight
            beta=jnp.zeros((1, f_out), jnp.float32),   # LayerNorm bias
        ))
    return params


# ---------------------------------------------------------------------------
# Full backbone forward (padding / adjacency glue in JAX, hot path in Pallas).
# ---------------------------------------------------------------------------
def graphsage_backbone_forward(x, edge_index, params, *, num_layers,
                               normalize=True, use_residual=True, tm=None):
    n, f_in = x.shape
    src, dst = edge_index[0], edge_index[1]

    kind = _tpu_kind()
    is_v7 = any(t in kind for t in ("v7", "7x", "tpu7"))
    is_v5 = "v5" in kind
    fuse_k = not is_v5                      # K=256 fused matmul only on 256-wide MXUs
    vmem_cap = (56 << 20) if is_v7 else (100 << 20)

    # Dense adjacency: messages flow src -> dst, aggregated at dst. Duplicate
    # edges add multiplicity (matches PyG mean aggregation); no self-loops added.
    adj = jnp.zeros((n, n), jnp.float32).at[dst, src].add(1.0)
    deg = jnp.sum(adj, axis=1, keepdims=True)
    inv_deg = 1.0 / jnp.maximum(deg, 1.0)        # mean; no in-neighbors -> agg = 0

    # Adjacency stream dtype: fp8 e4m3 on v7x (exact for multiplicity <= 16,
    # halves the dominant HBM stream), bf16 on v5e/v6e (exact to 256).
    use_fp8_adj = False
    if is_v7 and hasattr(jnp, "float8_e4m3fn"):
        use_fp8_adj = bool(jnp.max(adj) <= 16.0)
    a_dtype = jnp.float8_e4m3fn if use_fp8_adj else jnp.bfloat16
    a_bytes = 1 if use_fp8_adj else 2

    # Row-tile size: multiple of 128, generation-aware budget for the
    # double-buffered A stripe (~32 MiB on v5e/v6e, ~12 MiB on v7x).
    n128 = _round_up(n, LANE)
    if tm is None:
        a_budget = (12 << 20) if is_v7 else (32 << 20)
        tm_auto = a_budget // (2 * a_bytes * n128)
        tm = max(LANE, min(1024, (tm_auto // LANE) * LANE))
    tm = min(tm, n128)
    n_pad = _round_up(n, tm)

    f_in_pad = _round_up(f_in, LANE)
    a_q = _pad2d(adj, n_pad, n_pad).astype(a_dtype)
    inv_deg_p = _pad2d(inv_deg, n_pad, 1)
    x_full = _pad2d(x.astype(jnp.float32), n_pad, f_in_pad).astype(jnp.bfloat16)

    for i, p in enumerate(params):
        is_last = (i == num_layers - 1)
        f_in_real, f_out_real = p["w_l"].shape
        f_out_pad = _round_up(f_out_real, LANE)
        f_cur_pad = x_full.shape[1]

        # Stacked [W_l ; W_r] (bf16) -> single K=2*Fp matmul when fuse_k.
        w_cat = jnp.concatenate(
            [_pad2d(p["w_l"], f_cur_pad, f_out_pad),
             _pad2d(p["w_r"], f_cur_pad, f_out_pad)],
            axis=0).astype(jnp.bfloat16)
        b_l = _pad2d(p["b_l"], 1, f_out_pad)
        gamma = _pad2d(p["gamma"], 1, f_out_pad)   # zero-padded lanes stay exactly 0
        beta = _pad2d(p["beta"], 1, f_out_pad)

        resid = use_residual and (not is_last) and (f_in_real == f_out_real)
        x_full = sage_layer(
            a_q, inv_deg_p, x_full, w_cat, b_l, gamma, beta,
            f_out_real=f_out_real, normalize=normalize,
            apply_act=not is_last, use_residual=resid, tm=tm, fuse_k=fuse_k,
            out_dtype=jnp.float32 if is_last else jnp.bfloat16,
            vmem_cap=vmem_cap)

    f_out_real = params[-1]["w_l"].shape[1]
    return x_full[:n, :f_out_real]


if __name__ == "__main__":
    # Small deterministic example: 200 nodes (padded to 256), features
    # 16 -> 32 -> 32 -> 16 (padded to 128 lanes), 600 edges.
    N, IN_C, HID_C, OUT_C, NUM_LAYERS, E = 200, 16, 32, 16, 3, 600

    key = jax.random.PRNGKey(0)
    k_x, k_e1, k_e2, k_p = jax.random.split(key, 4)

    x = jax.random.normal(k_x, (N, IN_C), dtype=jnp.float32)
    edge_index = jnp.stack([
        jax.random.randint(k_e1, (E,), 0, N),
        jax.random.randint(k_e2, (E,), 0, N),
    ]).astype(jnp.int32)                                # (2, E)

    params = init_backbone_params(k_p, IN_C, HID_C, OUT_C, NUM_LAYERS)

    out = graphsage_backbone_forward(
        x, edge_index, params,
        num_layers=NUM_LAYERS, normalize=True, use_residual=True)
    jax.block_until_ready(out)

    assert out.shape == (N, OUT_C)
    assert bool(jnp.all(jnp.isfinite(out)))
    print("KERNEL_OK")
</pallas_src>

<mosaic_0001>
module attributes {stable_mosaic.version = 11 : i64} {
  func.func @sage_layer_kernel(%arg0: i32, %arg1: memref<256x256xbf16, #tpu.memory_space<vmem>>, %arg2: memref<256x1xf32, #tpu.memory_space<vmem>>, %arg3: memref<256x128xbf16, #tpu.memory_space<vmem>>, %arg4: memref<256x128xbf16, #tpu.memory_space<vmem>>, %arg5: memref<1x128xf32, #tpu.memory_space<vmem>>, %arg6: memref<1x128xf32, #tpu.memory_space<vmem>>, %arg7: memref<1x128xf32, #tpu.memory_space<vmem>>, %arg8: memref<256x128xbf16, #tpu.memory_space<vmem>>) attributes {dimension_semantics = [#tpu.dimension_semantics<parallel>], iteration_bounds = array<i64: 1>, scalar_prefetch = 0 : i64, scratch_operands = 0 : i64, tpu.core_type = #tpu.core_type<tc>, window_params = [{transform_indices = @transform_0, window_bounds = array<i64: 256, 256>}, {transform_indices = @transform_1, window_bounds = array<i64: 256, 1>}, {pipeline_mode = #tpu.pipeline_mode<synchronous>, transform_indices = @transform_2, window_bounds = array<i64: 256, 128>}, {pipeline_mode = #tpu.pipeline_mode<synchronous>, transform_indices = @transform_3, window_bounds = array<i64: 256, 128>}, {pipeline_mode = #tpu.pipeline_mode<synchronous>, transform_indices = @transform_4, window_bounds = array<i64: 1, 128>}, {pipeline_mode = #tpu.pipeline_mode<synchronous>, transform_indices = @transform_5, window_bounds = array<i64: 1, 128>}, {pipeline_mode = #tpu.pipeline_mode<synchronous>, transform_indices = @transform_6, window_bounds = array<i64: 1, 128>}, {transform_indices = @transform_7, window_bounds = array<i64: 256, 128>}]} {
    %c256_i32 = arith.constant 256 : i32
    %0 = arith.muli %arg0, %c256_i32 : i32
    %1 = tpu.assume_multiple %0, 256 : i32
    %2 = arith.index_cast %1 : i32 to index
    %c0 = arith.constant 0 : index
    %3 = vector.load %arg3[%2, %c0] : memref<256x128xbf16, #tpu.memory_space<vmem>>, vector<256x128xbf16>
    %c0_0 = arith.constant 0 : index
    %c0_1 = arith.constant 0 : index
    %4 = vector.load %arg1[%c0_0, %c0_1] : memref<256x256xbf16, #tpu.memory_space<vmem>>, vector<256x256xbf16>
    %c0_2 = arith.constant 0 : index
    %c0_3 = arith.constant 0 : index
    %5 = vector.load %arg3[%c0_2, %c0_3] : memref<256x128xbf16, #tpu.memory_space<vmem>>, vector<256x128xbf16>
    %cst = arith.constant dense<0.000000e+00> : vector<256x128xf32>
    %6 = tpu.matmul %4, %5, %cst {dimension_numbers = #tpu.dot_dimension_numbers<[1], [0], [0], [1], [0, 0, 1, 1], [], []>} : vector<256x256xbf16>, vector<256x128xbf16>, vector<256x128xf32> -> vector<256x128xf32>
    %c0_4 = arith.constant 0 : index
    %c0_5 = arith.constant 0 : index
    %7 = vector.load %arg2[%c0_4, %c0_5] : memref<256x1xf32, #tpu.memory_space<vmem>>, vector<256x1xf32>
    %8 = vector.broadcast %7 : vector<256x1xf32> to vector<256x128xf32>
    %9 = arith.mulf %6, %8 : vector<256x128xf32>
    %10 = arith.truncf %9 : vector<256x128xf32> to vector<256x128xbf16>
    %11 = tpu.concatenate %10, %3 in 1 : vector<256x128xbf16>, vector<256x128xbf16> -> vector<256x256xbf16>
    %c0_6 = arith.constant 0 : index
    %c0_7 = arith.constant 0 : index
    %12 = vector.load %arg4[%c0_6, %c0_7] : memref<256x128xbf16, #tpu.memory_space<vmem>>, vector<256x128xbf16>
    %cst_8 = arith.constant dense<0.000000e+00> : vector<256x128xf32>
    %13 = tpu.matmul %11, %12, %cst_8 {dimension_numbers = #tpu.dot_dimension_numbers<[1], [0], [0], [1], [0, 0, 1, 1], [], []>} : vector<256x256xbf16>, vector<256x128xbf16>, vector<256x128xf32> -> vector<256x128xf32>
    %c0_9 = arith.constant 0 : index
    %c0_10 = arith.constant 0 : index
    %14 = vector.load %arg5[%c0_9, %c0_10] : memref<1x128xf32, #tpu.memory_space<vmem>>, vector<1x128xf32>
    %15 = vector.broadcast %14 : vector<1x128xf32> to vector<256x128xf32>
    %16 = arith.addf %13, %15 : vector<256x128xf32>
    %cst_11 = arith.constant dense<0.000000e+00> : vector<256xf32>
    %17 = vector.multi_reduction <add>, %16, %cst_11 [1] : vector<256x128xf32> to vector<256xf32>
    %18 = vector.shape_cast %17 : vector<256xf32> to vector<256x1xf32>
    %19 = arith.mulf %16, %16 : vector<256x128xf32>
    %cst_12 = arith.constant dense<0.000000e+00> : vector<256xf32>
    %20 = vector.multi_reduction <add>, %19, %cst_12 [1] : vector<256x128xf32> to vector<256xf32>
    %21 = vector.shape_cast %20 : vector<256xf32> to vector<256x1xf32>
    %cst_13 = arith.constant 1.000000e-24 : f32
    %22 = vector.broadcast %cst_13 : f32 to vector<256x1xf32>
    %23 = arith.maximumf %21, %22 : vector<256x1xf32>
    %24 = math.rsqrt %23 : vector<256x1xf32>
    %25 = vector.broadcast %24 : vector<256x1xf32> to vector<256x128xf32>
    %26 = arith.mulf %16, %25 : vector<256x128xf32>
    %cst_14 = arith.constant 3.125000e-02 : f32
    %27 = vector.broadcast %cst_14 : f32 to vector<256x1xf32>
    %28 = arith.mulf %24, %27 : vector<256x1xf32>
    %29 = arith.mulf %18, %28 : vector<256x1xf32>
    %30 = arith.mulf %24, %24 : vector<256x1xf32>
    %31 = arith.mulf %21, %30 : vector<256x1xf32>
    %cst_15 = arith.constant 3.125000e-02 : f32
    %32 = vector.broadcast %cst_15 : f32 to vector<256x1xf32>
    %33 = arith.mulf %31, %32 : vector<256x1xf32>
    %34 = arith.mulf %29, %29 : vector<256x1xf32>
    %35 = arith.subf %33, %34 : vector<256x1xf32>
    %cst_16 = arith.constant 0.000000e+00 : f32
    %36 = vector.broadcast %cst_16 : f32 to vector<256x1xf32>
    %37 = arith.maximumf %35, %36 : vector<256x1xf32>
    %38 = vector.broadcast %29 : vector<256x1xf32> to vector<256x128xf32>
    %39 = arith.subf %26, %38 : vector<256x128xf32>
    %cst_17 = arith.constant 9.99999974E-6 : f32
    %40 = vector.broadcast %cst_17 : f32 to vector<256x1xf32>
    %41 = arith.addf %37, %40 : vector<256x1xf32>
    %42 = math.rsqrt %41 : vector<256x1xf32>
    %43 = vector.broadcast %42 : vector<256x1xf32> to vector<256x128xf32>
    %44 = arith.mulf %39, %43 : vector<256x128xf32>
    %c0_18 = arith.constant 0 : index
    %c0_19 = arith.constant 0 : index
    %45 = vector.load %arg6[%c0_18, %c0_19] : memref<1x128xf32, #tpu.memory_space<vmem>>, vector<1x128xf32>
    %46 = vector.broadcast %45 : vector<1x128xf32> to vector<256x128xf32>
    %47 = arith.mulf %44, %46 : vector<256x128xf32>
    %c0_20 = arith.constant 0 : index
    %c0_21 = arith.constant 0 : index
    %48 = vector.load %arg7[%c0_20, %c0_21] : memref<1x128xf32, #tpu.memory_space<vmem>>, vector<1x128xf32>
    %49 = vector.broadcast %48 : vector<1x128xf32> to vector<256x128xf32>
    %50 = arith.addf %47, %49 : vector<256x128xf32>
    %cst_22 = arith.constant 0.000000e+00 : f32
    %51 = vector.broadcast %cst_22 : f32 to vector<256x128xf32>
    %52 = arith.maximumf %50, %51 : vector<256x128xf32>
    %53 = arith.truncf %52 : vector<256x128xf32> to vector<256x128xbf16>
    %c0_23 = arith.constant 0 : index
    %c0_24 = arith.constant 0 : index
    %54 = vector.load %arg8[%c0_23, %c0_24] : memref<256x128xbf16, #tpu.memory_space<vmem>>, vector<256x128xbf16>
    tpu.vector_store %arg8[%c0_23, %c0_24], %53 {strides = array<i32>} : memref<256x128xbf16, #tpu.memory_space<vmem>>, vector<256x128xbf16>,
    return
  }
  func.func @transform_0(%arg0: i32) -> (i32, i32) {
    %c0_i32 = arith.constant 0 : i32
    %c0_i32_0 = arith.constant 0 : i32
    return %arg0, %c0_i32 : i32, i32
  }
  func.func @transform_1(%arg0: i32) -> (i32, i32) {
    %c0_i32 = arith.constant 0 : i32
    %c0_i32_0 = arith.constant 0 : i32
    return %arg0, %c0_i32 : i32, i32
  }
  func.func @transform_2(%arg0: i32) -> (i32, i32) {
    %c0_i32 = arith.constant 0 : i32
    %c0_i32_0 = arith.constant 0 : i32
    %c0_i32_1 = arith.constant 0 : i32
    return %c0_i32, %c0_i32_0 : i32, i32
  }
  func.func @transform_3(%arg0: i32) -> (i32, i32) {
    %c0_i32 = arith.constant 0 : i32
    %c0_i32_0 = arith.constant 0 : i32
    %c0_i32_1 = arith.constant 0 : i32
    return %c0_i32, %c0_i32_0 : i32, i32
  }
  func.func @transform_4(%arg0: i32) -> (i32, i32) {
    %c0_i32 = arith.constant 0 : i32
    %c0_i32_0 = arith.constant 0 : i32
    %c0_i32_1 = arith.constant 0 : i32
    return %c0_i32, %c0_i32_0 : i32, i32
  }
  func.func @transform_5(%arg0: i32) -> (i32, i32) {
    %c0_i32 = arith.constant 0 : i32
    %c0_i32_0 = arith.constant 0 : i32
    %c0_i32_1 = arith.constant 0 : i32
    return %c0_i32, %c0_i32_0 : i32, i32
  }
  func.func @transform_6(%arg0: i32) -> (i32, i32) {
    %c0_i32 = arith.constant 0 : i32
    %c0_i32_0 = arith.constant 0 : i32
    %c0_i32_1 = arith.constant 0 : i32
    return %c0_i32, %c0_i32_0 : i32, i32
  }
  func.func @transform_7(%arg0: i32) -> (i32, i32) {
    %c0_i32 = arith.constant 0 : i32
    %c0_i32_0 = arith.constant 0 : i32
    return %arg0, %c0_i32 : i32, i32
  }
}

</mosaic_0001>

<bundles_post_ra>
// kernel: tpu_custom_call.1
= control target key start
LH: loop header
LB: loop body
LE: loop exit
PB: predicated region body
PF: predicated region fallthrough
CT: control target
= control target key end

     0   :  { %12 = vsyncpa [#allocation3], 0  ;;  %s5449_s0 = inlined_call_operand.vmem [shape: bf16[256,256], index: 0, kind: input, shape index: {}]   ;;  %s5450_s1 = inlined_call_operand.vmem [shape: f32[256,1], index: 1, kind: input, shape index: {}]   ;;  %s5451_s2 = inlined_call_operand.hbm [shape: bf16[256,128], index: 2, kind: input, shape index: {}]   ;;  %s5452_s3 = inlined_call_operand.hbm [shape: bf16[256,128], index: 3, kind: input, shape index: {}]   ;;  %s5453_s4 = inlined_call_operand.vmem [shape: f32[1,128], index: 4, kind: input, shape index: {}]   ;;  %s5454_s5 = inlined_call_operand.vmem [shape: f32[1,128], index: 5, kind: input, shape index: {}]   ;;  %s5455_s6 = inlined_call_operand.vmem [shape: f32[1,128], index: 6, kind: input, shape index: {}]   ;;  %s5456_s7 = inlined_call_operand.hbm [shape: bf16[256,128], index: 7, kind: output, shape index: {}]  }
   0x1   :  { %13 = vsyncpa [#allocation6], 0 }
   0x2   :  { %14 = vsyncpa [#allocation4], 0  ;;  %s23_s26 = sshll.u32 %s5451_s2, 4  ;;  %s3476_s27 = smov [#allocation2]   ;;  %s24_s26 = int_to_ptr.hbm [resolvable:$true] %s23_s26 }
   0x3   :  { %s25_s28 = sshll.u32 %s3476_s27, 4  ;;  %s36_s8 = sshll.u32 %s5452_s3, 4  ;;  %s26_s28 = int_to_ptr.vmem [resolvable:$true] %s25_s28  ;;  %s37_s8 = int_to_ptr.hbm [resolvable:$true] %s36_s8 }
   0x4   :  { %s3477_s9 = smov 64   ;;  %s3478_s10 = smov 4  }
   0x5   :  { %31 = dma.hbm_to_vmem [thread:$0]  %s24_s26, 2048, %s26_s28, [#allocation3], %s3477_s9, %s3477_s9, %s3478_s10  }
   0x6   :  { %s3479_s11 = smov [#allocation5]  }
   0x7   :  { %s38_s12 = sshll.u32 %s3479_s11, 4  ;;  %s39_s12 = int_to_ptr.vmem [resolvable:$true] %s38_s12 }
   0x8   :  { %44 = dma.hbm_to_vmem [thread:$0]  %s37_s8, 2048, %s39_s12, [#allocation6], %s3477_s9, %s3477_s9, %s3478_s10  }
   0x9   :  { %3470 = dma.done.wait [#allocation3], 2048  }
   0xa   :  { %3471 = vsyncadd [#allocation3], 4294965248 }
   0xb   :  { %3472 = dma.done.wait [#allocation6], 2048  }
   0xc   :  { %3473 = vsyncadd [#allocation6], 4294965248  ;;  %v3480_v0 = vmov 0   ;;  %v596_v1 = vld [vmem:[%s5450_s1 + $0x10] sm:$0xff]  ;;  %v594_v2 = vld [vmem:[%s5450_s1] sm:$0xff]  ;;  %s2742_s30 = sshll.u32 %s5456_s7, 4  ;;  %s2743_s30 = int_to_ptr.hbm [resolvable:$true] %s2742_s30 }
   0xd   :  { %3260 = vset.pattern.permute.xlu1 %v3480_v0  ;;  %3259 = vset.pattern.permute.xlu0 %v3480_v0  ;;  %v3133_v3 = vld [vmem:[#allocation2 + $0x38] sm:$0xff]  ;;  %v3132_v5 = vld [vmem:[#allocation2 + $0x30] sm:$0xff]  ;;  %v595_v8 = vld [vmem:[%s5450_s1 + $0x8] sm:$0xff] }
   0xe   :  { %3261 = vset.pattern.permute.xlu2 %v3480_v0  ;;  %638 = vperm.xlu1 %3260, %v596_v1   ;;  %v3141_v4 = vld [vmem:[#allocation2 + $0x78] sm:$0xff]  ;;  %v3140_v6 = vld [vmem:[#allocation2 + $0x70] sm:$0xff]  ;;  %v3131_v9 = vld [vmem:[#allocation2 + $0x28] sm:$0xff] }
   0xf   :  { %628 = vperm.xlu0 %3259, %v594_v2   ;;  %416 = vmatpush.bf16.msra.mxu0 %v3133_v3  ;;  %v597_v7 = vld [vmem:[%s5450_s1 + $0x18] sm:$0xff]  ;;  %v3139_v10 = vld [vmem:[#allocation2 + $0x68] sm:$0xff]  ;;  %v598_v11 = vld [vmem:[%s5450_s1 + $0x20] sm:$0xff] }
  0x10   :  { %505 = vmatpush.bf16.msra.mxu1 %v3141_v4  ;;  %648 = vperm.xlu2 %3261, %v598_v11   ;;  %v3130_v12 = vld [vmem:[#allocation2 + $0x20] sm:$0xff]  ;;  %v599_v14 = vld [vmem:[%s5450_s1 + $0x28] sm:$0xff]  ;;  %v601_v15 = vld [vmem:[%s5450_s1 + $0x38] sm:$0xff] }
  0x11   :  { %v3138_v13 = vld [vmem:[#allocation2 + $0x60] sm:$0xff]  ;;  %v600_v16 = vld [vmem:[%s5450_s1 + $0x30] sm:$0xff]  ;;  %v3129_v17 = vld [vmem:[#allocation2 + $0x18] sm:$0xff] }
  0x12   :  { %v3137_v18 = vld [vmem:[#allocation2 + $0x58] sm:$0xff]  ;;  %v3128_v19 = vld [vmem:[#allocation2 + $0x10] sm:$0xff]  ;;  %v602_v21 = vld [vmem:[%s5450_s1 + $0x40] sm:$0xff] }
  0x13   :  { %417 = vmatpush.bf16.msra.mxu0 %v3132_v5  ;;  %v3136_v20 = vld [vmem:[#allocation2 + $0x50] sm:$0xff]  ;;  %v603_v23 = vld [vmem:[%s5450_s1 + $0x48] sm:$0xff]  ;;  %v3126_v26 = vld [vmem:[#allocation2] sm:$0xff] }
  0x14   :  { %506 = vmatpush.bf16.msra.mxu1 %v3140_v6  ;;  %v604_v22 = vld [vmem:[%s5450_s1 + $0x50] sm:$0xff]  ;;  %v3127_v24 = vld [vmem:[#allocation2 + $0x8] sm:$0xff]  ;;  %v3134_v27 = vld [vmem:[#allocation2 + $0x40] sm:$0xff] }
  0x15   :  { %v3135_v25 = vld [vmem:[#allocation2 + $0x48] sm:$0xff]  ;;  %v2760_v28 = vld [vmem:[%s5449_s0] sm:$0xf]  ;;  %v3094_v30 = vld [vmem:[%s5449_s0 + $0x4] sm:$0xf] }
  0x16   :  { %643 = vperm.xlu1 %3260, %v597_v7   ;;  %v3095_v29 = vld [vmem:[%s5449_s0 + $0x4] sm:$0xf0]  ;;  %v2762_v31 = vld [vmem:[%s5449_s0 + $0x8] sm:$0xf0]  ;;  %v605_v32 = vld [vmem:[%s5450_s1 + $0x58] sm:$0xff] }
  0x17   :  { %633 = vperm.xlu0 %3259, %v595_v8   ;;  %418 = vmatpush.bf16.msra.mxu0 %v3131_v9  ;;  %v607_v33 = vld [vmem:[%s5450_s1 + $0x68] sm:$0xff]  ;;  %v606_v34 = vld [vmem:[%s5450_s1 + $0x60] sm:$0xff]  ;;  %v2761_v35 = vor.u32 %v3095_v29, %v2760_v28  ;;  %v2765_v36 = vor.u32 %v3094_v30, %v2762_v31  ;;  %v608_v37 = vld [vmem:[%s5450_s1 + $0x70] sm:$0xff] }
  0x18   :  { %507 = vmatpush.bf16.msra.mxu1 %v3139_v10  ;;  %653 = vperm.xlu2 %3261, %v599_v14   ;;  %v610_v38 = vld [vmem:[%s5450_s1 + $0x80] sm:$0xff]  ;;  %v609_v39 = vld [vmem:[%s5450_s1 + $0x78] sm:$0xff]  ;;  %v2768_v40 = vld [vmem:[%s5449_s0 + $0x10] sm:$0xf] }
  0x19   :  { %v3097_v41 = vld [vmem:[%s5449_s0 + $0x14] sm:$0xf0]  ;;  %v3096_v42 = vld [vmem:[%s5449_s0 + $0x14] sm:$0xf]  ;;  %v2770_v43 = vld [vmem:[%s5449_s0 + $0x18] sm:$0xf0] }
  0x1a   :  { %v611_v44 = vld [vmem:[%s5450_s1 + $0x88] sm:$0xff]  ;;  %v613_v45 = vld [vmem:[%s5450_s1 + $0x98] sm:$0xff]  ;;  %v612_v46 = vld [vmem:[%s5450_s1 + $0x90] sm:$0xff]  ;;  %v2769_v47 = vor.u32 %v3097_v41, %v2768_v40  ;;  %v2773_v48 = vor.u32 %v3096_v42, %v2770_v43 }
  0x1b   :  { %419 = vmatpush.bf16.msra.mxu0 %v3130_v12  ;;  %v614_v49 = vld [vmem:[%s5450_s1 + $0xa0] sm:$0xff]  ;;  %v616_v50 = vld [vmem:[%s5450_s1 + $0xb0] sm:$0xff]  ;;  %v615_v51 = vld [vmem:[%s5450_s1 + $0xa8] sm:$0xff] }
  0x1c   :  { %508 = vmatpush.bf16.msra.mxu1 %v3138_v13  ;;  %v2776_v52 = vld [vmem:[%s5449_s0 + $0x20] sm:$0xf]  ;;  %v3099_v53 = vld [vmem:[%s5449_s0 + $0x24] sm:$0xf0]  ;;  %v3098_v54 = vld [vmem:[%s5449_s0 + $0x24] sm:$0xf] }
  0x1d   :  { %v2778_v55 = vld [vmem:[%s5449_s0 + $0x28] sm:$0xf0]  ;;  %v617_v56 = vld [vmem:[%s5450_s1 + $0xb8] sm:$0xff]  ;;  %v618_v58 = vld [vmem:[%s5450_s1 + $0xc0] sm:$0xff]  ;;  %v2777_v59 = vor.u32 %v3099_v53, %v2776_v52 }
  0x1e   :  { %663 = vperm.xlu1 %3260, %v601_v15   ;;  %v619_v57 = vld [vmem:[%s5450_s1 + $0xc8] sm:$0xff]  ;;  %v2781_v60 = vor.u32 %v3098_v54, %v2778_v55  ;;  %v620_v61 = vld [vmem:[%s5450_s1 + $0xd0] sm:$0xff]  ;;  %v622_v62 = vld [vmem:[%s5450_s1 + $0xe0] sm:$0xff] }
  0x1f   :  { %658 = vperm.xlu0 %3259, %v600_v16   ;;  %420 = vmatpush.bf16.msra.mxu0 %v3129_v17  ;;  %v621_v63 = vld [vmem:[%s5450_s1 + $0xd8] sm:$0xff]  ;;  %v2784_v0 = vld [vmem:[%s5449_s0 + $0x30] sm:$0xf]  ;;  %v3100_v2 = vld [vmem:[%s5449_s0 + $0x34] sm:$0xf] }
  0x20   :  { %509 = vmatpush.bf16.msra.mxu1 %v3137_v18  ;;  %668 = vperm.xlu2 %3261, %v602_v21   ;;  %v3101_v1 = vld [vmem:[%s5449_s0 + $0x34] sm:$0xf0]  ;;  %v2786_v3 = vld [vmem:[%s5449_s0 + $0x38] sm:$0xf0]  ;;  %v623_v4 = vld [vmem:[%s5450_s1 + $0xe8] sm:$0xff] }
  0x21   :  { %v625_v5 = vld [vmem:[%s5450_s1 + $0xf8] sm:$0xff]  ;;  %v624_v6 = vld [vmem:[%s5450_s1 + $0xf0] sm:$0xff]  ;;  %v2785_v7 = vor.u32 %v3101_v1, %v2784_v0  ;;  %v2789_v8 = vor.u32 %v3100_v2, %v2786_v3  ;;  %v2792_v9 = vld [vmem:[%s5449_s0 + $0x40] sm:$0xf] }
  0x22   :  { %v3103_v10 = vld [vmem:[%s5449_s0 + $0x44] sm:$0xf0]  ;;  %v3102_v11 = vld [vmem:[%s5449_s0 + $0x44] sm:$0xf]  ;;  %v2794_v12 = vld [vmem:[%s5449_s0 + $0x48] sm:$0xf0] }
  0x23   :  { %421 = vmatpush.bf16.msra.mxu0 %v3128_v19  ;;  %v2793_v13 = vor.u32 %v3103_v10, %v2792_v9  ;;  %v2797_v14 = vor.u32 %v3102_v11, %v2794_v12  ;;  %v2800_v15 = vld [vmem:[%s5449_s0 + $0x50] sm:$0xf]  ;;  %v3105_v16 = vld [vmem:[%s5449_s0 + $0x54] sm:$0xf0]  ;;  %v3104_v17 = vld [vmem:[%s5449_s0 + $0x54] sm:$0xf] }
  0x24   :  { %510 = vmatpush.bf16.msra.mxu1 %v3136_v20  ;;  %v2802_v18 = vld [vmem:[%s5449_s0 + $0x58] sm:$0xf0]  ;;  %v3156_v20 = vld [vmem:[#allocation5 + $0x70] sm:$0xff]  ;;  %v2801_v21 = vor.u32 %v3105_v16, %v2800_v15  ;;  %v2808_v28 = vld [vmem:[%s5449_s0 + $0x60] sm:$0xf] }
  0x25   :  { %v3157_v19 = vld [vmem:[#allocation5 + $0x78] sm:$0xff]  ;;  %v3107_v29 = vld [vmem:[%s5449_s0 + $0x64] sm:$0xf0]  ;;  %v3106_v30 = vld [vmem:[%s5449_s0 + $0x64] sm:$0xf] }
  0x26   :  { %678 = vperm.xlu1 %3260, %v604_v22   ;;  %1263 = vmatpush.bf16.msra.mxu3 %v3157_v19  ;;  %v2805_v22 = vor.u32 %v3104_v17, %v2802_v18  ;;  %v2810_v31 = vld [vmem:[%s5449_s0 + $0x68] sm:$0xf0]  ;;  %v3150_v40 = vld [vmem:[#allocation5 + $0x40] sm:$0xff]  ;;  %v2816_v42 = vld [vmem:[%s5449_s0 + $0x70] sm:$0xf] }
  0x27   :  { %673 = vperm.xlu0 %3259, %v603_v23   ;;  %422 = vmatpush.bf16.msra.mxu0 %v3127_v24  ;;  %v3149_v23 = vld [vmem:[#allocation5 + $0x38] sm:$0xff]  ;;  %v3155_v24 = vld [vmem:[#allocation5 + $0x68] sm:$0xff]  ;;  %v3078_v43 = vld [vmem:[#allocation2] sm:$0xff] }
  0x28   :  { %511 = vmatpush.bf16.msra.mxu1 %v3135_v25  ;;  %683 = vperm.xlu2 %3261, %v605_v32   ;;  %v3148_v25 = vld [vmem:[#allocation5 + $0x30] sm:$0xff]  ;;  %v3153_v32 = vld [vmem:[#allocation5 + $0x58] sm:$0xff]  ;;  %v3143_v41 = vld [vmem:[#allocation5 + $0x8] sm:$0xff] }
  0x29   :  { %1174 = vmatpush.bf16.msra.mxu2 %v3149_v23  ;;  %v3110_v52 = vld [vmem:[%s5449_s0 + $0x84] sm:$0xf]  ;;  %v2826_v53 = vld [vmem:[%s5449_s0 + $0x88] sm:$0xf0] }
  0x2a   :  { %1264 = vmatpush.bf16.msra.mxu3 %v3156_v20  ;;  %v3079_v54 = vld [vmem:[#allocation2 + $0x8] sm:$0xff] }
  0x2b   :  { %423 = vmatpush.bf16.msra.mxu0 %v3126_v26  ;;  %v3154_v26 = vld [vmem:[#allocation5 + $0x60] sm:$0xff] }
  0x2c   :  { %512 = vmatpush.bf16.msra.mxu1 %v3134_v27  ;;  %v3147_v27 = vld [vmem:[#allocation5 + $0x28] sm:$0xff] }
  0x2d   :  { %1175 = vmatpush.bf16.msra.mxu2 %v3148_v25 }
  0x2e   :  { %693 = vperm.xlu1 %3260, %v607_v33   ;;  %424 = vmatmul.bf16.vlgmr.msra.gmra.mxu0 %v2761_v35  ;;  %v3146_v33 = vld [vmem:[#allocation5 + $0x20] sm:$0xff]  ;;  %v2813_v35 = vor.u32 %v3106_v30, %v2810_v31  ;;  %v2842_v30 = vld [vmem:[%s5449_s0 + $0xa8] sm:$0xf0] }
  0x2f   :  { %688 = vperm.xlu0 %3259, %v606_v34   ;;  %513 = vmatmul.bf16.vlgmr.msra.gmra.mxu1 %v2765_v36  ;;  %v2809_v34 = vor.u32 %v3107_v29, %v2808_v28  ;;  %v3152_v36 = vld [vmem:[#allocation5 + $0x50] sm:$0xff]  ;;  %v3115_v28 = vld [vmem:[%s5449_s0 + $0xa4] sm:$0xf0]  ;;  %v3114_v29 = vld [vmem:[%s5449_s0 + $0xa4] sm:$0xf] }
  0x30   :  { %698 = vperm.xlu2 %3261, %v608_v37   ;;  %1265 = vmatpush.bf16.msra.mxu3 %v3155_v24  ;;  %v3145_v37 = vld [vmem:[#allocation5 + $0x18] sm:$0xff] }
  0x31   :  { %1176 = vmatpush.bf16.msra.mxu2 %v3147_v27  ;;  %v3081_v27 = vld [vmem:[#allocation2 + $0x18] sm:$0xff] }
  0x34   :  { %1266 = vmatpush.bf16.msra.mxu3 %v3154_v26  ;;  %v2840_v26 = vld [vmem:[%s5449_s0 + $0xa0] sm:$0xf] }
  0x35   :  { %1177 = vmatpush.bf16.msra.mxu2 %v3146_v33  ;;  %v2841_v33 = vor.u32 %v3115_v28, %v2840_v26  ;;  %v2864_v28 = vld [vmem:[%s5449_s0 + $0xd0] sm:$0xf] }
  0x36   :  { %708 = vperm.xlu1 %3260, %v610_v38   ;;  %v3151_v38 = vld [vmem:[#allocation5 + $0x48] sm:$0xff] }
  0x37   :  { %703 = vperm.xlu0 %3259, %v609_v39   ;;  %v3144_v39 = vld [vmem:[#allocation5 + $0x10] sm:$0xff] }
  0x38   :  { %713 = vperm.xlu2 %3261, %v611_v44   ;;  %1267 = vmatpush.bf16.msra.mxu3 %v3153_v32  ;;  %v3109_v44 = vld [vmem:[%s5449_s0 + $0x74] sm:$0xf0] }
  0x39   :  { %1178 = vmatpush.bf16.msra.mxu2 %v3145_v37 }
  0x3c   :  { %1268 = vmatpush.bf16.msra.mxu3 %v3152_v36 }
  0x3d   :  { %1179 = vmatpush.bf16.msra.mxu2 %v3144_v39 }
  0x3e   :  { %723 = vperm.xlu1 %3260, %v613_v45   ;;  %429 = vmatmul.bf16.gmra.mxu0 %v2769_v47  ;;  %v3108_v45 = vld [vmem:[%s5449_s0 + $0x74] sm:$0xf]  ;;  %v3142_v47 = vld [vmem:[#allocation5] sm:$0xff] }
  0x3f   :  { %718 = vperm.xlu0 %3259, %v612_v46   ;;  %518 = vmatmul.bf16.gmra.mxu1 %v2773_v48  ;;  %v2818_v46 = vld [vmem:[%s5449_s0 + $0x78] sm:$0xf0]  ;;  %v2817_v48 = vor.u32 %v3109_v44, %v2816_v42 }
  0x40   :  { %728 = vperm.xlu2 %3261, %v614_v49   ;;  %1269 = vmatpush.bf16.msra.mxu3 %v3151_v38  ;;  %v2821_v49 = vor.u32 %v3108_v45, %v2818_v46 }
  0x41   :  { %1180 = vmatpush.bf16.msra.mxu2 %v3143_v41 }
  0x44   :  { %1270 = vmatpush.bf16.msra.mxu3 %v3150_v40 }
  0x45   :  { %1181 = vmatpush.bf16.msra.mxu2 %v3142_v47 }
  0x46   :  { %738 = vperm.xlu1 %3260, %v616_v50   ;;  %v2824_v50 = vld [vmem:[%s5449_s0 + $0x80] sm:$0xf] }
  0x47   :  { %733 = vperm.xlu0 %3259, %v615_v51   ;;  %1271 = vmatmul.bf16.vlgmr.msra.gmra.mxu3 %v3078_v43  ;;  %v3111_v51 = vld [vmem:[%s5449_s0 + $0x84] sm:$0xf0] }
  0x48   :  { %743 = vperm.xlu2 %3261, %v617_v56   ;;  %v2825_v56 = vor.u32 %v3111_v51, %v2824_v50  ;;  %v3116_v50 = vld [vmem:[%s5449_s0 + $0xb4] sm:$0xf]  ;;  %v2850_v51 = vld [vmem:[%s5449_s0 + $0xb8] sm:$0xf0] }
  0x4e   :  { %753 = vperm.xlu1 %3260, %v619_v57   ;;  %434 = vmatmul.bf16.gmra.mxu0 %v2777_v59  ;;  %v2829_v57 = vor.u32 %v3110_v52, %v2826_v53  ;;  %v3082_v52 = vld [vmem:[#allocation2 + $0x20] sm:$0xff] }
  0x4f   :  { %748 = vperm.xlu0 %3259, %v618_v58   ;;  %523 = vmatmul.bf16.gmra.mxu1 %v2781_v60 }
  0x50   :  { %758 = vperm.xlu2 %3261, %v620_v61  }
  0x56   :  { %768 = vperm.xlu1 %3260, %v622_v62  }
  0x57   :  { %763 = vperm.xlu0 %3259, %v621_v63   ;;  %1276 = vmatmul.bf16.gmra.mxu3 %v3079_v54 }
  0x58   :  { %773 = vperm.xlu2 %3261, %v623_v4   ;;  %v2832_v4 = vld [vmem:[%s5449_s0 + $0x90] sm:$0xf] }
  0x5e   :  { %783 = vperm.xlu1 %3260, %v625_v5   ;;  %439 = vmatmul.bf16.gmra.mxu0 %v2785_v7  ;;  %v3080_v5 = vld [vmem:[#allocation2 + $0x10] sm:$0xff] }
  0x5f   :  { %778 = vperm.xlu0 %3259, %v624_v6   ;;  %528 = vmatmul.bf16.gmra.mxu1 %v2789_v8  ;;  %v3113_v6 = vld [vmem:[%s5449_s0 + $0x94] sm:$0xf0]  ;;  %v3112_v7 = vld [vmem:[%s5449_s0 + $0x94] sm:$0xf]  ;;  %v2834_v8 = vld [vmem:[%s5449_s0 + $0x98] sm:$0xf0] }
  0x60   :  { %v2833_v11 = vor.u32 %v3113_v6, %v2832_v4  ;;  %v2837_v12 = vor.u32 %v3112_v7, %v2834_v8  ;;  %v2856_v6 = vld [vmem:[%s5449_s0 + $0xc0] sm:$0xf]  ;;  %v3119_v7 = vld [vmem:[%s5449_s0 + $0xc4] sm:$0xf0]  ;;  %v3118_v8 = vld [vmem:[%s5449_s0 + $0xc4] sm:$0xf] }
  0x67   :  { %1281 = vmatmul.bf16.gmra.mxu3 %v3080_v5 }
  0x6a   :  { %v649_v32 = vpop.permute.xlu2 %648 }
  0x6e   :  { %444 = vmatmul.bf16.gmra.mxu0 %v2793_v13 }
  0x6f   :  { %533 = vmatmul.bf16.gmra.mxu1 %v2797_v14 }
  0x72   :  { %v654_v45 = vpop.permute.xlu2 %653 }
  0x77   :  { %1286 = vmatmul.bf16.gmra.mxu3 %v3081_v27 }
  0x7e   :  { %449 = vmatmul.bf16.gmra.mxu0 %v2801_v21 }
  0x7f   :  { %538 = vmatmul.bf16.gmra.mxu1 %v2805_v22 }
  0x80   :  { %v639_v10 = vpop.permute.xlu1 %638 }
  0x81   :  { %v629_v55 = vpop.permute.xlu0 %628 }
  0x87   :  { %1291 = vmatmul.bf16.gmra.mxu3 %v3082_v52  ;;  %v3122_v52 = vld [vmem:[%s5449_s0 + $0xe4] sm:$0xf] }
  0x88   :  { %v644_v23 = vpop.permute.xlu1 %643 }
  0x89   :  { %v634_v1 = vpop.permute.xlu0 %633 }
  0x8e   :  { %454 = vmatmul.bf16.gmra.mxu0 %v2809_v34  ;;  %v2845_v34 = vor.u32 %v3114_v29, %v2842_v30  ;;  %v3121_v29 = vld [vmem:[%s5449_s0 + $0xd4] sm:$0xf0]  ;;  %v3120_v30 = vld [vmem:[%s5449_s0 + $0xd4] sm:$0xf] }
  0x8f   :  { %543 = vmatmul.bf16.gmra.mxu1 %v2813_v35 }
  0x9e   :  { %459 = vmatmul.bf16.gmra.mxu0 %v2817_v48  ;;  %v2848_v48 = vld [vmem:[%s5449_s0 + $0xb0] sm:$0xf] }
  0x9f   :  { %548 = vmatmul.bf16.gmra.mxu1 %v2821_v49  ;;  %v3117_v49 = vld [vmem:[%s5449_s0 + $0xb4] sm:$0xf0] }
  0xa0   :  { %v2849_v54 = vor.u32 %v3117_v49, %v2848_v48 }
  0xab   :  { %v425_v58 = vpop.f32.mrf.mxu0 }
  0xac   :  { %v514_v59 = vpop.f32.mrf.mxu1 }
  0xad   :  { %v515_v60 = vadd.f32 %v514_v59, %v425_v58 }
  0xae   :  { %464 = vmatmul.bf16.gmra.mxu0 %v2825_v56 }
  0xaf   :  { %553 = vmatmul.bf16.gmra.mxu1 %v2829_v57  ;;  %v786_v61 = vmul.f32 %v629_v55, %v515_v60  ;;  %v2853_v55 = vor.u32 %v3116_v50, %v2850_v51  ;;  %v2872_v50 = vld [vmem:[%s5449_s0 + $0xe0] sm:$0xf]  ;;  %v3123_v51 = vld [vmem:[%s5449_s0 + $0xe4] sm:$0xf0] }
  0xb1   :  { %v818_v2 = vpack.c.bf16 %v786_v61, %v786_v61 }
  0xb3   :  { %v427_v62 = vpop.f32.mrf.mxu0  ;;  %v882_v13 = vunpack.c.l.b16 %v818_v2 }
  0xb4   :  { %v516_v63 = vpop.f32.mrf.mxu1 }
  0xb5   :  { %v517_v0 = vadd.f32 %v516_v63, %v427_v62  ;;  %v659_v62 = vpop.permute.xlu0 %658 }
  0xb7   :  { %v787_v3 = vmul.f32 %v634_v1, %v517_v0 }
  0xb9   :  { %v819_v9 = vpack.c.bf16 %v787_v3, %v787_v3  ;;  %v664_v3 = vpop.permute.xlu1 %663 }
  0xbb   :  { %v883_v14 = vunpack.c.l.b16 %v819_v9  ;;  %v430_v15 = vpop.f32.mrf.mxu0  ;;  %v2858_v9 = vld [vmem:[%s5449_s0 + $0xc8] sm:$0xf0] }
  0xbc   :  { %v519_v16 = vpop.f32.mrf.mxu1 }
  0xbd   :  { %v914_v17 = vpack.c.b16 %v883_v14, %v882_v13  ;;  %v520_v18 = vadd.f32 %v519_v16, %v430_v15  ;;  %v2861_v13 = vor.u32 %v3118_v8, %v2858_v9  ;;  %v2880_v8 = vld [vmem:[%s5449_s0 + $0xf0] sm:$0xf]  ;;  %v3125_v9 = vld [vmem:[%s5449_s0 + $0xf4] sm:$0xf0] }
  0xbe   :  { %469 = vmatmul.bf16.gmra.mxu0 %v2833_v11 }
  0xbf   :  { %558 = vmatmul.bf16.gmra.mxu1 %v2837_v12  ;;  %1182 = vmatmul.bf16.vlgmr.msra.gmra.mxu2 %v914_v17  ;;  %v788_v19 = vmul.f32 %v639_v10, %v520_v18  ;;  %v3083_v10 = vld [vmem:[#allocation2 + $0x28] sm:$0xff]  ;;  %v2857_v12 = vor.u32 %v3119_v7, %v2856_v6 }
  0xc0   :  { %1296 = vmatmul.bf16.gmra.mxu3 %v3083_v10  ;;  %v3124_v10 = vld [vmem:[%s5449_s0 + $0xf4] sm:$0xf] }
  0xc1   :  { %v820_v24 = vpack.c.bf16 %v788_v19, %v788_v19 }
  0xc3   :  { %v432_v20 = vpop.f32.mrf.mxu0  ;;  %v884_v35 = vunpack.c.l.b16 %v820_v24 }
  0xc4   :  { %v521_v21 = vpop.f32.mrf.mxu1 }
  0xc5   :  { %v522_v22 = vadd.f32 %v521_v21, %v432_v20  ;;  %v669_v20 = vpop.permute.xlu2 %668 }
  0xc7   :  { %v789_v25 = vmul.f32 %v644_v23, %v522_v22 }
  0xc9   :  { %v821_v31 = vpack.c.bf16 %v789_v25, %v789_v25  ;;  %v674_v25 = vpop.permute.xlu0 %673 }
  0xcb   :  { %v885_v36 = vunpack.c.l.b16 %v821_v31  ;;  %v435_v37 = vpop.f32.mrf.mxu0  ;;  %v2866_v31 = vld [vmem:[%s5449_s0 + $0xd8] sm:$0xf0] }
  0xcc   :  { %v524_v38 = vpop.f32.mrf.mxu1 }
  0xcd   :  { %v915_v39 = vpack.c.b16 %v885_v36, %v884_v35  ;;  %v525_v40 = vadd.f32 %v524_v38, %v435_v37  ;;  %v2869_v35 = vor.u32 %v3120_v30, %v2866_v31 }
  0xce   :  { %474 = vmatmul.bf16.gmra.mxu0 %v2841_v33 }
  0xcf   :  { %563 = vmatmul.bf16.gmra.mxu1 %v2845_v34  ;;  %1187 = vmatmul.bf16.gmra.mxu2 %v915_v39  ;;  %v790_v41 = vmul.f32 %v649_v32, %v525_v40  ;;  %v3084_v32 = vld [vmem:[#allocation2 + $0x30] sm:$0xff]  ;;  %v2865_v34 = vor.u32 %v3121_v29, %v2864_v28 }
  0xd0   :  { %1301 = vmatmul.bf16.gmra.mxu3 %v3084_v32  ;;  %v3087_v32 = vld [vmem:[#allocation2 + $0x48] sm:$0xff] }
  0xd1   :  { %v822_v46 = vpack.c.bf16 %v790_v41, %v790_v41 }
  0xd3   :  { %v437_v42 = vpop.f32.mrf.mxu0  ;;  %v886_v56 = vunpack.c.l.b16 %v822_v46 }
  0xd4   :  { %v526_v43 = vpop.f32.mrf.mxu1 }
  0xd5   :  { %v527_v44 = vadd.f32 %v526_v43, %v437_v42  ;;  %v679_v42 = vpop.permute.xlu1 %678 }
  0xd7   :  { %v791_v47 = vmul.f32 %v654_v45, %v527_v44 }
  0xd9   :  { %v823_v53 = vpack.c.bf16 %v791_v47, %v791_v47  ;;  %v684_v47 = vpop.permute.xlu2 %683 }
  0xdb   :  { %v887_v57 = vunpack.c.l.b16 %v823_v53  ;;  %v440_v58 = vpop.f32.mrf.mxu0  ;;  %v2874_v53 = vld [vmem:[%s5449_s0 + $0xe8] sm:$0xf0] }
  0xdc   :  { %v529_v59 = vpop.f32.mrf.mxu1 }
  0xdd   :  { %v916_v60 = vpack.c.b16 %v887_v57, %v886_v56  ;;  %v530_v61 = vadd.f32 %v529_v59, %v440_v58  ;;  %v2873_v56 = vor.u32 %v3123_v51, %v2872_v50  ;;  %v2877_v57 = vor.u32 %v3122_v52, %v2874_v53  ;;  %v3088_v50 = vld [vmem:[#allocation2 + $0x50] sm:$0xff] }
  0xde   :  { %479 = vmatmul.bf16.gmra.mxu0 %v2849_v54  ;;  %v3085_v54 = vld [vmem:[#allocation2 + $0x38] sm:$0xff] }
  0xdf   :  { %568 = vmatmul.bf16.gmra.mxu1 %v2853_v55  ;;  %1192 = vmatmul.bf16.gmra.mxu2 %v916_v60  ;;  %v792_v63 = vmul.f32 %v659_v62, %v530_v61 }
  0xe0   :  { %1306 = vmatmul.bf16.gmra.mxu3 %v3085_v54 }
  0xe1   :  { %v824_v4 = vpack.c.bf16 %v792_v63, %v792_v63 }
  0xe3   :  { %v442_v0 = vpop.f32.mrf.mxu0  ;;  %v888_v14 = vunpack.c.l.b16 %v824_v4 }
  0xe4   :  { %v531_v1 = vpop.f32.mrf.mxu1 }
  0xe5   :  { %v532_v2 = vadd.f32 %v531_v1, %v442_v0  ;;  %v689_v0 = vpop.permute.xlu0 %688 }
  0xe7   :  { %v793_v5 = vmul.f32 %v664_v3, %v532_v2 }
  0xe9   :  { %v825_v11 = vpack.c.bf16 %v793_v5, %v793_v5  ;;  %v694_v5 = vpop.permute.xlu1 %693 }
  0xeb   :  { %v889_v15 = vunpack.c.l.b16 %v825_v11  ;;  %v445_v16 = vpop.f32.mrf.mxu0  ;;  %v2882_v11 = vld [vmem:[%s5449_s0 + $0xf8] sm:$0xf0] }
  0xec   :  { %v534_v17 = vpop.f32.mrf.mxu1 }
  0xed   :  { %v917_v18 = vpack.c.b16 %v889_v15, %v888_v14  ;;  %v535_v19 = vadd.f32 %v534_v17, %v445_v16  ;;  %v2881_v14 = vor.u32 %v3125_v9, %v2880_v8  ;;  %v2885_v15 = vor.u32 %v3124_v10, %v2882_v11  ;;  %v704_v28 = vpop.permute.xlu0 %703  ;;  %v3089_v8 = vld [vmem:[#allocation2 + $0x58] sm:$0xff] }
  0xee   :  { %484 = vmatmul.bf16.gmra.mxu0 %v2857_v12  ;;  %v3086_v12 = vld [vmem:[#allocation2 + $0x40] sm:$0xff] }
  0xef   :  { %573 = vmatmul.bf16.gmra.mxu1 %v2861_v13  ;;  %1197 = vmatmul.bf16.gmra.mxu2 %v917_v18  ;;  %v794_v21 = vmul.f32 %v669_v20, %v535_v19 }
  0xf0   :  { %1311 = vmatmul.bf16.gmra.mxu3 %v3086_v12 }
  0xf1   :  { %v826_v26 = vpack.c.bf16 %v794_v21, %v794_v21  ;;  %v1272_v21 = vpop.f32.mrf.mxu3 }
  0xf3   :  { %v447_v22 = vpop.f32.mrf.mxu0  ;;  %v890_v36 = vunpack.c.l.b16 %v826_v26 }
  0xf4   :  { %v536_v23 = vpop.f32.mrf.mxu1 }
  0xf5   :  { %v537_v24 = vadd.f32 %v536_v23, %v447_v22  ;;  %v699_v23 = vpop.permute.xlu2 %698 }
  0xf7   :  { %v795_v27 = vmul.f32 %v674_v25, %v537_v24 }
  0xf9   :  { %v827_v33 = vpack.c.bf16 %v795_v27, %v795_v27  ;;  %v1274_v31 = vpop.f32.mrf.mxu3 }
  0xfb   :  { %v891_v37 = vunpack.c.l.b16 %v827_v33  ;;  %v450_v38 = vpop.f32.mrf.mxu0 }
  0xfc   :  { %v539_v39 = vpop.f32.mrf.mxu1 }
  0xfd   :  { %v918_v40 = vpack.c.b16 %v891_v37, %v890_v36  ;;  %v540_v41 = vadd.f32 %v539_v39, %v450_v38 }
  0xfe   :  { %489 = vmatmul.bf16.gmra.mxu0 %v2865_v34 }
  0xff   :  { %578 = vmatmul.bf16.gmra.mxu1 %v2869_v35  ;;  %1202 = vmatmul.bf16.gmra.mxu2 %v918_v40  ;;  %v796_v43 = vmul.f32 %v679_v42, %v540_v41  ;;  %v709_v41 = vpop.permute.xlu1 %708 }
 0x100   :  { %1316 = vmatmul.bf16.gmra.mxu3 %v3087_v32 }
 0x101   :  { %v828_v48 = vpack.c.bf16 %v796_v43, %v796_v43  ;;  %v1277_v40 = vpop.f32.mrf.mxu3 }
 0x103   :  { %v452_v44 = vpop.f32.mrf.mxu0  ;;  %v892_v58 = vunpack.c.l.b16 %v828_v48 }
 0x104   :  { %v541_v45 = vpop.f32.mrf.mxu1 }
 0x105   :  { %v542_v46 = vadd.f32 %v541_v45, %v452_v44 }
 0x107   :  { %v797_v49 = vmul.f32 %v684_v47, %v542_v46  ;;  %v714_v46 = vpop.permute.xlu2 %713 }
 0x109   :  { %v829_v55 = vpack.c.bf16 %v797_v49, %v797_v49  ;;  %v3822_v53 = vpop.f32.mrf.mxu3 }
 0x10b   :  { %v893_v59 = vunpack.c.l.b16 %v829_v55  ;;  %v455_v60 = vpop.f32.mrf.mxu0 }
 0x10c   :  { %v544_v61 = vpop.f32.mrf.mxu1 }
 0x10d   :  { %v919_v62 = vpack.c.b16 %v893_v59, %v892_v58  ;;  %v545_v63 = vadd.f32 %v544_v61, %v455_v60  ;;  %v3827_v58 = vld [vmem:[%s5453_s4] ss:$0 sm:$0xff]  ;;  %v719_v59 = vpop.permute.xlu0 %718 }
 0x10e   :  { %494 = vmatmul.bf16.gmra.mxu0 %v2873_v56 }
 0x10f   :  { %583 = vmatmul.bf16.gmra.mxu1 %v2877_v57  ;;  %1207 = vmatmul.bf16.gmra.mxu2 %v919_v62  ;;  %v798_v1 = vmul.f32 %v689_v0, %v545_v63 }
 0x110   :  { %1321 = vmatmul.bf16.gmra.mxu3 %v3088_v50 }
 0x111   :  { %v830_v6 = vpack.c.bf16 %v798_v1, %v798_v1 }
 0x113   :  { %v457_v2 = vpop.f32.mrf.mxu0  ;;  %v894_v16 = vunpack.c.l.b16 %v830_v6 }
 0x114   :  { %v546_v3 = vpop.f32.mrf.mxu1 }
 0x115   :  { %v547_v4 = vadd.f32 %v546_v3, %v457_v2  ;;  %v3830_v2 = vpop.f32.mrf.mxu3  ;;  %v724_v3 = vpop.permute.xlu1 %723 }
 0x117   :  { %v799_v7 = vmul.f32 %v694_v5, %v547_v4 }
 0x119   :  { %v831_v13 = vpack.c.bf16 %v799_v7, %v799_v7 }
 0x11b   :  { %v895_v17 = vunpack.c.l.b16 %v831_v13  ;;  %v460_v18 = vpop.f32.mrf.mxu0 }
 0x11c   :  { %v549_v19 = vpop.f32.mrf.mxu1 }
 0x11d   :  { %v920_v20 = vpack.c.b16 %v895_v17, %v894_v16  ;;  %v550_v22 = vadd.f32 %v549_v19, %v460_v18  ;;  %v1284_v19 = vpop.f32.mrf.mxu3 }
 0x11e   :  { %499 = vmatmul.bf16.gmra.mxu0 %v2881_v14 }
 0x11f   :  { %588 = vmatmul.bf16.gmra.mxu1 %v2885_v15  ;;  %1212 = vmatmul.bf16.gmra.mxu2 %v920_v20  ;;  %v800_v24 = vmul.f32 %v699_v23, %v550_v22  ;;  %v729_v20 = vpop.permute.xlu2 %728 }
 0x120   :  { %1326 = vmatmul.bf16.gmra.mxu3 %v3089_v8 }
 0x121   :  { %v832_v29 = vpack.c.bf16 %v800_v24, %v800_v24 }
 0x123   :  { %v462_v25 = vpop.f32.mrf.mxu0  ;;  %v896_v34 = vunpack.c.l.b16 %v832_v29 }
 0x124   :  { %v551_v26 = vpop.f32.mrf.mxu1 }
 0x125   :  { %v552_v27 = vadd.f32 %v551_v26, %v462_v25 }
 0x127   :  { %v801_v30 = vmul.f32 %v704_v28, %v552_v27  ;;  %v734_v27 = vpop.permute.xlu0 %733 }
 0x129   :  { %v833_v33 = vpack.c.bf16 %v801_v30, %v801_v30 }
 0x12b   :  { %v897_v35 = vunpack.c.l.b16 %v833_v33  ;;  %v465_v36 = vpop.f32.mrf.mxu0  ;;  %v1287_v33 = vpop.f32.mrf.mxu3 }
 0x12c   :  { %v554_v37 = vpop.f32.mrf.mxu1 }
 0x12d   :  { %v921_v38 = vpack.c.b16 %v897_v35, %v896_v34  ;;  %v555_v39 = vadd.f32 %v554_v37, %v465_v36  ;;  %v3090_v34 = vld [vmem:[#allocation2 + $0x60] sm:$0xff] }
 0x12f   :  { %1217 = vmatmul.bf16.gmra.mxu2 %v921_v38  ;;  %v802_v42 = vmul.f32 %v709_v41, %v555_v39 }
 0x130   :  { %1331 = vmatmul.bf16.gmra.mxu3 %v3090_v34 }
 0x131   :  { %v834_v47 = vpack.c.bf16 %v802_v42, %v802_v42 }
 0x133   :  { %v467_v43 = vpop.f32.mrf.mxu0  ;;  %v898_v51 = vunpack.c.l.b16 %v834_v47 }
 0x134   :  { %v556_v44 = vpop.f32.mrf.mxu1 }
 0x135   :  { %v557_v45 = vadd.f32 %v556_v44, %v467_v43 }
 0x137   :  { %v803_v48 = vmul.f32 %v714_v46, %v557_v45  ;;  %v739_v45 = vpop.permute.xlu1 %738 }
 0x139   :  { %v835_v49 = vpack.c.bf16 %v803_v48, %v803_v48  ;;  %v1289_v48 = vpop.f32.mrf.mxu3 }
 0x13b   :  { %v899_v52 = vunpack.c.l.b16 %v835_v49  ;;  %v470_v54 = vpop.f32.mrf.mxu0 }
 0x13c   :  { %v559_v55 = vpop.f32.mrf.mxu1 }
 0x13d   :  { %v922_v56 = vpack.c.b16 %v899_v52, %v898_v51  ;;  %v560_v57 = vadd.f32 %v559_v55, %v470_v54  ;;  %v744_v54 = vpop.permute.xlu2 %743 }
 0x13f   :  { %1222 = vmatmul.bf16.gmra.mxu2 %v922_v56  ;;  %v804_v60 = vmul.f32 %v719_v59, %v560_v57 }
 0x141   :  { %v836_v5 = vpack.c.bf16 %v804_v60, %v804_v60 }
 0x142   :  { %v1183_v61 = vpop.f32.mrf.mxu2 }
 0x143   :  { %v1184_v62 = vadd.f32 %v3827_v58, %v1183_v61  ;;  %v472_v63 = vpop.f32.mrf.mxu0  ;;  %v900_v10 = vunpack.c.l.b16 %v836_v5  ;;  %v3091_v61 = vld [vmem:[#allocation2 + $0x68] sm:$0xff] }
 0x144   :  { %v561_v0 = vpop.f32.mrf.mxu1  ;;  %1336 = vmatmul.bf16.gmra.mxu3 %v3091_v61 }
 0x145   :  { %v562_v1 = vadd.f32 %v561_v0, %v472_v63  ;;  %v3832_v4 = vadd.f32 %v1272_v21, %v1184_v62 }
 0x147   :  { %v805_v6 = vmul.f32 %v724_v3, %v562_v1  ;;  %1352 = vadd.xlane.f32.xlu2 %v3832_v4  ;;  %v1416_v18 = vmul.f32 %v3832_v4, %v3832_v4 }
 0x149   :  { %v837_v7 = vpack.c.bf16 %v805_v6, %v805_v6  ;;  %v1292_v6 = vpop.f32.mrf.mxu3 }
 0x14a   :  { %v1185_v9 = vpop.f32.mrf.mxu2 }
 0x14b   :  { %v901_v11 = vunpack.c.l.b16 %v837_v7  ;;  %v1186_v12 = vadd.f32 %v3827_v58, %v1185_v9  ;;  %v475_v13 = vpop.f32.mrf.mxu0 }
 0x14c   :  { %v564_v14 = vpop.f32.mrf.mxu1 }
 0x14d   :  { %v923_v15 = vpack.c.b16 %v901_v11, %v900_v10  ;;  %v3836_v16 = vadd.f32 %v1274_v31, %v1186_v12  ;;  %v565_v17 = vadd.f32 %v564_v14, %v475_v13  ;;  %v749_v10 = vpop.permute.xlu0 %748 }
 0x14f   :  { %1227 = vmatmul.bf16.gmra.mxu2 %v923_v15  ;;  %1354 = vadd.xlane.f32.xlu0 %v3836_v16  ;;  %v806_v21 = vmul.f32 %v729_v20, %v565_v17  ;;  %v1417_v29 = vmul.f32 %v3836_v16, %v3836_v16 }
 0x150   :  { %1448 = vadd.xlane.f32.xlu2 %v1416_v18  ;;  %v754_v18 = vpop.permute.xlu1 %753 }
 0x151   :  { %v838_v30 = vpack.c.bf16 %v806_v21, %v806_v21 }
 0x152   :  { %v1188_v22 = vpop.f32.mrf.mxu2 }
 0x153   :  { %v1189_v23 = vadd.f32 %v3827_v58, %v1188_v22  ;;  %v477_v24 = vpop.f32.mrf.mxu0  ;;  %v902_v36 = vunpack.c.l.b16 %v838_v30  ;;  %v1294_v22 = vpop.f32.mrf.mxu3 }
 0x154   :  { %v566_v25 = vpop.f32.mrf.mxu1 }
 0x155   :  { %v567_v26 = vadd.f32 %v566_v25, %v477_v24  ;;  %v3842_v28 = vadd.f32 %v1277_v40, %v1189_v23  ;;  %v3092_v25 = vld [vmem:[#allocation2 + $0x70] sm:$0xff] }
 0x156   :  { %1341 = vmatmul.bf16.gmra.mxu3 %v3092_v25 }
 0x157   :  { %v807_v31 = vmul.f32 %v734_v27, %v567_v26  ;;  %1356 = vadd.xlane.f32.xlu1 %v3842_v28  ;;  %1450 = vadd.xlane.f32.xlu0 %v1417_v29  ;;  %v1418_v43 = vmul.f32 %v3842_v28, %v3842_v28 }
 0x159   :  { %v839_v32 = vpack.c.bf16 %v807_v31, %v807_v31 }
 0x15a   :  { %v1190_v35 = vpop.f32.mrf.mxu2 }
 0x15b   :  { %v903_v37 = vunpack.c.l.b16 %v839_v32  ;;  %v1191_v38 = vadd.f32 %v3827_v58, %v1190_v35  ;;  %v480_v39 = vpop.f32.mrf.mxu0 }
 0x15c   :  { %v569_v40 = vpop.f32.mrf.mxu1 }
 0x15d   :  { %v924_v41 = vpack.c.b16 %v903_v37, %v902_v36  ;;  %v3849_v42 = vadd.f32 %v3822_v53, %v1191_v38  ;;  %v570_v44 = vadd.f32 %v569_v40, %v480_v39  ;;  %v1297_v37 = vpop.f32.mrf.mxu3  ;;  %v759_v38 = vpop.permute.xlu2 %758 }
 0x15f   :  { %1232 = vmatmul.bf16.gmra.mxu2 %v924_v41  ;;  %1452 = vadd.xlane.f32.xlu1 %v1418_v43  ;;  %v808_v46 = vmul.f32 %v739_v45, %v570_v44  ;;  %v1419_v57 = vmul.f32 %v3849_v42, %v3849_v42 }
 0x160   :  { %1358 = vadd.xlane.f32.xlu2 %v3849_v42 }
 0x161   :  { %v840_v55 = vpack.c.bf16 %v808_v46, %v808_v46  ;;  %v764_v46 = vpop.permute.xlu0 %763 }
 0x162   :  { %v1193_v47 = vpop.f32.mrf.mxu2 }
 0x163   :  { %v1194_v49 = vadd.f32 %v3827_v58, %v1193_v47  ;;  %v482_v50 = vpop.f32.mrf.mxu0  ;;  %v904_v63 = vunpack.c.l.b16 %v840_v55 }
 0x164   :  { %v571_v51 = vpop.f32.mrf.mxu1 }
 0x165   :  { %v572_v52 = vadd.f32 %v571_v51, %v482_v50  ;;  %v3856_v53 = vadd.f32 %v3830_v2, %v1194_v49 }
 0x167   :  { %v809_v56 = vmul.f32 %v744_v54, %v572_v52  ;;  %v1420_v59 = vmul.f32 %v3856_v53, %v3856_v53  ;;  %v3093_v52 = vld [vmem:[#allocation2 + $0x78] sm:$0xff] }
 0x168   :  { %1454 = vadd.xlane.f32.xlu2 %v1419_v57  ;;  %v1299_v57 = vpop.f32.mrf.mxu3  ;;  %1346 = vmatmul.bf16.gmra.mxu3 %v3093_v52 }
 0x169   :  { %v841_v60 = vpack.c.bf16 %v809_v56, %v809_v56  ;;  %1456 = vadd.xlane.f32.xlu0 %v1420_v59 }
 0x16a   :  { %v1195_v62 = vpop.f32.mrf.mxu2 }
 0x16b   :  { %v905_v0 = vunpack.c.l.b16 %v841_v60  ;;  %v1196_v1 = vadd.f32 %v3827_v58, %v1195_v62  ;;  %v485_v2 = vpop.f32.mrf.mxu0 }
 0x16c   :  { %v574_v3 = vpop.f32.mrf.mxu1 }
 0x16d   :  { %v925_v5 = vpack.c.b16 %v905_v0, %v904_v63  ;;  %v3863_v7 = vadd.f32 %v1284_v19, %v1196_v1  ;;  %v575_v8 = vadd.f32 %v574_v3, %v485_v2  ;;  %v769_v2 = vpop.permute.xlu1 %768 }
 0x16f   :  { %1237 = vmatmul.bf16.gmra.mxu2 %v925_v5  ;;  %v1421_v9 = vmul.f32 %v3863_v7, %v3863_v7  ;;  %v810_v11 = vmul.f32 %v749_v10, %v575_v8 }
 0x170   :  { %1360 = vadd.xlane.f32.xlu2 %v3856_v53 }
 0x171   :  { %1458 = vadd.xlane.f32.xlu1 %v1421_v9  ;;  %1362 = vadd.xlane.f32.xlu0 %v3863_v7  ;;  %v842_v20 = vpack.c.bf16 %v810_v11, %v810_v11  ;;  %v1302_v11 = vpop.f32.mrf.mxu3 }
 0x172   :  { %v1198_v12 = vpop.f32.mrf.mxu2 }
 0x173   :  { %v1199_v13 = vadd.f32 %v3827_v58, %v1198_v12  ;;  %v487_v14 = vpop.f32.mrf.mxu0  ;;  %v906_v26 = vunpack.c.l.b16 %v842_v20  ;;  %v774_v12 = vpop.permute.xlu2 %773 }
 0x174   :  { %v576_v15 = vpop.f32.mrf.mxu1 }
 0x175   :  { %v577_v17 = vadd.f32 %v576_v15, %v487_v14  ;;  %v3870_v19 = vadd.f32 %v1287_v33, %v1199_v13 }
 0x177   :  { %v811_v21 = vmul.f32 %v754_v18, %v577_v17  ;;  %v1422_v23 = vmul.f32 %v3870_v19, %v3870_v19 }
 0x179   :  { %v843_v24 = vpack.c.bf16 %v811_v21, %v811_v21  ;;  %1364 = vadd.xlane.f32.xlu1 %v3870_v19  ;;  %1460 = vadd.xlane.f32.xlu2 %v1422_v23 }
 0x17a   :  { %v1200_v29 = vpop.f32.mrf.mxu2 }
 0x17b   :  { %v907_v27 = vunpack.c.l.b16 %v843_v24  ;;  %v1201_v30 = vadd.f32 %v3827_v58, %v1200_v29  ;;  %v490_v31 = vpop.f32.mrf.mxu0 }
 0x17c   :  { %v579_v32 = vpop.f32.mrf.mxu1 }
 0x17d   :  { %v926_v33 = vpack.c.b16 %v907_v27, %v906_v26  ;;  %v3876_v34 = vadd.f32 %v1289_v48, %v1201_v30  ;;  %v580_v35 = vadd.f32 %v579_v32, %v490_v31  ;;  %v1304_v30 = vpop.f32.mrf.mxu3  ;;  %v779_v32 = vpop.permute.xlu0 %778 }
 0x17f   :  { %1242 = vmatmul.bf16.gmra.mxu2 %v926_v33  ;;  %v1423_v36 = vmul.f32 %v3876_v34, %v3876_v34  ;;  %v812_v39 = vmul.f32 %v759_v38, %v580_v35 }
 0x181   :  { %1462 = vadd.xlane.f32.xlu0 %v1423_v36  ;;  %1366 = vadd.xlane.f32.xlu2 %v3876_v34  ;;  %v844_v48 = vpack.c.bf16 %v812_v39, %v812_v39 }
 0x182   :  { %v1203_v40 = vpop.f32.mrf.mxu2 }
 0x183   :  { %v1204_v41 = vadd.f32 %v3827_v58, %v1203_v40  ;;  %v492_v43 = vpop.f32.mrf.mxu0  ;;  %v908_v54 = vunpack.c.l.b16 %v844_v48  ;;  %v784_v40 = vpop.permute.xlu1 %783 }
 0x184   :  { %v581_v44 = vpop.f32.mrf.mxu1 }
 0x185   :  { %v582_v45 = vadd.f32 %v581_v44, %v492_v43  ;;  %v3882_v47 = vadd.f32 %v1292_v6, %v1204_v41  ;;  %v1307_v48 = vpop.f32.mrf.mxu3 }
 0x187   :  { %v813_v49 = vmul.f32 %v764_v46, %v582_v45  ;;  %v1424_v50 = vmul.f32 %v3882_v47, %v3882_v47 }
 0x189   :  { %v845_v51 = vpack.c.bf16 %v813_v49, %v813_v49  ;;  %1464 = vadd.xlane.f32.xlu1 %v1424_v50  ;;  %1368 = vadd.xlane.f32.xlu0 %v3882_v47 }
 0x18a   :  { %v1205_v56 = vpop.f32.mrf.mxu2 }
 0x18b   :  { %v909_v55 = vunpack.c.l.b16 %v845_v51  ;;  %v1206_v59 = vadd.f32 %v3827_v58, %v1205_v56  ;;  %v495_v60 = vpop.f32.mrf.mxu0 }
 0x18c   :  { %v584_v61 = vpop.f32.mrf.mxu1 }
 0x18d   :  { %v927_v62 = vpack.c.b16 %v909_v55, %v908_v54  ;;  %v3888_v63 = vadd.f32 %v1294_v22, %v1206_v59  ;;  %v585_v0 = vadd.f32 %v584_v61, %v495_v60  ;;  %v1309_v59 = vpop.f32.mrf.mxu3 }
 0x18f   :  { %1247 = vmatmul.bf16.gmra.mxu2 %v927_v62  ;;  %v1425_v1 = vmul.f32 %v3888_v63, %v3888_v63  ;;  %v814_v3 = vmul.f32 %v769_v2, %v585_v0 }
 0x191   :  { %1370 = vadd.xlane.f32.xlu1 %v3888_v63  ;;  %1466 = vadd.xlane.f32.xlu2 %v1425_v1  ;;  %v846_v14 = vpack.c.bf16 %v814_v3, %v814_v3 }
 0x192   :  { %v1208_v5 = vpop.f32.mrf.mxu2 }
 0x193   :  { %v1209_v6 = vadd.f32 %v3827_v58, %v1208_v5  ;;  %v497_v8 = vpop.f32.mrf.mxu0  ;;  %v910_v20 = vunpack.c.l.b16 %v846_v14 }
 0x194   :  { %v586_v9 = vpop.f32.mrf.mxu1 }
 0x195   :  { %v587_v10 = vadd.f32 %v586_v9, %v497_v8  ;;  %v3894_v13 = vadd.f32 %v1297_v37, %v1209_v6  ;;  %v1312_v3 = vpop.f32.mrf.mxu3 }
 0x197   :  { %v815_v15 = vmul.f32 %v774_v12, %v587_v10  ;;  %v1426_v17 = vmul.f32 %v3894_v13, %v3894_v13 }
 0x199   :  { %v847_v18 = vpack.c.bf16 %v815_v15, %v815_v15  ;;  %1468 = vadd.xlane.f32.xlu0 %v1426_v17  ;;  %1372 = vadd.xlane.f32.xlu2 %v3894_v13 }
 0x19a   :  { %v1210_v22 = vpop.f32.mrf.mxu2 }
 0x19b   :  { %v911_v21 = vunpack.c.l.b16 %v847_v18  ;;  %v1211_v23 = vadd.f32 %v3827_v58, %v1210_v22  ;;  %v500_v24 = vpop.f32.mrf.mxu0 }
 0x19c   :  { %v589_v25 = vpop.f32.mrf.mxu1 }
 0x19d   :  { %v928_v26 = vpack.c.b16 %v911_v21, %v910_v20  ;;  %v3900_v27 = vadd.f32 %v1299_v57, %v1211_v23  ;;  %v590_v29 = vadd.f32 %v589_v25, %v500_v24  ;;  %v1314_v15 = vpop.f32.mrf.mxu3 }
 0x19f   :  { %1252 = vmatmul.bf16.gmra.mxu2 %v928_v26  ;;  %v1427_v31 = vmul.f32 %v3900_v27, %v3900_v27  ;;  %v816_v33 = vmul.f32 %v779_v32, %v590_v29 }
 0x1a1   :  { %1470 = vadd.xlane.f32.xlu1 %v1427_v31  ;;  %1374 = vadd.xlane.f32.xlu0 %v3900_v27  ;;  %v848_v43 = vpack.c.bf16 %v816_v33, %v816_v33 }
 0x1a2   :  { %v1213_v35 = vpop.f32.mrf.mxu2 }
 0x1a3   :  { %v1214_v36 = vadd.f32 %v3827_v58, %v1213_v35  ;;  %v502_v37 = vpop.f32.mrf.mxu0  ;;  %v912_v49 = vunpack.c.l.b16 %v848_v43 }
 0x1a4   :  { %v591_v38 = vpop.f32.mrf.mxu1 }
 0x1a5   :  { %v592_v39 = vadd.f32 %v591_v38, %v502_v37  ;;  %v3906_v41 = vadd.f32 %v1302_v11, %v1214_v36  ;;  %v1317_v31 = vpop.f32.mrf.mxu3 }
 0x1a7   :  { %v817_v44 = vmul.f32 %v784_v40, %v592_v39  ;;  %v1428_v45 = vmul.f32 %v3906_v41, %v3906_v41 }
 0x1a9   :  { %v849_v46 = vpack.c.bf16 %v817_v44, %v817_v44  ;;  %1376 = vadd.xlane.f32.xlu1 %v3906_v41  ;;  %1472 = vadd.xlane.f32.xlu2 %v1428_v45 }
 0x1aa   :  { %v1215_v51 = vpop.f32.mrf.mxu2 }
 0x1ab   :  { %v913_v50 = vunpack.c.l.b16 %v849_v46  ;;  %v1216_v52 = vadd.f32 %v3827_v58, %v1215_v51 }
 0x1ad   :  { %v929_v54 = vpack.c.b16 %v913_v50, %v912_v49  ;;  %v3912_v55 = vadd.f32 %v1304_v30, %v1216_v52 }
 0x1af   :  { %1257 = vmatmul.bf16.gmra.mxu2 %v929_v54  ;;  %v1429_v56 = vmul.f32 %v3912_v55, %v3912_v55 }
 0x1b1   :  { %1474 = vadd.xlane.f32.xlu0 %v1429_v56  ;;  %1378 = vadd.xlane.f32.xlu2 %v3912_v55 }
 0x1b2   :  { %v1218_v57 = vpop.f32.mrf.mxu2 }
 0x1b3   :  { %v1219_v60 = vadd.f32 %v3827_v58, %v1218_v57  ;;  %v1319_v57 = vpop.f32.mrf.mxu3 }
 0x1b5   :  { %v3918_v61 = vadd.f32 %v1307_v48, %v1219_v60 }
 0x1b7   :  { %v1430_v62 = vmul.f32 %v3918_v61, %v3918_v61 }
 0x1b9   :  { %1476 = vadd.xlane.f32.xlu1 %v1430_v62  ;;  %1380 = vadd.xlane.f32.xlu0 %v3918_v61 }
 0x1ba   :  { %v1220_v0 = vpop.f32.mrf.mxu2  ;;  %v1353_v1 = vpop.xlane.xlu2 %1352 }
 0x1bb   :  { %v1221_v2 = vadd.f32 %v3827_v58, %v1220_v0 }
 0x1bd   :  { %v3924_v5 = vadd.f32 %v1309_v59, %v1221_v2 }
 0x1bf   :  { %v1431_v6 = vmul.f32 %v3924_v5, %v3924_v5 }
 0x1c1   :  { %1382 = vadd.xlane.f32.xlu1 %v3924_v5  ;;  %1478 = vadd.xlane.f32.xlu2 %v1431_v6 }
 0x1c2   :  { %v1223_v8 = vpop.f32.mrf.mxu2  ;;  %v3929_v9 = vpop.xlane.xlu0 %1354 }
 0x1c3   :  { %v1224_v10 = vadd.f32 %v3827_v58, %v1223_v8  ;;  %v1449_v11 = vpop.xlane.xlu2 %1448 }
 0x1c4   :  { %v1512_v12 = vmax.f32 %v1449_v11, 1e-24 }
 0x1c5   :  { %v3932_v14 = vadd.f32 %v1312_v3, %v1224_v10 }
 0x1c6   :  { %3265 = vrsqrt.f32 %v1512_v12  ;;  %vm1550_vm1 = vweird.f32 %v1512_v12 }
 0x1c7   :  { %v1432_v17 = vmul.f32 %v3932_v14, %v3932_v14 }
 0x1c9   :  { %1480 = vadd.xlane.f32.xlu0 %v1432_v17  ;;  %1384 = vadd.xlane.f32.xlu2 %v3932_v14 }
 0x1ca   :  { %v1225_v18 = vpop.f32.mrf.mxu2  ;;  %v3937_v20 = vpop.xlane.xlu1 %1356 }
 0x1cb   :  { %v1226_v21 = vadd.f32 %v3827_v58, %v1225_v18  ;;  %v3940_v22 = vpop.xlane.xlu0 %1450 }
 0x1cc   :  { %v3266_v23 = vpop.eup %3265  ;;  %v1513_v24 = vmax.f32 %v3940_v22, 1e-24 }
 0x1cd   :  { %v1545_v25 = vmul.f32 %v3266_v23, %v1512_v12  ;;  %v3943_v26 = vadd.f32 %v1314_v15, %v1226_v21  ;;  %vm1551_vm0 = vweird.f32 %v3266_v23 }
 0x1ce   :  { %3267 = vrsqrt.f32 %v1513_v24  ;;  %vm1552_vm2 = vmor %vm1550_vm1, %vm1551_vm0  ;;  %vm1560_vm4 = vweird.f32 %v1513_v24 }
 0x1cf   :  { %v1546_v29 = vmul.f32 %v3266_v23, %v1545_v25  ;;  %v1433_v30 = vmul.f32 %v3943_v26, %v3943_v26 }
 0x1d1   :  { %v1547_v32 = vmul.f32 0.5, %v1546_v29  ;;  %1482 = vadd.xlane.f32.xlu1 %v1433_v30  ;;  %1386 = vadd.xlane.f32.xlu0 %v3943_v26 }
 0x1d2   :  { %v1228_v33 = vpop.f32.mrf.mxu2  ;;  %v3948_v35 = vpop.xlane.xlu1 %1452 }
 0x1d3   :  { %v1548_v36 = vsub.f32 1.5, %v1547_v32  ;;  %v1229_v37 = vadd.f32 %v3827_v58, %v1228_v33  ;;  %v3952_v38 = vmax.f32 %v3948_v35, 1e-24  ;;  %v3954_v39 = vpop.xlane.xlu2 %1358 }
 0x1d4   :  { %v3268_v40 = vpop.eup %3267 }
 0x1d5   :  { %v1549_v43 = vmul.f32 %v3266_v23, %v1548_v36  ;;  %v1555_v44 = vmul.f32 %v3268_v40, %v1513_v24  ;;  %v3956_v45 = vadd.f32 %v1317_v31, %v1229_v37  ;;  %3269 = vrsqrt.f32 %v3952_v38 }
 0x1d6   :  { %vm1561_vm3 = vweird.f32 %v3268_v40  ;;  %vm1570_vm7 = vweird.f32 %v3952_v38 }
 0x1d7   :  { %v1553_v46 = vsel %vm1552_vm2, %v3266_v23, %v1549_v43  ;;  %v1556_v48 = vmul.f32 %v3268_v40, %v1555_v44  ;;  %v1434_v49 = vmul.f32 %v3956_v45, %v3956_v45  ;;  %vm1562_vm5 = vmor %vm1560_vm4, %vm1561_vm3 }
 0x1d8   :  { %v1896_v50 = vmul.f32 0.03125, %v1553_v46  ;;  %v1960_v51 = vmul.f32 %v1553_v46, %v1553_v46 }
 0x1d9   :  { %v1557_v52 = vmul.f32 0.5, %v1556_v48  ;;  %1388 = vadd.xlane.f32.xlu1 %v3956_v45  ;;  %1484 = vadd.xlane.f32.xlu2 %v1434_v49  ;;  %v1322_v49 = vpop.f32.mrf.mxu3 }
 0x1da   :  { %v3962_v54 = vmul.f32 %v1896_v50, %v1353_v1  ;;  %v1992_v56 = vmul.f32 %v1960_v51, %v1449_v11  ;;  %v1230_v59 = vpop.f32.mrf.mxu2 }
 0x1db   :  { %v1558_v60 = vsub.f32 1.5, %v1557_v52  ;;  %v1231_v62 = vadd.f32 %v3827_v58, %v1230_v59  ;;  %v3965_v0 = vpop.xlane.xlu2 %1454  ;;  %v3270_v2 = vpop.eup %3269 }
 0x1dc   :  { %v2024_v3 = vmul.f32 0.03125, %v1992_v56  ;;  %v2056_v6 = vmul.f32 %v3962_v54, %v3962_v54  ;;  %v3970_v8 = vmax.f32 %v3965_v0, 1e-24  ;;  %v3972_v10 = vpop.xlane.xlu0 %1456  ;;  %v1565_v11 = vmul.f32 %v3270_v2, %v3952_v38 }
 0x1dd   :  { %v1559_v1 = vmul.f32 %v3268_v40, %v1558_v60  ;;  %v3975_v12 = vadd.f32 %v1319_v57, %v1231_v62  ;;  %v3979_v17 = vmax.f32 %v3972_v10, 1e-24  ;;  %vm1571_vm6 = vweird.f32 %v3270_v2 }
 0x1de   :  { %v2088_v15 = vsub.f32 %v2024_v3, %v2056_v6  ;;  %3271 = vrsqrt.f32 %v3970_v8  ;;  %v1566_v21 = vmul.f32 %v3270_v2, %v1565_v11  ;;  %vm1572_vm8 = vmor %vm1570_vm7, %vm1571_vm6  ;;  %v4003_v57 = vmul.f32 %v1553_v46, %v3832_v4 }
 0x1df   :  { %v1563_v18 = vsel %vm1562_vm5, %v3268_v40, %v1559_v1  ;;  %v1435_v23 = vmul.f32 %v3975_v12, %v3975_v12  ;;  %3273 = vrsqrt.f32 %v3979_v17  ;;  %vm1580_vm10 = vweird.f32 %v3970_v8 }
 0x1e0   :  { %v2120_v25 = vmax.f32 %v2088_v15, 0.0  ;;  %v1897_v29 = vmul.f32 0.03125, %v1563_v18  ;;  %v1961_v30 = vmul.f32 %v1563_v18, %v1563_v18  ;;  %v1567_v24 = vmul.f32 0.5, %v1566_v21 }
 0x1e1   :  { %1486 = vadd.xlane.f32.xlu0 %v1435_v23  ;;  %1390 = vadd.xlane.f32.xlu2 %v3975_v12  ;;  %v2152_v11 = vsub.f32 %v4003_v57, %v3962_v54  ;;  %vm1590_vm13 = vweird.f32 %v3979_v17 }
 0x1e2   :  { %v3985_v31 = vadd.f32 1e-05, %v2120_v25  ;;  %v3988_v32 = vmul.f32 %v1897_v29, %v3929_v9  ;;  %v1993_v33 = vmul.f32 %v1961_v30, %v3940_v22  ;;  %v1233_v36 = vpop.f32.mrf.mxu2  ;;  %v1568_v37 = vsub.f32 1.5, %v1567_v24 }
 0x1e3   :  { %v1234_v40 = vadd.f32 %v3827_v58, %v1233_v36  ;;  %v4007_v3 = vpop.xlane.xlu2 %1360 }
 0x1e4   :  { %v3272_v43 = vpop.eup %3271  ;;  %3275 = vrsqrt.f32 %v3985_v31  ;;  %v2025_v44 = vmul.f32 0.03125, %v1993_v33  ;;  %v2057_v48 = vmul.f32 %v3988_v32, %v3988_v32  ;;  %v3995_v50 = vpop.xlane.xlu1 %1458  ;;  %v1569_v51 = vmul.f32 %v3270_v2, %v1568_v37 }
 0x1e5   :  { %v1575_v9 = vmul.f32 %v3272_v43, %v3970_v8  ;;  %v4000_v52 = vmax.f32 %v3995_v50, 1e-24  ;;  %v3274_v56 = vpop.eup %3273  ;;  %v4005_v62 = vadd.f32 %v1322_v49, %v1234_v40  ;;  %vm1581_vm9 = vweird.f32 %v3272_v43 }
 0x1e6   :  { %v2089_v22 = vsub.f32 %v2025_v44, %v2057_v48  ;;  %v1573_v59 = vsel %vm1572_vm8, %v3270_v2, %v1569_v51  ;;  %v1585_v21 = vmul.f32 %v3274_v56, %v3979_v17  ;;  %v4026_v37 = vmul.f32 %v1563_v18, %v3836_v16  ;;  %vm1582_vm12 = vmor %vm1580_vm10, %vm1581_vm9  ;;  %v1324_v48 = vpop.f32.mrf.mxu3 }
 0x1e7   :  { %v1576_v60 = vmul.f32 %v3272_v43, %v1575_v9  ;;  %v1898_v1 = vmul.f32 0.03125, %v1573_v59  ;;  %v1962_v38 = vmul.f32 %v1573_v59, %v1573_v59  ;;  %3277 = vrsqrt.f32 %v4000_v52 }
 0x1e8   :  { %v2121_v6 = vmax.f32 %v2089_v22, 0.0  ;;  %v1586_v24 = vmul.f32 %v3274_v56, %v1585_v21  ;;  %vm2222_vm11 = vweird.f32 %v3985_v31  ;;  %v1436_v49 = vmul.f32 %v4005_v62, %v4005_v62 }
 0x1e9   :  { %v1577_v15 = vmul.f32 0.5, %v1576_v60  ;;  %1392 = vadd.xlane.f32.xlu0 %v4005_v62  ;;  %v4016_v46 = vmul.f32 %v1898_v1, %v3937_v20  ;;  %v1994_v2 = vmul.f32 %v1962_v38, %v3948_v35  ;;  %vm1591_vm14 = vweird.f32 %v3274_v56 }
 0x1ea   :  { %v3276_v23 = vpop.eup %3275  ;;  %v4013_v4 = vadd.f32 1e-05, %v2121_v6  ;;  %v1235_v25 = vpop.f32.mrf.mxu2  ;;  %v1587_v40 = vmul.f32 0.5, %v1586_v24  ;;  %v2153_v18 = vsub.f32 %v4026_v37, %v3988_v32  ;;  %1488 = vadd.xlane.f32.xlu1 %v1436_v49  ;;  %vm1592_vm0 = vmor %vm1590_vm13, %vm1591_vm14  ;;  %vm1600_vm2 = vweird.f32 %v4000_v52 }
 0x1eb   :  { %v2217_v29 = vmul.f32 %v3276_v23, %v3985_v31  ;;  %v1578_v30 = vsub.f32 1.5, %v1577_v15  ;;  %v2026_v33 = vmul.f32 0.03125, %v1994_v2  ;;  %v2058_v36 = vmul.f32 %v4016_v46, %v4016_v46 }
 0x1ec   :  { %3279 = vrsqrt.f32 %v4013_v4  ;;  %v1588_v8 = vsub.f32 1.5, %v1587_v40  ;;  %v4034_v22 = vpop.xlane.xlu2 %1460  ;;  %vm2223_vm15 = vweird.f32 %v3276_v23  ;;  %v1236_v15 = vadd.f32 %v3827_v58, %v1235_v25  ;;  %v4072_v40 = vpop.xlane.xlu0 %1362 }
 0x1ed   :  { %v2218_v20 = vmul.f32 %v3276_v23, %v2217_v29  ;;  %v1579_v35 = vmul.f32 %v3272_v43, %v1578_v30  ;;  %v2090_v44 = vsub.f32 %v2026_v33, %v2058_v36  ;;  %v4036_v16 = vpop.eup %3277  ;;  %v4056_v24 = vmax.f32 %v4034_v22, 1e-24  ;;  %vm2224_vm1 = vmor %vm2222_vm11, %vm2223_vm15 }
 0x1ee   :  { %vm2232_vm3 = vweird.f32 %v4013_v4  ;;  %v1327_v57 = vpop.f32.mrf.mxu3  ;;  %vm1601_vm5 = vweird.f32 %v4036_v16 }
 0x1ef   :  { %v2219_v51 = vmul.f32 0.5, %v2218_v20  ;;  %v4032_v9 = vsel %vm1582_vm12, %v3272_v43, %v1579_v35  ;;  %v2122_v60 = vmax.f32 %v2090_v44, 0.0  ;;  %v1589_v43 = vmul.f32 %v3274_v56, %v1588_v8  ;;  %vm1602_vm8 = vmor %vm1600_vm2, %vm1601_vm5 }
 0x1f0   :  { %v1899_v6 = vmul.f32 0.03125, %v4032_v9  ;;  %v1963_v1 = vmul.f32 %v4032_v9, %v4032_v9  ;;  %vm1610_vm11 = vweird.f32 %v4056_v24 }
 0x1f1   :  { %v2220_v38 = vsub.f32 1.5, %v2219_v51  ;;  %v4046_v2 = vadd.f32 1e-05, %v2122_v60  ;;  %v4060_v20 = vsel %vm1592_vm0, %v3274_v56, %v1589_v43  ;;  %v4077_v51 = vadd.f32 %v1324_v48, %v1236_v15  ;;  %v4105_v15 = vld [vmem:[%s5455_s6] ss:$0 sm:$0xff] }
 0x1f2   :  { %v4044_v21 = vpop.eup %3279  ;;  %v4049_v29 = vmul.f32 %v1899_v6, %v3954_v39  ;;  %v1995_v30 = vmul.f32 %v1963_v1, %v3965_v0  ;;  %v1238_v33 = vpop.f32.mrf.mxu2  ;;  %v1595_v39 = vmul.f32 %v4036_v16, %v4000_v52  ;;  %v4067_v0 = vmul.f32 %v1573_v59, %v3842_v28  ;;  %v4082_v28 = vld [vmem:[%s5454_s5] ss:$0 sm:$0xff] }
 0x1f3   :  { %v2221_v36 = vmul.f32 %v3276_v23, %v2220_v38  ;;  %v2227_v25 = vmul.f32 %v4044_v21, %v4013_v4  ;;  %3281 = vrsqrt.f32 %v4046_v2  ;;  %v1964_v49 = vmul.f32 %v4060_v20, %v4060_v20  ;;  %1394 = vadd.xlane.f32.xlu1 %v4077_v51 }
 0x1f4   :  { %v2027_v17 = vmul.f32 0.03125, %v1995_v30  ;;  %v2059_v35 = vmul.f32 %v4049_v29, %v4049_v29  ;;  %v1900_v8 = vmul.f32 0.03125, %v4060_v20  ;;  %v1596_v48 = vmul.f32 %v4036_v16, %v1595_v39 }
 0x1f5   :  { %v2225_v44 = vsel %vm2224_vm1, %v3276_v23, %v2221_v36  ;;  %v2228_v56 = vmul.f32 %v4044_v21, %v2227_v25  ;;  %v1996_v60 = vmul.f32 %v1964_v49, %v3972_v10  ;;  %3283 = vrsqrt.f32 %v4056_v24  ;;  %v4128_v49 = vpop.xlane.xlu0 %1462 }
 0x1f6   :  { %v2536_v31 = vmul.f32 %v2225_v44, %v2152_v11  ;;  %v2091_v59 = vsub.f32 %v2027_v17, %v2059_v35  ;;  %vm2233_vm4 = vweird.f32 %v4044_v21  ;;  %v4095_v54 = vmul.f32 %v1900_v8, %v4007_v3 }
 0x1f7   :  { %v2229_v23 = vmul.f32 0.5, %v2228_v56  ;;  %v2028_v1 = vmul.f32 0.03125, %v1996_v60  ;;  %v1597_v38 = vmul.f32 0.5, %v1596_v48  ;;  %v1437_v10 = vmul.f32 %v4077_v51, %v4077_v51  ;;  %vm2234_vm6 = vmor %vm2232_vm3, %vm2233_vm4 }
 0x1f8   :  { %v2123_v6 = vmax.f32 %v2091_v59, 0.0  ;;  %v2572_v30 = vmul.f32 %v4082_v28, %v2536_v31  ;;  %v2154_v3 = vsub.f32 %v4067_v0, %v4016_v46  ;;  %v2060_v25 = vmul.f32 %v4095_v54, %v4095_v54 }
 0x1f9   :  { %v2230_v11 = vsub.f32 1.5, %v2229_v23  ;;  %v4100_v43 = vpop.eup %3281  ;;  %v1598_v35 = vsub.f32 1.5, %v1597_v38  ;;  %1490 = vadd.xlane.f32.xlu2 %v1437_v10  ;;  %vm2242_vm7 = vweird.f32 %v4046_v2  ;;  %v4125_v44 = vmul.f32 %v4032_v9, %v3849_v42 }
 0x1fa   :  { %v4110_v36 = vadd.f32 1e-05, %v2123_v6  ;;  %v2237_v17 = vmul.f32 %v4100_v43, %v4046_v2  ;;  %v2092_v56 = vsub.f32 %v2028_v1, %v2060_v25  ;;  %v1240_v31 = vpop.f32.mrf.mxu2  ;;  %v1239_v60 = vadd.f32 %v3827_v58, %v1238_v33  ;;  %v4194_v2 = vpop.xlane.xlu2 %1366 }
 0x1fb   :  { %v2231_v39 = vmul.f32 %v4044_v21, %v2230_v11  ;;  %v4130_v59 = vpop.eup %3283  ;;  %v1599_v4 = vmul.f32 %v4036_v16, %v1598_v35  ;;  %v2608_v48 = vadd.f32 %v4105_v15, %v2572_v30  ;;  %vm2243_vm9 = vweird.f32 %v4100_v43  ;;  %v4148_v11 = vpop.xlane.xlu1 %1364 }
 0x1fc   :  { %3285 = vrsqrt.f32 %v4110_v36  ;;  %v2238_v23 = vmul.f32 %v4100_v43, %v2237_v17  ;;  %v2124_v9 = vmax.f32 %v2092_v56, 0.0  ;;  %v4151_v1 = vmax.f32 %v4128_v49, 1e-24  ;;  %v1329_v35 = vpop.f32.mrf.mxu3  ;;  %vm4182_vm10 = vmor %vm2242_vm7, %vm2243_vm9 }
 0x1fd   :  { %v2235_v8 = vsel %vm2234_vm6, %v4044_v21, %v2231_v39  ;;  %v1605_v21 = vmul.f32 %v4130_v59, %v4056_v24  ;;  %v1603_v33 = vsel %vm1602_vm8, %v4036_v16, %v1599_v4  ;;  %v4156_v52 = vadd.f32 %v1327_v57, %v1239_v60 }
 0x1fe   :  { %v2537_v42 = vmul.f32 %v2235_v8, %v2153_v18  ;;  %v2239_v6 = vmul.f32 0.5, %v2238_v23  ;;  %v4154_v37 = vadd.f32 1e-05, %v2124_v9  ;;  %v1965_v18 = vmul.f32 %v1603_v33, %v1603_v33 }
 0x1ff   :  { %v1901_v10 = vmul.f32 0.03125, %v1603_v33  ;;  %v1606_v30 = vmul.f32 %v4130_v59, %v1605_v21  ;;  %3287 = vrsqrt.f32 %v4151_v1  ;;  %v2155_v39 = vsub.f32 %v4125_v44, %v4049_v29 }
 0x200   :  { %v2573_v32 = vmul.f32 %v4082_v28, %v2537_v42  ;;  %v2240_v38 = vsub.f32 1.5, %v2239_v6  ;;  %3289 = vrsqrt.f32 %v4154_v37  ;;  %v1997_v17 = vmul.f32 %v1965_v18, %v3995_v50 }
 0x201   :  { %v4172_v8 = vmul.f32 %v4060_v20, %v3856_v53  ;;  %v4175_v23 = vmul.f32 %v1901_v10, %v4072_v40  ;;  %1396 = vadd.xlane.f32.xlu2 %v4156_v52  ;;  %v2640_v29 = vmax.f32 %v2608_v48, 0.0  ;;  %v1607_v60 = vmul.f32 0.5, %v1606_v30 }
 0x202   :  { %v4160_v25 = vpop.eup %3285  ;;  %v2609_v16 = vadd.f32 %v4105_v15, %v2573_v32  ;;  %v2241_v57 = vmul.f32 %v4100_v43, %v2240_v38  ;;  %v2029_v4 = vmul.f32 0.03125, %v1997_v17  ;;  %vm1611_vm12 = vweird.f32 %v4130_v59  ;;  %v4198_v21 = vpop.f32.mrf.mxu2 }
 0x203   :  { %v2247_v56 = vmul.f32 %v4160_v25, %v4110_v36  ;;  %v2061_v40 = vmul.f32 %v4175_v23, %v4175_v23  ;;  %v1608_v42 = vsub.f32 1.5, %v1607_v60  ;;  %v1438_v9 = vmul.f32 %v4156_v52, %v4156_v52  ;;  %v4206_v10 = vpop.xlane.xlu1 %1464  ;;  %vm1612_vm15 = vmor %vm1610_vm11, %vm1611_vm12 }
 0x204   :  { %v2641_v44 = vmax.f32 %v2609_v16, 0.0  ;;  %v2245_v53 = vsel %vm4182_vm10, %v4100_v43, %v2241_v57  ;;  %v4203_v32 = vmul.f32 %v1603_v33, %v3863_v7  ;;  %v1241_v38 = vadd.f32 %v3827_v58, %v1240_v31  ;;  %v1332_v60 = vpop.f32.mrf.mxu3 }
 0x205   :  { %v2248_v20 = vmul.f32 %v4160_v25, %v2247_v56  ;;  %v4200_v6 = vpop.eup %3287  ;;  %v2093_v18 = vsub.f32 %v2029_v4, %v2061_v40  ;;  %v2538_v16 = vmul.f32 %v2245_v53, %v2154_v3  ;;  %vm2252_vm13 = vweird.f32 %v4110_v36  ;;  %1492 = vadd.xlane.f32.xlu0 %v1438_v9  ;;  %v4242_v40 = vpop.xlane.xlu0 %1368 }
 0x206   :  { %v3161_v48 = vpack.c.bf16 %v2641_v44, %v2640_v29  ;;  %v4208_v30 = vpop.eup %3289  ;;  %v1609_v17 = vmul.f32 %v4130_v59, %v1608_v42  ;;  %v1615_v7 = vmul.f32 %v4200_v6, %v4151_v1  ;;  %vm2253_vm14 = vweird.f32 %v4160_v25  ;;  %v4248_v9 = vpop.xlane.xlu2 %1466 }
 0x207   :  { %v2249_v43 = vmul.f32 0.5, %v2248_v20  ;;  %v2257_v58 = vmul.f32 %v4208_v30, %v4154_v37  ;;  %v2125_v31 = vmax.f32 %v2093_v18, 0.0  ;;  %vm1620_vm0 = vweird.f32 %v4151_v1  ;;  %vm2254_vm1 = vmor %vm2252_vm13, %vm2253_vm14 }
 0x208   :  { %3162 = vst [vmem:[#allocation7] sm:$0xff] %v3161_v48   ;;  %v1613_v46 = vsel %vm1612_vm15, %v4130_v59, %v1609_v17  ;;  %v1616_v0 = vmul.f32 %v4200_v6, %v1615_v7  ;;  %v4228_v3 = vmax.f32 %v4206_v10, 1e-24  ;;  %v4234_v44 = vadd.f32 %v1329_v35, %v1241_v38 }
 0x209   :  { %v2250_v33 = vsub.f32 1.5, %v2249_v43  ;;  %v2258_v56 = vmul.f32 %v4208_v30, %v2257_v58  ;;  %v4232_v29 = vadd.f32 1e-05, %v2125_v31  ;;  %v2574_v24 = vmul.f32 %v4082_v28, %v2538_v16 }
 0x20a   :  { %v1902_v59 = vmul.f32 0.03125, %v1613_v46  ;;  %v1966_v50 = vmul.f32 %v1613_v46, %v1613_v46  ;;  %v1617_v4 = vmul.f32 0.5, %v1616_v0  ;;  %vm1621_vm2 = vweird.f32 %v4200_v6 }
 0x20b   :  { %v2251_v57 = vmul.f32 %v4160_v25, %v2250_v33  ;;  %v2259_v20 = vmul.f32 0.5, %v2258_v56  ;;  %3291 = vrsqrt.f32 %v4232_v29  ;;  %vm2263_vm3 = vweird.f32 %v4208_v30  ;;  %vm1622_vm5 = vmor %vm1620_vm0, %vm1621_vm2 }
 0x20c   :  { %v4245_v48 = vmul.f32 %v1902_v59, %v4148_v11  ;;  %v1998_v36 = vmul.f32 %v1966_v50, %v4034_v22  ;;  %v1618_v42 = vsub.f32 1.5, %v1617_v4  ;;  %3293 = vrsqrt.f32 %v4228_v3  ;;  %v1245_v22 = vpop.f32.mrf.mxu2 }
 0x20d   :  { %v2255_v53 = vsel %vm2254_vm1, %v4160_v25, %v2251_v57  ;;  %v2260_v43 = vsub.f32 1.5, %v2259_v20  ;;  %v1439_v25 = vmul.f32 %v4234_v44, %v4234_v44  ;;  %v2610_v18 = vadd.f32 %v4105_v15, %v2574_v24  ;;  %1398 = vadd.xlane.f32.xlu0 %v4234_v44  ;;  %v4293_v24 = vpop.xlane.xlu1 %1370 }
 0x20e   :  { %v2539_v35 = vmul.f32 %v2255_v53, %v2155_v39  ;;  %v2030_v38 = vmul.f32 0.03125, %v1998_v36  ;;  %v2062_v11 = vmul.f32 %v4245_v48, %v4245_v48  ;;  %vm2262_vm4 = vweird.f32 %v4154_v37  ;;  %v4302_v36 = vpop.xlane.xlu0 %1468 }
 0x20f   :  { %v2261_v16 = vmul.f32 %v4208_v30, %v2260_v43  ;;  %v1619_v17 = vmul.f32 %v4200_v6, %v1618_v42  ;;  %1494 = vadd.xlane.f32.xlu1 %v1439_v25  ;;  %v4267_v7 = vmax.f32 %v4248_v9, 1e-24  ;;  %v2156_v58 = vsub.f32 %v4172_v8, %v4095_v54  ;;  %vm4274_vm6 = vmor %vm2262_vm4, %vm2263_vm3  ;;  %v4289_v54 = vld [vmem:[%s5453_s4] ss:$0 sm:$0xff] }
 0x210   :  { %v2575_v39 = vmul.f32 %v4082_v28, %v2539_v35  ;;  %v2157_v31 = vsub.f32 %v4203_v32, %v4175_v23  ;;  %v2094_v1 = vsub.f32 %v2030_v38, %v2062_v11  ;;  %v1244_v8 = vadd.f32 %v4289_v54, %v4198_v21 }
 0x211   :  { %v4280_v0 = vpop.eup %3291  ;;  %v2265_v57 = vsel %vm4274_vm6, %v4208_v30, %v2261_v16  ;;  %v1623_v56 = vsel %vm1622_vm5, %v4200_v6, %v1619_v17  ;;  %3295 = vrsqrt.f32 %v4267_v7  ;;  %v2642_v59 = vmax.f32 %v2610_v18, 0.0  ;;  %v1334_v18 = vpop.f32.mrf.mxu3 }
 0x212   :  { %v2611_v33 = vadd.f32 %v4105_v15, %v2575_v39  ;;  %v2267_v4 = vmul.f32 %v4280_v0, %v4232_v29  ;;  %v4299_v30 = vmul.f32 %v1613_v46, %v3870_v19  ;;  %v3294_v6 = vpop.eup %3293  ;;  %vm2272_vm7 = vweird.f32 %v4232_v29 }
 0x213   :  { %v2126_v53 = vmax.f32 %v2094_v1, 0.0  ;;  %v1967_v20 = vmul.f32 %v1623_v56, %v1623_v56  ;;  %v1903_v35 = vmul.f32 0.03125, %v1623_v56  ;;  %v2540_v42 = vmul.f32 %v2265_v57, %v2156_v58 }
 0x214   :  { %v2643_v50 = vmax.f32 %v2611_v33, 0.0  ;;  %v2268_v43 = vmul.f32 %v4280_v0, %v2267_v4  ;;  %v1625_v25 = vmul.f32 %v3294_v6, %v4228_v3  ;;  %v4312_v38 = vadd.f32 %v1332_v60, %v1244_v8  ;;  %v1248_v1 = vpop.f32.mrf.mxu2 }
 0x215   :  { %v4306_v39 = vadd.f32 1e-05, %v2126_v53  ;;  %v1999_v19 = vmul.f32 %v1967_v20, %v4128_v49  ;;  %v4310_v46 = vmul.f32 %v1903_v35, %v4194_v2  ;;  %v1246_v17 = vadd.f32 %v4289_v54, %v1245_v22 }
 0x216   :  { %v3166_v21 = vpack.c.bf16 %v2643_v50, %v2642_v59  ;;  %v2269_v11 = vmul.f32 0.5, %v2268_v43  ;;  %v1626_v16 = vmul.f32 %v3294_v6, %v1625_v25  ;;  %v4316_v33 = vmax.f32 %v4302_v36, 1e-24  ;;  %v4331_v50 = vpop.xlane.xlu1 %1470 }
 0x217   :  { %v4318_v58 = vpop.eup %3295  ;;  %3297 = vrsqrt.f32 %v4306_v39  ;;  %v2031_v37 = vmul.f32 0.03125, %v1999_v19  ;;  %v2063_v49 = vmul.f32 %v4310_v46, %v4310_v46  ;;  %vm1630_vm8 = vweird.f32 %v4228_v3  ;;  %1400 = vadd.xlane.f32.xlu1 %v4312_v38 }
 0x218   :  { %3238 = vst [vmem:[#allocation7 + $0x8] sm:$0xff] %v3166_v21   ;;  %v2576_v2 = vmul.f32 %v4082_v28, %v2540_v42  ;;  %v2270_v60 = vsub.f32 1.5, %v2269_v11  ;;  %vm2273_vm9 = vweird.f32 %v4280_v0  ;;  %v1627_v22 = vmul.f32 0.5, %v1626_v16 }
 0x219   :  { %v2095_v57 = vsub.f32 %v2031_v37, %v2063_v49  ;;  %vm1631_vm10 = vweird.f32 %v3294_v6  ;;  %v1635_v8 = vmul.f32 %v4318_v58, %v4267_v7  ;;  %v1440_v59 = vmul.f32 %v4312_v38, %v4312_v38  ;;  %vm2274_vm11 = vmor %vm2272_vm7, %vm2273_vm9 }
 0x21a   :  { %v2271_v4 = vmul.f32 %v4280_v0, %v2270_v60  ;;  %v1628_v53 = vsub.f32 1.5, %v1627_v22  ;;  %v4334_v20 = vadd.f32 %v1334_v18, %v1246_v17  ;;  %3299 = vrsqrt.f32 %v4316_v33  ;;  %vm1632_vm12 = vmor %vm1630_vm8, %vm1631_vm10 }
 0x21b   :  { %v2158_v35 = vsub.f32 %v4299_v30, %v4245_v48  ;;  %v2127_v21 = vmax.f32 %v2095_v57, 0.0  ;;  %v1636_v42 = vmul.f32 %v4318_v58, %v1635_v8  ;;  %1496 = vadd.xlane.f32.xlu2 %v1440_v59  ;;  %v1249_v43 = vadd.f32 %v4289_v54, %v1248_v1  ;;  %v1337_v1 = vpop.f32.mrf.mxu3 }
 0x21c   :  { %v2275_v25 = vsel %vm2274_vm11, %v4280_v0, %v2271_v4  ;;  %v1629_v19 = vmul.f32 %v3294_v6, %v1628_v53  ;;  %v1441_v18 = vmul.f32 %v4334_v20, %v4334_v20  ;;  %v4347_v11 = vmax.f32 %v4331_v50, 1e-24 }
 0x21d   :  { %v4349_v29 = vpop.eup %3297  ;;  %v2541_v16 = vmul.f32 %v2275_v25, %v2157_v31  ;;  %v4355_v17 = vmul.f32 %v1623_v56, %v3876_v34  ;;  %v4357_v37 = vadd.f32 1e-05, %v2127_v21  ;;  %v1637_v0 = vmul.f32 0.5, %v1636_v42 }
 0x21e   :  { %v2612_v49 = vadd.f32 %v4105_v15, %v2576_v2  ;;  %v2277_v60 = vmul.f32 %v4349_v29, %v4306_v39  ;;  %v4365_v22 = vsel %vm1632_vm12, %v3294_v6, %v1629_v19  ;;  %1498 = vadd.xlane.f32.xlu0 %v1441_v18  ;;  %3301 = vrsqrt.f32 %v4347_v11  ;;  %v4379_v2 = vpop.xlane.xlu2 %1372 }
 0x21f   :  { %v2577_v34 = vmul.f32 %v4082_v28, %v2541_v16  ;;  %3303 = vrsqrt.f32 %v4357_v37  ;;  %v1968_v23 = vmul.f32 %v4365_v22, %v4365_v22  ;;  %v4372_v32 = vadd.f32 %v1337_v1, %v1249_v43 }
 0x220   :  { %v4374_v3 = vpop.eup %3299  ;;  %v2278_v31 = vmul.f32 %v4349_v29, %v2277_v60  ;;  %v1904_v56 = vmul.f32 0.03125, %v4365_v22  ;;  %v1638_v6 = vsub.f32 1.5, %v1637_v0  ;;  %vm1641_vm13 = vweird.f32 %v4318_v58  ;;  %v1250_v0 = vpop.f32.mrf.mxu2 }
 0x221   :  { %v2613_v57 = vadd.f32 %v4105_v15, %v2577_v34  ;;  %v2000_v8 = vmul.f32 %v1968_v23, %v4206_v10  ;;  %vm1640_vm14 = vweird.f32 %v4267_v7  ;;  %v1645_v59 = vmul.f32 %v4374_v3, %v4316_v33 }
 0x222   :  { %v2644_v4 = vmax.f32 %v2612_v49, 0.0  ;;  %v2279_v53 = vmul.f32 0.5, %v2278_v31  ;;  %v4387_v21 = vmul.f32 %v1904_v56, %v4242_v40  ;;  %v1639_v42 = vmul.f32 %v4318_v58, %v1638_v6  ;;  %vm1642_vm15 = vmor %vm1640_vm14, %vm1641_vm13 }
 0x223   :  { %v2645_v43 = vmax.f32 %v2613_v57, 0.0  ;;  %v2032_v25 = vmul.f32 0.03125, %v2000_v8  ;;  %v1646_v19 = vmul.f32 %v4374_v3, %v1645_v59  ;;  %1402 = vadd.xlane.f32.xlu2 %v4334_v20  ;;  %v1442_v10 = vmul.f32 %v4372_v32, %v4372_v32 }
 0x224   :  { %v4394_v7 = vpop.eup %3301  ;;  %v2280_v18 = vsub.f32 1.5, %v2279_v53  ;;  %vm2283_vm0 = vweird.f32 %v4349_v29  ;;  %v2064_v40 = vmul.f32 %v4387_v21, %v4387_v21  ;;  %v4400_v16 = vsel %vm1642_vm15, %v4318_v58, %v1639_v42 }
 0x225   :  { %v4402_v49 = vpop.eup %3303  ;;  %v3171_v60 = vpack.c.bf16 %v2645_v43, %v2644_v4  ;;  %vm2282_vm1 = vweird.f32 %v4306_v39  ;;  %v1905_v1 = vmul.f32 0.03125, %v4400_v16  ;;  %v1969_v34 = vmul.f32 %v4400_v16, %v4400_v16  ;;  %1500 = vadd.xlane.f32.xlu1 %v1442_v10  ;;  %v4425_v4 = vpop.xlane.xlu0 %1374 }
 0x226   :  { %v2281_v23 = vmul.f32 %v4349_v29, %v2280_v18  ;;  %v2159_v31 = vsub.f32 %v4355_v17, %v4310_v46  ;;  %v2287_v58 = vmul.f32 %v4402_v49, %v4357_v37  ;;  %v2096_v56 = vsub.f32 %v2032_v25, %v2064_v40  ;;  %1404 = vadd.xlane.f32.xlu0 %v4372_v32  ;;  %vm2284_vm2 = vmor %vm2282_vm1, %vm2283_vm0  ;;  %v4427_v53 = vpop.xlane.xlu2 %1472 }
 0x227   :  { %3239 = vst [vmem:[#allocation7 + $0x10] sm:$0xff] %v3171_v60   ;;  %v4417_v39 = vmul.f32 %v1905_v1, %v4293_v24  ;;  %v2001_v6 = vmul.f32 %v1969_v34, %v4248_v9  ;;  %v1647_v57 = vmul.f32 0.5, %v1646_v19  ;;  %v1655_v8 = vmul.f32 %v4394_v7, %v4347_v11  ;;  %v1339_v19 = vpop.f32.mrf.mxu3 }
 0x228   :  { %v2285_v46 = vsel %vm2284_vm2, %v4349_v29, %v2281_v23  ;;  %v2288_v17 = vmul.f32 %v4402_v49, %v2287_v58  ;;  %v2128_v59 = vmax.f32 %v2096_v56, 0.0  ;;  %vm1650_vm3 = vweird.f32 %v4316_v33 }
 0x229   :  { %v2542_v24 = vmul.f32 %v2285_v46, %v2158_v35  ;;  %v2033_v9 = vmul.f32 0.03125, %v2001_v6  ;;  %v2065_v42 = vmul.f32 %v4417_v39, %v4417_v39  ;;  %vm1651_vm4 = vweird.f32 %v4374_v3  ;;  %v1253_v6 = vpop.f32.mrf.mxu2 }
 0x22a   :  { %v2289_v29 = vmul.f32 0.5, %v2288_v17  ;;  %v4435_v43 = vadd.f32 1e-05, %v2128_v59  ;;  %v1648_v25 = vsub.f32 1.5, %v1647_v57  ;;  %v1656_v10 = vmul.f32 %v4394_v7, %v1655_v8  ;;  %vm1652_vm7 = vmor %vm1650_vm3, %vm1651_vm4 }
 0x22b   :  { %vm2292_vm5 = vweird.f32 %v4357_v37  ;;  %v2097_v18 = vsub.f32 %v2033_v9, %v2065_v42  ;;  %v1251_v40 = vadd.f32 %v4289_v54, %v1250_v0  ;;  %v4441_v48 = vmax.f32 %v4427_v53, 1e-24 }
 0x22c   :  { %v2290_v30 = vsub.f32 1.5, %v2289_v29  ;;  %vm2293_vm6 = vweird.f32 %v4402_v49  ;;  %3305 = vrsqrt.f32 %v4435_v43  ;;  %v1649_v35 = vmul.f32 %v4374_v3, %v1648_v25  ;;  %v4483_v29 = vpop.xlane.xlu1 %1376 }
 0x22d   :  { %v2578_v60 = vmul.f32 %v4082_v28, %v2542_v24  ;;  %v2129_v1 = vmax.f32 %v2097_v18, 0.0  ;;  %v1657_v34 = vmul.f32 0.5, %v1656_v10  ;;  %v4451_v0 = vadd.f32 %v1339_v19, %v1251_v40  ;;  %vm2294_vm8 = vmor %vm2292_vm5, %vm2293_vm6  ;;  %v4470_v46 = vpop.xlane.xlu0 %1474 }
 0x22e   :  { %v2291_v23 = vmul.f32 %v4402_v49, %v2290_v30  ;;  %v4456_v58 = vmul.f32 %v4365_v22, %v3882_v47  ;;  %v1653_v56 = vsel %vm1652_vm7, %v4374_v3, %v1649_v35  ;;  %3307 = vrsqrt.f32 %v4441_v48 }
 0x22f   :  { %v4462_v57 = vadd.f32 1e-05, %v2129_v1  ;;  %v1970_v33 = vmul.f32 %v1653_v56, %v1653_v56  ;;  %vm1660_vm9 = vweird.f32 %v4347_v11  ;;  %vm1661_vm10 = vweird.f32 %v4394_v7  ;;  %1406 = vadd.xlane.f32.xlu1 %v4451_v0  ;;  %v1342_v35 = vpop.f32.mrf.mxu3 }
 0x230   :  { %v2295_v47 = vsel %vm2294_vm8, %v4402_v49, %v2291_v23  ;;  %v1906_v22 = vmul.f32 0.03125, %v1653_v56  ;;  %v1658_v8 = vsub.f32 1.5, %v1657_v34  ;;  %v1443_v3 = vmul.f32 %v4451_v0, %v4451_v0  ;;  %vm1662_vm11 = vmor %vm1660_vm9, %vm1661_vm10 }
 0x231   :  { %v2614_v37 = vadd.f32 %v4105_v15, %v2578_v60  ;;  %v2543_v17 = vmul.f32 %v2295_v47, %v2159_v31  ;;  %3309 = vrsqrt.f32 %v4462_v57  ;;  %v2002_v59 = vmul.f32 %v1970_v33, %v4302_v36 }
 0x232   :  { %v4475_v24 = vpop.eup %3305  ;;  %v2160_v9 = vsub.f32 %v4456_v58, %v4387_v21  ;;  %v4480_v49 = vmul.f32 %v1906_v22, %v4379_v2  ;;  %v1659_v42 = vmul.f32 %v4394_v7, %v1658_v8  ;;  %1502 = vadd.xlane.f32.xlu2 %v1443_v3  ;;  %v1254_v25 = vadd.f32 %v4289_v54, %v1253_v6 }
 0x233   :  { %v2579_v31 = vmul.f32 %v4082_v28, %v2543_v17  ;;  %v2297_v36 = vmul.f32 %v4475_v24, %v4435_v43  ;;  %v2034_v19 = vmul.f32 0.03125, %v2002_v59  ;;  %v4494_v2 = vmax.f32 %v4470_v46, 1e-24  ;;  %v1255_v17 = vpop.f32.mrf.mxu2 }
 0x234   :  { %v4496_v10 = vpop.eup %3307  ;;  %vm2302_vm12 = vweird.f32 %v4435_v43  ;;  %v4501_v18 = vmul.f32 %v4400_v16, %v3888_v63  ;;  %v2066_v40 = vmul.f32 %v4480_v49, %v4480_v49  ;;  %v4506_v30 = vsel %vm1662_vm11, %v4394_v7, %v1659_v42 }
 0x235   :  { %v2646_v11 = vmax.f32 %v2614_v37, 0.0  ;;  %v2615_v60 = vadd.f32 %v4105_v15, %v2579_v31  ;;  %v2298_v1 = vmul.f32 %v4475_v24, %v2297_v36  ;;  %v1971_v34 = vmul.f32 %v4506_v30, %v4506_v30 }
 0x236   :  { %v2098_v23 = vsub.f32 %v2034_v19, %v2066_v40  ;;  %v1907_v6 = vmul.f32 0.03125, %v4506_v30  ;;  %v1665_v63 = vmul.f32 %v4496_v10, %v4441_v48  ;;  %v4515_v16 = vadd.f32 %v1342_v35, %v1254_v25  ;;  %v4537_v35 = vpop.xlane.xlu2 %1378 }
 0x237   :  { %v4517_v33 = vpop.eup %3309  ;;  %v2647_v7 = vmax.f32 %v2615_v60, 0.0  ;;  %v2299_v47 = vmul.f32 0.5, %v2298_v1  ;;  %v2003_v22 = vmul.f32 %v1971_v34, %v4331_v50  ;;  %vm1670_vm13 = vweird.f32 %v4441_v48 }
 0x238   :  { %3311 = vrsqrt.f32 %v4494_v2  ;;  %vm2303_vm14 = vweird.f32 %v4475_v24  ;;  %v2307_v8 = vmul.f32 %v4517_v33, %v4462_v57  ;;  %v2130_v3 = vmax.f32 %v2098_v23, 0.0 }
 0x239   :  { %v4526_v37 = vmul.f32 %v1907_v6, %v4425_v4  ;;  %v3176_v59 = vpack.c.bf16 %v2647_v7, %v2646_v11  ;;  %v2300_v42 = vsub.f32 1.5, %v2299_v47  ;;  %v2035_v25 = vmul.f32 0.03125, %v2003_v22  ;;  %v4540_v4 = vpop.xlane.xlu1 %1476  ;;  %vm2304_vm0 = vmor %vm2302_vm12, %vm2303_vm14 }
 0x23a   :  { %v1666_v31 = vmul.f32 %v4496_v10, %v1665_v63  ;;  %v2308_v50 = vmul.f32 %v4517_v33, %v2307_v8  ;;  %v4531_v36 = vmul.f32 %v1653_v56, %v3894_v13  ;;  %v4533_v19 = vadd.f32 1e-05, %v2130_v3  ;;  %1408 = vadd.xlane.f32.xlu2 %v4515_v16  ;;  %v1344_v8 = vpop.f32.mrf.mxu3 }
 0x23b   :  { %v2067_v40 = vmul.f32 %v4526_v37, %v4526_v37  ;;  %3240 = vst [vmem:[#allocation7 + $0x18] sm:$0xff] %v3176_v59   ;;  %v2301_v11 = vmul.f32 %v4475_v24, %v2300_v42  ;;  %vm1671_vm15 = vweird.f32 %v4496_v10  ;;  %v1444_v13 = vmul.f32 %v4515_v16, %v4515_v16 }
 0x23c   :  { %v1667_v60 = vmul.f32 0.5, %v1666_v31  ;;  %v2309_v56 = vmul.f32 0.5, %v2308_v50  ;;  %vm2313_vm1 = vweird.f32 %v4517_v33  ;;  %3313 = vrsqrt.f32 %v4533_v19  ;;  %vm1672_vm3 = vmor %vm1670_vm13, %vm1671_vm15 }
 0x23d   :  { %v2099_v1 = vsub.f32 %v2035_v25, %v2067_v40  ;;  %v2305_v23 = vsel %vm2304_vm0, %v4475_v24, %v2301_v11  ;;  %1504 = vadd.xlane.f32.xlu0 %v1444_v13  ;;  %v1256_v63 = vadd.f32 %v4289_v54, %v1255_v17  ;;  %v4557_v7 = vmax.f32 %v4540_v4, 1e-24 }
 0x23e   :  { %v4552_v34 = vpop.eup %3311  ;;  %v1668_v6 = vsub.f32 1.5, %v1667_v60  ;;  %v2544_v43 = vmul.f32 %v2305_v23, %v2160_v9  ;;  %v2310_v47 = vsub.f32 1.5, %v2309_v56  ;;  %vm2312_vm2 = vweird.f32 %v4462_v57 }
 0x23f   :  { %v2131_v22 = vmax.f32 %v2099_v1, 0.0  ;;  %v1675_v3 = vmul.f32 %v4552_v34, %v4494_v2  ;;  %v4566_v59 = vadd.f32 %v1344_v8, %v1256_v63  ;;  %3315 = vrsqrt.f32 %v4557_v7  ;;  %vm2314_vm4 = vmor %vm2312_vm2, %vm2313_vm1 }
 0x240   :  { %v1669_v24 = vmul.f32 %v4496_v10, %v1668_v6  ;;  %v2580_v17 = vmul.f32 %v4082_v28, %v2544_v43  ;;  %v2311_v42 = vmul.f32 %v4517_v33, %v2310_v47  ;;  %v2161_v57 = vsub.f32 %v4501_v18, %v4417_v39  ;;  %v1258_v39 = vpop.f32.mrf.mxu2  ;;  %v4598_v18 = vpop.xlane.xlu2 %1478 }
 0x241   :  { %v4571_v21 = vadd.f32 1e-05, %v2131_v22  ;;  %v1676_v58 = vmul.f32 %v4552_v34, %v1675_v3  ;;  %v2162_v9 = vsub.f32 %v4531_v36, %v4480_v49  ;;  %v1445_v31 = vmul.f32 %v4566_v59, %v4566_v59 }
 0x242   :  { %v4585_v25 = vsel %vm1672_vm3, %v4496_v10, %v1669_v24  ;;  %v4589_v50 = vpop.eup %3313  ;;  %v2315_v48 = vsel %vm2314_vm4, %v4517_v33, %v2311_v42  ;;  %v4594_v40 = vmul.f32 %v4506_v30, %v3900_v27  ;;  %vm1680_vm5 = vweird.f32 %v4494_v2  ;;  %v4604_v33 = vpop.xlane.xlu0 %1380 }
 0x243   :  { %3317 = vrsqrt.f32 %v4571_v21  ;;  %v2545_v10 = vmul.f32 %v2315_v48, %v2161_v57  ;;  %v2317_v11 = vmul.f32 %v4589_v50, %v4533_v19  ;;  %vm2322_vm6 = vweird.f32 %v4533_v19  ;;  %1506 = vadd.xlane.f32.xlu1 %v1445_v31  ;;  %v1347_v57 = vpop.f32.mrf.mxu3  ;;  %v4633_v31 = vpop.xlane.xlu1 %1382 }
 0x244   :  { %vm1681_vm7 = vweird.f32 %v4552_v34  ;;  %v2616_v27 = vadd.f32 %v4105_v15, %v2580_v17  ;;  %v1908_v30 = vmul.f32 0.03125, %v4585_v25  ;;  %v1972_v60 = vmul.f32 %v4585_v25, %v4585_v25 }
 0x245   :  { %v1677_v13 = vmul.f32 0.5, %v1676_v58  ;;  %v4610_v56 = vpop.eup %3315  ;;  %v2581_v1 = vmul.f32 %v4082_v28, %v2545_v10  ;;  %v2318_v23 = vmul.f32 %v4589_v50, %v2317_v11  ;;  %1410 = vadd.xlane.f32.xlu0 %v4566_v59  ;;  %v1259_v6 = vadd.f32 %v4289_v54, %v1258_v39  ;;  %vm1682_vm9 = vmor %vm1680_vm5, %vm1681_vm7 }
 0x246   :  { %v4617_v63 = vmax.f32 %v4598_v18, 1e-24  ;;  %v4620_v43 = vmul.f32 %v1908_v30, %v4483_v29  ;;  %v2004_v47 = vmul.f32 %v1972_v60, %v4427_v53  ;;  %v1685_v8 = vmul.f32 %v4610_v56, %v4557_v7 }
 0x247   :  { %v1678_v22 = vsub.f32 1.5, %v1677_v13  ;;  %v2617_v3 = vadd.f32 %v4105_v15, %v2581_v1  ;;  %v2319_v24 = vmul.f32 0.5, %v2318_v23  ;;  %vm2323_vm8 = vweird.f32 %v4589_v50 }
 0x248   :  { %3319 = vrsqrt.f32 %v4617_v63  ;;  %v2648_v42 = vmax.f32 %v2616_v27, 0.0  ;;  %v2036_v58 = vmul.f32 0.03125, %v2004_v47  ;;  %v2068_v29 = vmul.f32 %v4620_v43, %v4620_v43  ;;  %vm2324_vm11 = vmor %vm2322_vm6, %vm2323_vm8 }
 0x249   :  { %v4628_v17 = vpop.eup %3317  ;;  %v1679_v53 = vmul.f32 %v4552_v34, %v1678_v22  ;;  %v2649_v48 = vmax.f32 %v2617_v3, 0.0  ;;  %v2320_v39 = vsub.f32 1.5, %v2319_v24  ;;  %v4641_v11 = vadd.f32 %v1347_v57, %v1259_v6 }
 0x24a   :  { %v2327_v10 = vmul.f32 %v4628_v17, %v4571_v21  ;;  %v2100_v27 = vsub.f32 %v2036_v58, %v2068_v29  ;;  %v1686_v60 = vmul.f32 %v4610_v56, %v1685_v8  ;;  %vm1690_vm10 = vweird.f32 %v4557_v7  ;;  %v4653_v2 = vpop.xlane.xlu0 %1480 }
 0x24b   :  { %v4644_v30 = vsel %vm1682_vm9, %v4552_v34, %v1679_v53  ;;  %v3181_v13 = vpack.c.bf16 %v2649_v48, %v2648_v42  ;;  %v2321_v1 = vmul.f32 %v4589_v50, %v2320_v39  ;;  %1412 = vadd.xlane.f32.xlu1 %v4641_v11  ;;  %vm1691_vm12 = vweird.f32 %v4610_v56  ;;  %v1260_v39 = vpop.f32.mrf.mxu2 }
 0x24c   :  { %v2328_v23 = vmul.f32 %v4628_v17, %v2327_v10  ;;  %v1973_v47 = vmul.f32 %v4644_v30, %v4644_v30  ;;  %v2132_v34 = vmax.f32 %v2100_v27, 0.0  ;;  %v1909_v6 = vmul.f32 0.03125, %v4644_v30  ;;  %vm1692_vm15 = vmor %vm1690_vm10, %vm1691_vm12 }
 0x24d   :  { %v1687_v22 = vmul.f32 0.5, %v1686_v60  ;;  %3241 = vst [vmem:[#allocation7 + $0x20] sm:$0xff] %v3181_v13   ;;  %v2325_v3 = vsel %vm2324_vm11, %v4589_v50, %v2321_v1  ;;  %v1446_v58 = vmul.f32 %v4641_v11, %v4641_v11  ;;  %vm2333_vm13 = vweird.f32 %v4628_v17 }
 0x24e   :  { %v4661_v8 = vpop.eup %3319  ;;  %v2329_v24 = vmul.f32 0.5, %v2328_v23  ;;  %v2005_v42 = vmul.f32 %v1973_v47, %v4470_v46  ;;  %v2546_v19 = vmul.f32 %v2325_v3, %v2162_v9  ;;  %v4670_v29 = vadd.f32 1e-05, %v2132_v34 }
 0x24f   :  { %v4673_v53 = vmul.f32 %v1909_v6, %v4537_v35  ;;  %v1688_v57 = vsub.f32 1.5, %v1687_v22  ;;  %v1695_v46 = vmul.f32 %v4661_v8, %v4617_v63  ;;  %1508 = vadd.xlane.f32.xlu2 %v1446_v58  ;;  %vm2332_vm14 = vweird.f32 %v4571_v21  ;;  %v4686_v35 = vpop.xlane.xlu1 %1482 }
 0x250   :  { %v2330_v48 = vsub.f32 1.5, %v2329_v24  ;;  %v2037_v50 = vmul.f32 0.03125, %v2005_v42  ;;  %v4681_v49 = vmul.f32 %v4585_v25, %v3906_v41  ;;  %3321 = vrsqrt.f32 %v4670_v29  ;;  %vm2334_vm0 = vmor %vm2332_vm14, %vm2333_vm13  ;;  %v4712_v42 = vpop.xlane.xlu2 %1384 }
 0x251   :  { %v2069_v36 = vmul.f32 %v4673_v53, %v4673_v53  ;;  %v2582_v9 = vmul.f32 %v4082_v28, %v2546_v19  ;;  %v1689_v27 = vmul.f32 %v4610_v56, %v1688_v57  ;;  %v1696_v41 = vmul.f32 %v4661_v8, %v1695_v46 }
 0x252   :  { %v2331_v10 = vmul.f32 %v4628_v17, %v2330_v48  ;;  %v2163_v21 = vsub.f32 %v4594_v40, %v4526_v37  ;;  %v1261_v60 = vadd.f32 %v4289_v54, %v1260_v39  ;;  %v4702_v13 = vmax.f32 %v4653_v2, 1e-24  ;;  %v1349_v40 = vpop.f32.mrf.mxu3 }
 0x253   :  { %v2101_v25 = vsub.f32 %v2037_v50, %v2069_v36  ;;  %v2164_v7 = vsub.f32 %v4681_v49, %v4620_v43  ;;  %v1693_v23 = vsel %vm1692_vm15, %v4610_v56, %v1689_v27  ;;  %v1697_v47 = vmul.f32 0.5, %v1696_v41 }
 0x254   :  { %v2335_v1 = vsel %vm2334_vm0, %v4628_v17, %v2331_v10  ;;  %v1974_v37 = vmul.f32 %v1693_v23, %v1693_v23  ;;  %vm1701_vm1 = vweird.f32 %v4661_v8  ;;  %v2618_v22 = vadd.f32 %v4105_v15, %v2582_v9  ;;  %v4714_v17 = vpop.xlane.xlu0 %1386 }
 0x255   :  { %v2547_v34 = vmul.f32 %v2335_v1, %v2163_v21  ;;  %v2133_v6 = vmax.f32 %v2101_v25, 0.0  ;;  %v1910_v54 = vmul.f32 0.03125, %v1693_v23  ;;  %v1698_v3 = vsub.f32 1.5, %v1697_v47 }
 0x256   :  { %v4710_v24 = vadd.f32 %v1349_v40, %v1261_v60  ;;  %v3322_v58 = vpop.eup %3321  ;;  %v2006_v57 = vmul.f32 %v1974_v37, %v4540_v4  ;;  %3323 = vrsqrt.f32 %v4702_v13  ;;  %vm1700_vm2 = vweird.f32 %v4617_v63 }
 0x257   :  { %v2583_v56 = vmul.f32 %v4082_v28, %v2547_v34  ;;  %v4717_v19 = vadd.f32 1e-05, %v2133_v6  ;;  %v2337_v48 = vmul.f32 %v3322_v58, %v4670_v29  ;;  %v4723_v50 = vmul.f32 %v1910_v54, %v4604_v33  ;;  %vm1702_vm3 = vmor %vm1700_vm2, %vm1701_vm1  ;;  %v4742_v21 = vpop.xlane.xlu1 %1388 }
 0x258   :  { %v1699_v46 = vmul.f32 %v4661_v8, %v1698_v3  ;;  %1414 = vadd.xlane.f32.xlu1 %v4710_v24  ;;  %v2038_v28 = vmul.f32 0.03125, %v2006_v57  ;;  %v4733_v4 = vmax.f32 %v4686_v35, 1e-24  ;;  %v4737_v33 = vmul.f32 %v4644_v30, %v3912_v55  ;;  %v4756_v40 = vpop.xlane.xlu2 %1484 }
 0x259   :  { %v2619_v39 = vadd.f32 %v4105_v15, %v2583_v56  ;;  %3325 = vrsqrt.f32 %v4717_v19  ;;  %v2338_v36 = vmul.f32 %v3322_v58, %v2337_v48  ;;  %v2070_v63 = vmul.f32 %v4723_v50, %v4723_v50 }
 0x25a   :  { %v1703_v9 = vsel %vm1702_vm3, %v4661_v8, %v1699_v46  ;;  %v2650_v15 = vmax.f32 %v2618_v22, 0.0  ;;  %vm2342_vm4 = vweird.f32 %v4670_v29  ;;  %v1447_v1 = vmul.f32 %v4710_v24, %v4710_v24 }
 0x25b   :  { %v2651_v10 = vmax.f32 %v2619_v39, 0.0  ;;  %v1911_v27 = vmul.f32 0.03125, %v1703_v9  ;;  %v1975_v41 = vmul.f32 %v1703_v9, %v1703_v9  ;;  %v2339_v25 = vmul.f32 0.5, %v2338_v36 }
 0x25c   :  { %v2102_v60 = vsub.f32 %v2038_v28, %v2070_v63  ;;  %v4747_v55 = vpop.eup %3323  ;;  %3327 = vrsqrt.f32 %v4733_v4  ;;  %vm2343_vm5 = vweird.f32 %v3322_v58  ;;  %1510 = vadd.xlane.f32.xlu0 %v1447_v1  ;;  %v4758_v22 = vpop.xlane.xlu0 %1486  ;;  %vm2352_vm6 = vweird.f32 %v4717_v19 }
 0x25d   :  { %v3186_v30 = vpack.c.bf16 %v2651_v10, %v2650_v15  ;;  %v4750_v47 = vmul.f32 %v1911_v27, %v4633_v31  ;;  %v2007_v8 = vmul.f32 %v1975_v41, %v4598_v18  ;;  %v2340_v34 = vsub.f32 1.5, %v2339_v25  ;;  %vm2344_vm7 = vmor %vm2342_vm4, %vm2343_vm5 }
 0x25e   :  { %v2134_v6 = vmax.f32 %v2102_v60, 0.0  ;;  %v1705_v37 = vmul.f32 %v4747_v55, %v4702_v13  ;;  %v2165_v31 = vsub.f32 %v4737_v33, %v4673_v53  ;;  %v4763_v18 = vmul.f32 %v1693_v23, %v3918_v61  ;;  %v4798_v60 = vld [vmem:[%s5454_s5] ss:$0 sm:$0xff] }
 0x25f   :  { %v3326_v54 = vpop.eup %3325  ;;  %3242 = vst [vmem:[#allocation7 + $0x28] sm:$0xff] %v3186_v30   ;;  %v2039_v3 = vmul.f32 0.03125, %v2007_v8  ;;  %v2071_v56 = vmul.f32 %v4750_v47, %v4750_v47  ;;  %v2341_v57 = vmul.f32 %v3322_v58, %v2340_v34  ;;  %v4776_v61 = vmax.f32 %v4756_v40, 1e-24  ;;  %v4788_v27 = vpop.xlane.xlu1 %1488 }
 0x260   :  { %v2347_v48 = vmul.f32 %v3326_v54, %v4717_v19  ;;  %v4769_v46 = vadd.f32 1e-05, %v2134_v6  ;;  %v1706_v53 = vmul.f32 %v4747_v55, %v1705_v37  ;;  %v4779_v23 = vmax.f32 %v4758_v22, 1e-24  ;;  %v4815_v6 = vld [vmem:[%s5455_s6] ss:$0 sm:$0xff] }
 0x261   :  { %v2103_v39 = vsub.f32 %v2039_v3, %v2071_v56  ;;  %v2345_v28 = vsel %vm2344_vm7, %v3322_v58, %v2341_v57  ;;  %v2166_v33 = vsub.f32 %v4763_v18, %v4723_v50  ;;  %v4791_v58 = vmul.f32 %v1703_v9, %v3924_v5 }
 0x262   :  { %v2348_v36 = vmul.f32 %v3326_v54, %v2347_v48  ;;  %3329 = vrsqrt.f32 %v4769_v46  ;;  %v3328_v63 = vpop.eup %3327  ;;  %v2548_v29 = vmul.f32 %v2345_v28, %v2164_v7  ;;  %v1707_v10 = vmul.f32 0.5, %v1706_v53 }
 0x263   :  { %v2135_v15 = vmax.f32 %v2103_v39, 0.0  ;;  %3331 = vrsqrt.f32 %v4776_v61  ;;  %vm1711_vm8 = vweird.f32 %v4747_v55  ;;  %v1715_v25 = vmul.f32 %v3328_v63, %v4733_v4 }
 0x264   :  { %v2349_v41 = vmul.f32 0.5, %v2348_v36  ;;  %v2584_v43 = vmul.f32 %v4798_v60, %v2548_v29  ;;  %v1708_v7 = vsub.f32 1.5, %v1707_v10  ;;  %3333 = vrsqrt.f32 %v4779_v23 }
 0x265   :  { %v4801_v49 = vadd.f32 1e-05, %v2135_v15  ;;  %vm2353_vm9 = vweird.f32 %v3326_v54  ;;  %v1716_v5 = vmul.f32 %v3328_v63, %v1715_v25  ;;  %v4805_v9 = vmax.f32 %v4788_v27, 1e-24 }
 0x266   :  { %v2350_v1 = vsub.f32 1.5, %v2349_v41  ;;  %v2167_v30 = vsub.f32 %v4791_v58, %v4750_v47  ;;  %v1709_v8 = vmul.f32 %v4747_v55, %v1708_v7  ;;  %vm1710_vm10 = vweird.f32 %v4702_v13  ;;  %vm2354_vm13 = vmor %vm2352_vm6, %vm2353_vm9 }
 0x267   :  { %3335 = vrsqrt.f32 %v4801_v49  ;;  %v2620_v37 = vadd.f32 %v4815_v6, %v2584_v43  ;;  %vm1712_vm11 = vmor %vm1710_vm10, %vm1711_vm8  ;;  %v1717_v56 = vmul.f32 0.5, %v1716_v5  ;;  %vm1720_vm12 = vweird.f32 %v4733_v4 }
 0x268   :  { %v3330_v34 = vpop.eup %3329  ;;  %v2351_v3 = vmul.f32 %v3326_v54, %v2350_v1  ;;  %vm2362_vm14 = vweird.f32 %v4769_v46  ;;  %v4829_v48 = vsel %vm1712_vm11, %v4747_v55, %v1709_v8  ;;  %vm1721_vm15 = vweird.f32 %v3328_v63 }
 0x269   :  { %v4821_v57 = vpop.eup %3331  ;;  %v2357_v13 = vmul.f32 %v3330_v34, %v4769_v46  ;;  %v1976_v53 = vmul.f32 %v4829_v48, %v4829_v48  ;;  %v1912_v28 = vmul.f32 0.03125, %v4829_v48  ;;  %3337 = vrsqrt.f32 %v4805_v9  ;;  %vm1722_vm1 = vmor %vm1720_vm12, %vm1721_vm15 }
 0x26a   :  { %v2355_v39 = vsel %vm2354_vm13, %v3326_v54, %v2351_v3  ;;  %v4835_v36 = vpop.eup %3333  ;;  %v1718_v15 = vsub.f32 1.5, %v1717_v56  ;;  %v1725_v10 = vmul.f32 %v4821_v57, %v4776_v61  ;;  %v2652_v41 = vmax.f32 %v2620_v37, 0.0 }
 0x26b   :  { %v2549_v19 = vmul.f32 %v2355_v39, %v2165_v31  ;;  %v2358_v29 = vmul.f32 %v3330_v34, %v2357_v13  ;;  %vm2363_vm0 = vweird.f32 %v3330_v34  ;;  %v2008_v55 = vmul.f32 %v1976_v53, %v4653_v2 }
 0x26c   :  { %v4841_v54 = vmul.f32 %v1912_v28, %v4712_v42  ;;  %v1719_v1 = vmul.f32 %v3328_v63, %v1718_v15  ;;  %v1726_v5 = vmul.f32 %v4821_v57, %v1725_v10  ;;  %v1735_v2 = vmul.f32 %v4835_v36, %v4779_v23  ;;  %vm2364_vm4 = vmor %vm2362_vm14, %vm2363_vm0 }
 0x26d   :  { %v3336_v25 = vpop.eup %3335  ;;  %v2585_v43 = vmul.f32 %v4798_v60, %v2549_v19  ;;  %v2359_v7 = vmul.f32 0.5, %v2358_v29  ;;  %v2040_v8 = vmul.f32 0.03125, %v2008_v55  ;;  %vm1731_vm2 = vweird.f32 %v4821_v57 }
 0x26e   :  { %v2367_v31 = vmul.f32 %v3336_v25, %v4801_v49  ;;  %v2072_v3 = vmul.f32 %v4841_v54, %v4841_v54  ;;  %v4854_v56 = vsel %vm1722_vm1, %v3328_v63, %v1719_v1  ;;  %vm2373_vm3 = vweird.f32 %v3336_v25 }
 0x26f   :  { %v2621_v42 = vadd.f32 %v4815_v6, %v2585_v43  ;;  %v2360_v37 = vsub.f32 1.5, %v2359_v7  ;;  %v4857_v13 = vpop.eup %3337  ;;  %v1977_v28 = vmul.f32 %v4854_v56, %v4854_v56  ;;  %v1913_v29 = vmul.f32 0.03125, %v4854_v56 }
 0x270   :  { %v2368_v39 = vmul.f32 %v3336_v25, %v2367_v31  ;;  %v2104_v53 = vsub.f32 %v2040_v8, %v2072_v3  ;;  %v1727_v15 = vmul.f32 0.5, %v1726_v5  ;;  %v1736_v43 = vmul.f32 %v4835_v36, %v1735_v2 }
 0x271   :  { %v2653_v4 = vmax.f32 %v2621_v42, 0.0  ;;  %v2361_v19 = vmul.f32 %v3330_v34, %v2360_v37  ;;  %v2009_v55 = vmul.f32 %v1977_v28, %v4686_v35  ;;  %v4868_v31 = vmul.f32 %v1913_v29, %v4714_v17  ;;  %v1391_v37 = vpop.xlane.xlu2 %1390 }
 0x272   :  { %v2369_v63 = vmul.f32 0.5, %v2368_v39  ;;  %v2136_v10 = vmax.f32 %v2104_v53, 0.0  ;;  %v1728_v8 = vsub.f32 1.5, %v1727_v15  ;;  %vm1730_vm5 = vweird.f32 %v4776_v61 }
 0x273   :  { %v3191_v7 = vpack.c.bf16 %v2653_v4, %v2652_v41  ;;  %v2365_v1 = vsel %vm2364_vm4, %v3330_v34, %v2361_v19  ;;  %v2041_v46 = vmul.f32 0.03125, %v2009_v55  ;;  %v2073_v35 = vmul.f32 %v4868_v31, %v4868_v31  ;;  %v4879_v34 = vpop.xlane.xlu0 %1392  ;;  %vm1732_vm7 = vmor %vm1730_vm5, %vm1731_vm2 }
 0x274   :  { %v2550_v5 = vmul.f32 %v2365_v1, %v2166_v33  ;;  %v2370_v3 = vsub.f32 1.5, %v2369_v63  ;;  %v4873_v42 = vadd.f32 1e-05, %v2136_v10  ;;  %v1729_v41 = vmul.f32 %v4821_v57, %v1728_v8 }
 0x275   :  { %3243 = vst [vmem:[#allocation7 + $0x30] sm:$0xff] %v3191_v7   ;;  %v1737_v17 = vmul.f32 0.5, %v1736_v43  ;;  %vm2372_vm6 = vweird.f32 %v4801_v49  ;;  %v2105_v18 = vsub.f32 %v2041_v46, %v2073_v35  ;;  %vm1741_vm9 = vweird.f32 %v4835_v36 }
 0x276   :  { %v2586_v2 = vmul.f32 %v4798_v60, %v2550_v5  ;;  %v2371_v50 = vmul.f32 %v3336_v25, %v2370_v3  ;;  %3339 = vrsqrt.f32 %v4873_v42  ;;  %vm2374_vm8 = vmor %vm2372_vm6, %vm2373_vm3  ;;  %v4888_v33 = vsel %vm1732_vm7, %v4821_v57, %v1729_v41 }
 0x277   :  { %v1738_v61 = vsub.f32 1.5, %v1737_v17  ;;  %v1914_v53 = vmul.f32 0.03125, %v4888_v33  ;;  %vm1740_vm10 = vweird.f32 %v4779_v23  ;;  %v2137_v28 = vmax.f32 %v2105_v18, 0.0 }
 0x278   :  { %v2375_v39 = vsel %vm2374_vm8, %v3336_v25, %v2371_v50  ;;  %v1978_v4 = vmul.f32 %v4888_v33, %v4888_v33  ;;  %v2622_v57 = vadd.f32 %v4815_v6, %v2586_v2  ;;  %vm1742_vm11 = vmor %vm1740_vm10, %vm1741_vm9  ;;  %v1745_v25 = vmul.f32 %v4857_v13, %v4805_v9 }
 0x279   :  { %v2551_v49 = vmul.f32 %v2375_v39, %v2167_v30  ;;  %v1739_v19 = vmul.f32 %v4835_v36, %v1738_v61  ;;  %v4901_v29 = vmul.f32 %v1914_v53, %v4742_v21  ;;  %v4906_v15 = vadd.f32 1e-05, %v2137_v28  ;;  %v4912_v30 = vpop.xlane.xlu1 %1394  ;;  %v4918_v55 = vpop.xlane.xlu2 %1490 }
 0x27a   :  { %v2010_v47 = vmul.f32 %v1978_v4, %v4756_v40  ;;  %vm1750_vm12 = vweird.f32 %v4805_v9  ;;  %v1746_v35 = vmul.f32 %v4857_v13, %v1745_v25  ;;  %v4930_v41 = vmax.f32 %v4918_v55, 1e-24 }
 0x27b   :  { %v2587_v23 = vmul.f32 %v4798_v60, %v2551_v49  ;;  %v4910_v58 = vsel %vm1742_vm11, %v4835_v36, %v1739_v19  ;;  %v2074_v21 = vmul.f32 %v4901_v29, %v4901_v29  ;;  %3341 = vrsqrt.f32 %v4906_v15  ;;  %v4924_v40 = vpop.xlane.xlu0 %1492 }
 0x27c   :  { %v3340_v63 = vpop.eup %3339  ;;  %v1979_v10 = vmul.f32 %v4910_v58, %v4910_v58  ;;  %v2654_v36 = vmax.f32 %v2622_v57, 0.0  ;;  %v2042_v1 = vmul.f32 0.03125, %v2010_v47  ;;  %v1915_v5 = vmul.f32 0.03125, %v4910_v58 }
 0x27d   :  { %v2623_v43 = vadd.f32 %v4815_v6, %v2587_v23  ;;  %v2377_v7 = vmul.f32 %v3340_v63, %v4873_v42  ;;  %v4935_v18 = vmax.f32 %v4924_v40, 1e-24  ;;  %v1747_v53 = vmul.f32 0.5, %v1746_v35 }
 0x27e   :  { %v2011_v8 = vmul.f32 %v1979_v10, %v4758_v22  ;;  %v2106_v17 = vsub.f32 %v2042_v1, %v2074_v21  ;;  %v4932_v50 = vmul.f32 %v1915_v5, %v1391_v37  ;;  %3343 = vrsqrt.f32 %v4930_v41 }
 0x27f   :  { %v2655_v3 = vmax.f32 %v2623_v43, 0.0  ;;  %v2378_v46 = vmul.f32 %v3340_v63, %v2377_v7  ;;  %v1880_v22 = vmul.f32 %v4829_v48, %v3932_v14  ;;  %vm1751_vm13 = vweird.f32 %v4857_v13 }
 0x280   :  { %v2043_v2 = vmul.f32 0.03125, %v2011_v8  ;;  %v2138_v49 = vmax.f32 %v2106_v17, 0.0  ;;  %v2075_v28 = vmul.f32 %v4932_v50, %v4932_v50  ;;  %vm2383_vm14 = vweird.f32 %v3340_v63  ;;  %vm1752_vm0 = vmor %vm1750_vm12, %vm1751_vm13 }
 0x281   :  { %v3196_v61 = vpack.c.bf16 %v2655_v3, %v2654_v36  ;;  %v2379_v39 = vmul.f32 0.5, %v2378_v46  ;;  %v3342_v4 = vpop.eup %3341  ;;  %v1748_v19 = vsub.f32 1.5, %v1747_v53  ;;  %3345 = vrsqrt.f32 %v4935_v18  ;;  %v4971_v8 = vpop.xlane.xlu2 %1396 }
 0x282   :  { %v4944_v57 = vpop.xlane.xlu1 %1494  ;;  %v2168_v25 = vsub.f32 %v1880_v22, %v4841_v54  ;;  %v2387_v23 = vmul.f32 %v3342_v4, %v4906_v15  ;;  %v4948_v14 = vadd.f32 1e-05, %v2138_v49  ;;  %v2107_v48 = vsub.f32 %v2043_v2, %v2075_v28 }
 0x283   :  { %3244 = vst [vmem:[#allocation7 + $0x38] sm:$0xff] %v3196_v61   ;;  %v2380_v37 = vsub.f32 1.5, %v2379_v39  ;;  %vm2382_vm15 = vweird.f32 %v4873_v42  ;;  %v1749_v21 = vmul.f32 %v4857_v13, %v1748_v19  ;;  %v4957_v10 = vmax.f32 %v4944_v57, 1e-24 }
 0x284   :  { %vm2384_vm1 = vmor %vm2382_vm15, %vm2383_vm14  ;;  %v1881_v54 = vmul.f32 %v4854_v56, %v3943_v26  ;;  %v2388_v43 = vmul.f32 %v3342_v4, %v2387_v23  ;;  %3347 = vrsqrt.f32 %v4948_v14  ;;  %v2139_v7 = vmax.f32 %v2107_v48, 0.0  ;;  %v4962_v36 = vpop.eup %3343 }
 0x285   :  { %v2381_v47 = vmul.f32 %v3340_v63, %v2380_v37  ;;  %v4966_v1 = vmul.f32 %v4888_v33, %v3956_v45  ;;  %v4969_v9 = vsel %vm1752_vm0, %v4857_v13, %v1749_v21  ;;  %3349 = vrsqrt.f32 %v4957_v10 }
 0x286   :  { %v2389_v26 = vmul.f32 0.5, %v2388_v43  ;;  %v4974_v56 = vadd.f32 1e-05, %v2139_v7  ;;  %v1980_v3 = vmul.f32 %v4969_v9, %v4969_v9  ;;  %v1916_v13 = vmul.f32 0.03125, %v4969_v9 }
 0x287   :  { %v2385_v42 = vsel %vm2384_vm1, %v3340_v63, %v2381_v47  ;;  %v4978_v46 = vpop.eup %3345  ;;  %v2169_v63 = vsub.f32 %v1881_v54, %v4868_v31  ;;  %v2170_v45 = vsub.f32 %v4966_v1, %v4901_v29  ;;  %v1755_v33 = vmul.f32 %v4962_v36, %v4930_v41 }
 0x288   :  { %v2552_v5 = vmul.f32 %v2385_v42, %v2168_v25  ;;  %v2390_v17 = vsub.f32 1.5, %v2389_v26  ;;  %vm2393_vm2 = vweird.f32 %v3342_v4  ;;  %3351 = vrsqrt.f32 %v4974_v56 }
 0x289   :  { %v2012_v2 = vmul.f32 %v1980_v3, %v4788_v27  ;;  %v4990_v61 = vmul.f32 %v1916_v13, %v4879_v34  ;;  %v1756_v31 = vmul.f32 %v4962_v36, %v1755_v33  ;;  %v1765_v39 = vmul.f32 %v4978_v46, %v4935_v18 }
 0x28a   :  { %v2588_v35 = vmul.f32 %v4798_v60, %v2552_v5  ;;  %v3348_v53 = vpop.eup %3347  ;;  %v2391_v22 = vmul.f32 %v3342_v4, %v2390_v17  ;;  %vm2392_vm3 = vweird.f32 %v4906_v15  ;;  %v4998_v49 = vmul.f32 %v4910_v58, %v3975_v12 }
 0x28b   :  { %vm1760_vm4 = vweird.f32 %v4930_v41  ;;  %v5001_v28 = vpop.eup %3349  ;;  %vm2394_vm5 = vmor %vm2392_vm3, %vm2393_vm2  ;;  %v2397_v27 = vmul.f32 %v3348_v53, %v4948_v14  ;;  %vm2402_vm6 = vweird.f32 %v4948_v14  ;;  %v2044_v34 = vmul.f32 0.03125, %v2012_v2 }
 0x28c   :  { %v2076_v37 = vmul.f32 %v4990_v61, %v4990_v61  ;;  %v2624_v19 = vadd.f32 %v4815_v6, %v2588_v35  ;;  %v2395_v15 = vsel %vm2394_vm5, %v3342_v4, %v2391_v22  ;;  %v1757_v25 = vmul.f32 0.5, %v1756_v31 }
 0x28d   :  { %vm1761_vm7 = vweird.f32 %v4962_v36  ;;  %v2553_v12 = vmul.f32 %v2395_v15, %v2169_v63  ;;  %v2398_v58 = vmul.f32 %v3348_v53, %v2397_v27  ;;  %v1766_v48 = vmul.f32 %v4978_v46, %v1765_v39 }
 0x28e   :  { %v2108_v23 = vsub.f32 %v2044_v34, %v2076_v37  ;;  %vm1770_vm8 = vweird.f32 %v4935_v18  ;;  %v5011_v47 = vpop.xlane.xlu2 %1496  ;;  %v3352_v21 = vpop.eup %3351  ;;  %vm2403_vm9 = vweird.f32 %v3348_v53  ;;  %v1758_v54 = vsub.f32 1.5, %v1757_v25  ;;  %vm1762_vm11 = vmor %vm1760_vm4, %vm1761_vm7 }
 0x28f   :  { %vm1771_vm10 = vweird.f32 %v4978_v46  ;;  %v1775_v4 = vmul.f32 %v5001_v28, %v4957_v10  ;;  %v2589_v43 = vmul.f32 %v4798_v60, %v2553_v12  ;;  %v2399_v7 = vmul.f32 0.5, %v2398_v58  ;;  %v5033_v34 = vpop.xlane.xlu0 %1398  ;;  %vm2404_vm12 = vmor %vm2402_vm6, %vm2403_vm9 }
 0x290   :  { %v2407_v42 = vmul.f32 %v3352_v21, %v4974_v56  ;;  %v5019_v5 = vmax.f32 %v5011_v47, 1e-24  ;;  %v2140_v26 = vmax.f32 %v2108_v23, 0.0  ;;  %v1759_v3 = vmul.f32 %v4962_v36, %v1758_v54  ;;  %vm1772_vm14 = vmor %vm1770_vm8, %vm1771_vm10 }
 0x291   :  { %v1767_v63 = vmul.f32 0.5, %v1766_v48  ;;  %v1776_v13 = vmul.f32 %v5001_v28, %v1775_v4  ;;  %v2656_v33 = vmax.f32 %v2624_v19, 0.0  ;;  %v2625_v35 = vadd.f32 %v4815_v6, %v2589_v43 }
 0x292   :  { %v2400_v17 = vsub.f32 1.5, %v2399_v7  ;;  %v2408_v2 = vmul.f32 %v3352_v21, %v2407_v42  ;;  %v5028_v31 = vadd.f32 1e-05, %v2140_v26  ;;  %v5031_v39 = vsel %vm1762_vm11, %v4962_v36, %v1759_v3 }
 0x293   :  { %v1768_v22 = vsub.f32 1.5, %v1767_v63  ;;  %v1777_v27 = vmul.f32 0.5, %v1776_v13  ;;  %v2657_v37 = vmax.f32 %v2625_v35, 0.0  ;;  %3353 = vrsqrt.f32 %v5019_v5 }
 0x294   :  { %v2401_v19 = vmul.f32 %v3348_v53, %v2400_v17  ;;  %v2409_v15 = vmul.f32 0.5, %v2408_v2  ;;  %vm2413_vm13 = vweird.f32 %v3352_v21  ;;  %3355 = vrsqrt.f32 %v5028_v31 }
 0x295   :  { %v1917_v41 = vmul.f32 0.03125, %v5031_v39  ;;  %v1981_v36 = vmul.f32 %v5031_v39, %v5031_v39  ;;  %v3201_v25 = vpack.c.bf16 %v2657_v37, %v2656_v33  ;;  %v1769_v23 = vmul.f32 %v4978_v46, %v1768_v22 }
 0x296   :  { %v2405_v12 = vsel %vm2404_vm12, %v3348_v53, %v2401_v19  ;;  %v2410_v58 = vsub.f32 1.5, %v2409_v15  ;;  %v1778_v4 = vsub.f32 1.5, %v1777_v27  ;;  %v2171_v53 = vsub.f32 %v4998_v49, %v4932_v50 }
 0x297   :  { %v2554_v48 = vmul.f32 %v2405_v12, %v2170_v45  ;;  %v5048_v14 = vmul.f32 %v1917_v41, %v4912_v30  ;;  %v2013_v54 = vmul.f32 %v1981_v36, %v4918_v55  ;;  %3245 = vst [vmem:[#allocation7 + $0x40] sm:$0xff] %v3201_v25   ;;  %vm2412_vm15 = vweird.f32 %v4974_v56  ;;  %v5075_v3 = vpop.xlane.xlu0 %1498 }
 0x298   :  { %v2411_v43 = vmul.f32 %v3352_v21, %v2410_v58  ;;  %v5059_v29 = vsel %vm1772_vm14, %v4978_v46, %v1769_v23  ;;  %vm2414_vm0 = vmor %vm2412_vm15, %vm2413_vm13  ;;  %vm1781_vm1 = vweird.f32 %v5001_v28  ;;  %v5071_v46 = vpop.xlane.xlu1 %1400  ;;  %v1779_v26 = vmul.f32 %v5001_v28, %v1778_v4 }
 0x299   :  { %v2590_v30 = vmul.f32 %v4798_v60, %v2554_v48  ;;  %v2045_v55 = vmul.f32 0.03125, %v2013_v54  ;;  %v2077_v18 = vmul.f32 %v5048_v14, %v5048_v14  ;;  %v5066_v1 = vpop.eup %3353  ;;  %v1982_v50 = vmul.f32 %v5059_v29, %v5059_v29 }
 0x29a   :  { %v2415_v45 = vsel %vm2414_vm0, %v3352_v21, %v2411_v43  ;;  %v1918_v56 = vmul.f32 0.03125, %v5059_v29  ;;  %v3356_v49 = vpop.eup %3355  ;;  %vm1780_vm2 = vweird.f32 %v4957_v10  ;;  %v5087_v10 = vpop.xlane.xlu2 %1402  ;;  %vm2422_vm5 = vweird.f32 %v5028_v31 }
 0x29b   :  { %v2555_v7 = vmul.f32 %v2415_v45, %v2171_v53  ;;  %v2109_v42 = vsub.f32 %v2045_v55, %v2077_v18  ;;  %v2417_v63 = vmul.f32 %v3356_v49, %v5028_v31  ;;  %v2014_v21 = vmul.f32 %v1982_v50, %v4924_v40  ;;  %vm1782_vm3 = vmor %vm1780_vm2, %vm1781_vm1 }
 0x29c   :  { %v5080_v13 = vmul.f32 %v1918_v56, %v4971_v8  ;;  %v2626_v33 = vadd.f32 %v4815_v6, %v2590_v30  ;;  %v1783_v2 = vsel %vm1782_vm3, %v5001_v28, %v1779_v26  ;;  %v5092_v8 = vmax.f32 %v5075_v3, 1e-24 }
 0x29d   :  { %v2591_v35 = vmul.f32 %v4798_v60, %v2555_v7  ;;  %v2141_v17 = vmax.f32 %v2109_v42, 0.0  ;;  %v2418_v22 = vmul.f32 %v3356_v49, %v2417_v63  ;;  %v2046_v27 = vmul.f32 0.03125, %v2014_v21 }
 0x29e   :  { %v2078_v40 = vmul.f32 %v5080_v13, %v5080_v13  ;;  %vm2423_vm4 = vweird.f32 %v3356_v49  ;;  %v1983_v15 = vmul.f32 %v1783_v2, %v1783_v2  ;;  %v1919_v25 = vmul.f32 0.03125, %v1783_v2 }
 0x29f   :  { %v2627_v37 = vadd.f32 %v4815_v6, %v2591_v35  ;;  %v5095_v19 = vadd.f32 1e-05, %v2141_v17  ;;  %v2419_v41 = vmul.f32 0.5, %v2418_v22  ;;  %v1785_v28 = vmul.f32 %v5066_v1, %v5019_v5  ;;  %vm2424_vm6 = vmor %vm2422_vm5, %vm2423_vm4 }
 0x2a0   :  { %v2110_v36 = vsub.f32 %v2046_v27, %v2078_v40  ;;  %v2658_v12 = vmax.f32 %v2626_v33, 0.0  ;;  %v2015_v23 = vmul.f32 %v1983_v15, %v4944_v57  ;;  %v5102_v4 = vmul.f32 %v1919_v25, %v5033_v34  ;;  %v5105_v43 = vpop.xlane.xlu1 %1500 }
 0x2a1   :  { %v2659_v58 = vmax.f32 %v2627_v37, 0.0  ;;  %3357 = vrsqrt.f32 %v5095_v19  ;;  %v2420_v48 = vsub.f32 1.5, %v2419_v41  ;;  %v1786_v53 = vmul.f32 %v5066_v1, %v1785_v28 }
 0x2a2   :  { %v2142_v54 = vmax.f32 %v2110_v36, 0.0  ;;  %v1884_v55 = vmul.f32 %v4969_v9, %v4005_v62  ;;  %v2047_v18 = vmul.f32 0.03125, %v2015_v23  ;;  %3359 = vrsqrt.f32 %v5092_v8  ;;  %v5171_v23 = vpop.xlane.xlu0 %1404 }
 0x2a3   :  { %v3206_v30 = vpack.c.bf16 %v2659_v58, %v2658_v12  ;;  %v2421_v45 = vmul.f32 %v3356_v49, %v2420_v48  ;;  %v2079_v34 = vmul.f32 %v5102_v4, %v5102_v4  ;;  %v1787_v56 = vmul.f32 0.5, %v1786_v53 }
 0x2a4   :  { %v5111_v57 = vadd.f32 1e-05, %v2142_v54  ;;  %v2172_v50 = vsub.f32 %v1884_v55, %v4990_v61  ;;  %v5118_v7 = vmax.f32 %v5105_v43, 1e-24  ;;  %vm1791_vm7 = vweird.f32 %v5066_v1 }
 0x2a5   :  { %3246 = vst [vmem:[#allocation7 + $0x48] sm:$0xff] %v3206_v30   ;;  %v5120_v62 = vpop.xlane.xlu2 %1502  ;;  %v2425_v9 = vsel %vm2424_vm6, %v3356_v49, %v2421_v45  ;;  %v2111_v31 = vsub.f32 %v2047_v18, %v2079_v34  ;;  %v1788_v63 = vsub.f32 1.5, %v1787_v56  ;;  %v1885_v61 = vmul.f32 %v5031_v39, %v4077_v51 }
 0x2a6   :  { %3361 = vrsqrt.f32 %v5111_v57  ;;  %v2556_v26 = vmul.f32 %v2425_v9, %v2172_v50  ;;  %v5129_v35 = vmax.f32 %v5120_v62, 1e-24  ;;  %v5136_v22 = vmul.f32 %v5059_v29, %v4156_v52 }
 0x2a7   :  { %v3358_v42 = vpop.eup %3357  ;;  %3363 = vrsqrt.f32 %v5118_v7  ;;  %v2143_v33 = vmax.f32 %v2111_v31, 0.0  ;;  %v1789_v27 = vmul.f32 %v5066_v1, %v1788_v63  ;;  %vm1790_vm8 = vweird.f32 %v5019_v5 }
 0x2a8   :  { %v2427_v21 = vmul.f32 %v3358_v42, %v5095_v19  ;;  %v5131_v49 = vpop.eup %3359  ;;  %v2592_v17 = vmul.f32 %v4798_v60, %v2556_v26  ;;  %v2173_v51 = vsub.f32 %v1885_v61, %v5048_v14  ;;  %vm1792_vm9 = vmor %vm1790_vm8, %vm1791_vm7  ;;  %v2174_v15 = vsub.f32 %v5136_v22, %v5080_v13 }
 0x2a9   :  { %v5141_v40 = vadd.f32 1e-05, %v2143_v33  ;;  %v1795_v37 = vmul.f32 %v5131_v49, %v5092_v8  ;;  %v5148_v41 = vmul.f32 %v1783_v2, %v4234_v44  ;;  %v5151_v52 = vsel %vm1792_vm9, %v5066_v1, %v1789_v27 }
 0x2aa   :  { %v2428_v39 = vmul.f32 %v3358_v42, %v2427_v21  ;;  %3365 = vrsqrt.f32 %v5129_v35  ;;  %vm2432_vm10 = vweird.f32 %v5095_v19  ;;  %vm1800_vm11 = vweird.f32 %v5092_v8 }
 0x2ab   :  { %3367 = vrsqrt.f32 %v5141_v40  ;;  %v5158_v36 = vadd.f32 %v4815_v6, %v2592_v17  ;;  %vm2433_vm12 = vweird.f32 %v3358_v42  ;;  %v1920_v1 = vmul.f32 0.03125, %v5151_v52 }
 0x2ac   :  { %v3362_v5 = vpop.eup %3361  ;;  %v2429_v14 = vmul.f32 0.5, %v2428_v39  ;;  %v1984_v2 = vmul.f32 %v5151_v52, %v5151_v52  ;;  %v1796_v25 = vmul.f32 %v5131_v49, %v1795_v37  ;;  %vm2442_vm13 = vweird.f32 %v5111_v57  ;;  %vm2434_vm15 = vmor %vm2432_vm10, %vm2433_vm12 }
 0x2ad   :  { %v3364_v29 = vpop.eup %3363  ;;  %v2437_v44 = vmul.f32 %v3362_v5, %v5111_v57  ;;  %v5168_v58 = vmul.f32 %v1920_v1, %v5071_v46  ;;  %vm1810_vm14 = vweird.f32 %v5118_v7  ;;  %v2660_v18 = vmax.f32 %v5158_v36, 0.0 }
 0x2ae   :  { %v2430_v13 = vsub.f32 1.5, %v2429_v14  ;;  %v1805_v28 = vmul.f32 %v3364_v29, %v5118_v7  ;;  %v2016_v54 = vmul.f32 %v1984_v2, %v5011_v47  ;;  %v1797_v53 = vmul.f32 0.5, %v1796_v25  ;;  %v5222_v7 = vpop.xlane.xlu2 %1408 }
 0x2af   :  { %v2438_v12 = vmul.f32 %v3362_v5, %v2437_v44  ;;  %v2080_v46 = vmul.f32 %v5168_v58, %v5168_v58  ;;  %vm1801_vm0 = vweird.f32 %v5131_v49  ;;  %vm2443_vm1 = vweird.f32 %v3362_v5 }
 0x2b0   :  { %v2431_v48 = vmul.f32 %v3358_v42, %v2430_v13  ;;  %v1806_v30 = vmul.f32 %v3364_v29, %v1805_v28  ;;  %v5174_v55 = vpop.eup %3365  ;;  %v2048_v56 = vmul.f32 0.03125, %v2016_v54  ;;  %v1798_v47 = vsub.f32 1.5, %v1797_v53  ;;  %vm1802_vm2 = vmor %vm1800_vm11, %vm1801_vm0  ;;  %v5202_v1 = vpop.xlane.xlu0 %1504 }
 0x2b1   :  { %v2439_v45 = vmul.f32 0.5, %v2438_v12  ;;  %v3368_v34 = vpop.eup %3367  ;;  %v1815_v33 = vmul.f32 %v5174_v55, %v5129_v35  ;;  %vm1811_vm3 = vweird.f32 %v3364_v29  ;;  %vm2444_vm4 = vmor %vm2442_vm13, %vm2443_vm1  ;;  %vm2452_vm7 = vweird.f32 %v5141_v40 }
 0x2b2   :  { %v2435_v50 = vsel %vm2434_vm15, %v3358_v42, %v2431_v48  ;;  %v1807_v9 = vmul.f32 0.5, %v1806_v30  ;;  %v2447_v63 = vmul.f32 %v3368_v34, %v5141_v40  ;;  %v2112_v61 = vsub.f32 %v2048_v56, %v2080_v46  ;;  %v5192_v42 = vpop.xlane.xlu1 %1406  ;;  %vm1812_vm6 = vmor %vm1810_vm14, %vm1811_vm3 }
 0x2b3   :  { %v2557_v31 = vmul.f32 %v2435_v50, %v2173_v51  ;;  %v2440_v26 = vsub.f32 1.5, %v2439_v45  ;;  %v1799_v19 = vmul.f32 %v5131_v49, %v1798_v47  ;;  %vm2453_vm5 = vweird.f32 %v3368_v34 }
 0x2b4   :  { %v1808_v21 = vsub.f32 1.5, %v1807_v9  ;;  %v2448_v27 = vmul.f32 %v3368_v34, %v2447_v63  ;;  %v2144_v51 = vmax.f32 %v2112_v61, 0.0  ;;  %v5220_v48 = vmax.f32 %v5202_v1, 1e-24  ;;  %vm2454_vm8 = vmor %vm2452_vm7, %vm2453_vm5 }
 0x2b5   :  { %v2593_v17 = vmul.f32 %v4798_v60, %v2557_v31  ;;  %v2441_v22 = vmul.f32 %v3362_v5, %v2440_v26  ;;  %v5197_v39 = vsel %vm1802_vm2, %v5131_v49, %v1799_v19  ;;  %v1816_v49 = vmul.f32 %v5174_v55, %v1815_v33 }
 0x2b6   :  { %v1809_v37 = vmul.f32 %v3364_v29, %v1808_v21  ;;  %v2449_v44 = vmul.f32 0.5, %v2448_v27  ;;  %v1985_v8 = vmul.f32 %v5197_v39, %v5197_v39  ;;  %v5204_v2 = vadd.f32 1e-05, %v2144_v51 }
 0x2b7   :  { %v2629_v14 = vadd.f32 %v4815_v6, %v2593_v17  ;;  %v2445_v36 = vsel %vm2444_vm4, %v3362_v5, %v2441_v22  ;;  %v1921_v57 = vmul.f32 0.03125, %v5197_v39  ;;  %v2175_v40 = vsub.f32 %v5148_v41, %v5102_v4 }
 0x2b8   :  { %v2558_v13 = vmul.f32 %v2445_v36, %v2174_v15  ;;  %v2450_v28 = vsub.f32 1.5, %v2449_v44  ;;  %v2017_v5 = vmul.f32 %v1985_v8, %v5075_v3  ;;  %v5212_v12 = vsel %vm1812_vm6, %v3364_v29, %v1809_v37 }
 0x2b9   :  { %v2661_v25 = vmax.f32 %v2629_v14, 0.0  ;;  %3369 = vrsqrt.f32 %v5204_v2  ;;  %v5217_v15 = vmul.f32 %v1921_v57, %v5087_v10  ;;  %v1986_v3 = vmul.f32 %v5212_v12, %v5212_v12 }
 0x2ba   :  { %v2451_v53 = vmul.f32 %v3368_v34, %v2450_v28  ;;  %v2049_v30 = vmul.f32 0.03125, %v2017_v5  ;;  %v2594_v29 = vmul.f32 %v4798_v60, %v2558_v13  ;;  %v1817_v50 = vmul.f32 0.5, %v1816_v49  ;;  %v5234_v56 = vpop.xlane.xlu1 %1506 }
 0x2bb   :  { %v3211_v54 = vpack.c.bf16 %v2661_v25, %v2660_v18  ;;  %v2081_v10 = vmul.f32 %v5217_v15, %v5217_v15  ;;  %v2018_v46 = vmul.f32 %v1986_v3, %v5105_v43  ;;  %v1922_v18 = vmul.f32 0.03125, %v5212_v12 }
 0x2bc   :  { %v2455_v45 = vsel %vm2454_vm8, %v3368_v34, %v2451_v53  ;;  %3371 = vrsqrt.f32 %v5220_v48  ;;  %v1818_v41 = vsub.f32 1.5, %v1817_v50  ;;  %vm1821_vm9 = vweird.f32 %v5174_v55 }
 0x2bd   :  { %3247 = vst [vmem:[#allocation7 + $0x50] sm:$0xff] %v3211_v54   ;;  %v2559_v47 = vmul.f32 %v2455_v45, %v2175_v40  ;;  %v2113_v9 = vsub.f32 %v2049_v30, %v2081_v10  ;;  %v2050_v31 = vmul.f32 0.03125, %v2018_v46  ;;  %v5238_v4 = vmul.f32 %v1922_v18, %v5171_v23 }
 0x2be   :  { %v2630_v43 = vadd.f32 %v4815_v6, %v2594_v29  ;;  %v5246_v61 = vmax.f32 %v5234_v56, 1e-24  ;;  %vm1820_vm10 = vweird.f32 %v5129_v35  ;;  %v1819_v17 = vmul.f32 %v5174_v55, %v1818_v41 }
 0x2bf   :  { %v5241_v26 = vpop.eup %3369  ;;  %v2595_v34 = vmul.f32 %v4798_v60, %v2559_v47  ;;  %v2145_v63 = vmax.f32 %v2113_v9, 0.0  ;;  %v2082_v23 = vmul.f32 %v5238_v4, %v5238_v4  ;;  %vm1822_vm11 = vmor %vm1820_vm10, %vm1821_vm9  ;;  %v1888_v3 = vmul.f32 %v5151_v52, %v4312_v38 }
 0x2c0   :  { %v2457_v19 = vmul.f32 %v5241_v26, %v5204_v2  ;;  %3373 = vrsqrt.f32 %v5246_v61  ;;  %v2662_v14 = vmax.f32 %v2630_v43, 0.0  ;;  %v5268_v36 = vsel %vm1822_vm11, %v5174_v55, %v1819_v17 }
 0x2c1   :  { %v2631_v21 = vadd.f32 %v4815_v6, %v2595_v34  ;;  %v5254_v33 = vadd.f32 1e-05, %v2145_v63  ;;  %v2114_v51 = vsub.f32 %v2050_v31, %v2082_v23  ;;  %v1923_v13 = vmul.f32 0.03125, %v5268_v36 }
 0x2c2   :  { %v5258_v22 = vpop.xlane.xlu2 %1508  ;;  %v2458_v27 = vmul.f32 %v5241_v26, %v2457_v19  ;;  %v3372_v35 = vpop.eup %3371  ;;  %v1987_v49 = vmul.f32 %v5268_v36, %v5268_v36  ;;  %vm2463_vm12 = vweird.f32 %v5241_v26  ;;  %vm2462_vm13 = vweird.f32 %v5204_v2 }
 0x2c3   :  { %v5264_v37 = vmax.f32 %v5258_v22, 1e-24  ;;  %v2663_v6 = vmax.f32 %v2631_v21, 0.0  ;;  %3375 = vrsqrt.f32 %v5254_v33  ;;  %v2146_v8 = vmax.f32 %v2114_v51, 0.0  ;;  %vm5294_vm14 = vmor %vm2462_vm13, %vm2463_vm12 }
 0x2c4   :  { %v2459_v44 = vmul.f32 0.5, %v2458_v27  ;;  %v1825_v25 = vmul.f32 %v3372_v35, %v5220_v48  ;;  %v5277_v54 = vmul.f32 %v1923_v13, %v5192_v42  ;;  %v2019_v53 = vmul.f32 %v1987_v49, %v5120_v62  ;;  %v1411_v27 = vpop.xlane.xlu0 %1410 }
 0x2c5   :  { %v3216_v57 = vpack.c.bf16 %v2663_v6, %v2662_v14  ;;  %v5274_v5 = vadd.f32 1e-05, %v2146_v8  ;;  %3377 = vrsqrt.f32 %v5264_v37  ;;  %v2176_v62 = vsub.f32 %v1888_v3, %v5168_v58 }
 0x2c6   :  { %v2460_v28 = vsub.f32 1.5, %v2459_v44  ;;  %v5280_v55 = vpop.eup %3373  ;;  %v1826_v30 = vmul.f32 %v3372_v35, %v1825_v25  ;;  %v2083_v42 = vmul.f32 %v5277_v54, %v5277_v54  ;;  %v2051_v10 = vmul.f32 0.03125, %v2019_v53 }
 0x2c7   :  { %3248 = vst [vmem:[#allocation7 + $0x58] sm:$0xff] %v3216_v57   ;;  %3379 = vrsqrt.f32 %v5274_v5  ;;  %v1835_v46 = vmul.f32 %v5280_v55, %v5246_v61  ;;  %v1889_v38 = vmul.f32 %v5197_v39, %v4334_v20  ;;  %v5310_v43 = vmul.f32 %v5212_v12, %v4372_v32 }
 0x2c8   :  { %v2461_v29 = vmul.f32 %v5241_v26, %v2460_v28  ;;  %v1827_v45 = vmul.f32 0.5, %v1826_v30  ;;  %v2115_v50 = vsub.f32 %v2051_v10, %v2083_v42  ;;  %vm1831_vm15 = vweird.f32 %v3372_v35 }
 0x2c9   :  { %v3376_v40 = vpop.eup %3375  ;;  %v1836_v9 = vmul.f32 %v5280_v55, %v1835_v46  ;;  %v2177_v58 = vsub.f32 %v1889_v38, %v5217_v15  ;;  %vm1830_vm0 = vweird.f32 %v5220_v48  ;;  %v2178_v23 = vsub.f32 %v5310_v43, %v5238_v4 }
 0x2ca   :  { %v2467_v52 = vmul.f32 %v3376_v40, %v5254_v33  ;;  %v2465_v2 = vsel %vm5294_vm14, %v5241_v26, %v2461_v29  ;;  %v1828_v47 = vsub.f32 1.5, %v1827_v45  ;;  %v2147_v20 = vmax.f32 %v2115_v50, 0.0  ;;  %vm1832_vm2 = vmor %vm1830_vm0, %vm1831_vm15  ;;  %v5351_v29 = vld [vmem:[%s5455_s6] ss:$0 sm:$0xff] }
 0x2cb   :  { %v5305_v31 = vpop.eup %3377  ;;  %v1837_v34 = vmul.f32 0.5, %v1836_v9  ;;  %v2560_v63 = vmul.f32 %v2465_v2, %v2176_v62  ;;  %vm2473_vm1 = vweird.f32 %v3376_v40  ;;  %vm1840_vm3 = vweird.f32 %v5246_v61 }
 0x2cc   :  { %v2468_v41 = vmul.f32 %v3376_v40, %v2467_v52  ;;  %v1829_v39 = vmul.f32 %v3372_v35, %v1828_v47  ;;  %v1845_v15 = vmul.f32 %v5305_v31, %v5264_v37  ;;  %v5321_v12 = vadd.f32 1e-05, %v2147_v20 }
 0x2cd   :  { %v5313_v26 = vpop.eup %3379  ;;  %v1838_v17 = vsub.f32 1.5, %v1837_v34  ;;  %vm2472_vm4 = vweird.f32 %v5254_v33  ;;  %vm1841_vm5 = vweird.f32 %v5280_v55  ;;  %v2596_v6 = vmul.f32 %v4798_v60, %v2560_v63 }
 0x2ce   :  { %v2469_v19 = vmul.f32 0.5, %v2468_v41  ;;  %v2477_v32 = vmul.f32 %v5313_v26, %v5274_v5  ;;  %v5324_v21 = vsel %vm1832_vm2, %v3372_v35, %v1829_v39  ;;  %v1846_v51 = vmul.f32 %v5305_v31, %v1845_v15  ;;  %vm2474_vm6 = vmor %vm2472_vm4, %vm2473_vm1 }
 0x2cf   :  { %3381 = vrsqrt.f32 %v5321_v12  ;;  %v1988_v8 = vmul.f32 %v5324_v21, %v5324_v21  ;;  %v1924_v35 = vmul.f32 0.03125, %v5324_v21  ;;  %vm2482_vm7 = vweird.f32 %v5274_v5  ;;  %vm1842_vm9 = vmor %vm1840_vm3, %vm1841_vm5  ;;  %v5378_v2 = vpop.xlane.xlu0 %1510 }
 0x2d0   :  { %v2470_v48 = vsub.f32 1.5, %v2469_v19  ;;  %v2478_v14 = vmul.f32 %v5313_v26, %v2477_v32  ;;  %v1839_v33 = vmul.f32 %v5280_v55, %v1838_v17  ;;  %v1847_v57 = vmul.f32 0.5, %v1846_v51 }
 0x2d1   :  { %vm2483_vm8 = vweird.f32 %v5313_v26  ;;  %v2020_v25 = vmul.f32 %v1988_v8, %v5202_v1  ;;  %v5341_v60 = vmul.f32 %v1924_v35, %v5222_v7  ;;  %v2632_v42 = vadd.f32 %v5351_v29, %v2596_v6 }
 0x2d2   :  { %v2471_v44 = vmul.f32 %v3376_v40, %v2470_v48  ;;  %v2479_v13 = vmul.f32 0.5, %v2478_v14  ;;  %v5346_v30 = vsel %vm1842_vm9, %v5280_v55, %v1839_v33  ;;  %v1848_v3 = vsub.f32 1.5, %v1847_v57  ;;  %v5361_v55 = vld [vmem:[%s5454_s5] ss:$0 sm:$0xff]  ;;  %vm5371_vm11 = vmor %vm2482_vm7, %vm2483_vm8  ;;  %v1413_v14 = vpop.xlane.xlu1 %1412  ;;  %s3481_s5 = smov [#allocation7]  }
 0x2d3   :  { %v2052_v1 = vmul.f32 0.03125, %v2020_v25  ;;  %v2084_v7 = vmul.f32 %v5341_v60, %v5341_v60  ;;  %v1989_v61 = vmul.f32 %v5346_v30, %v5346_v30  ;;  %v1925_v46 = vmul.f32 0.03125, %v5346_v30  ;;  %s2740_s6 = sshll.u32 %s3481_s5, 4  ;;  %s2741_s6 = int_to_ptr.vmem [resolvable:$true] %s2740_s6 }
 0x2d4   :  { %v2475_v49 = vsel %vm2474_vm6, %v3376_v40, %v2471_v44  ;;  %v2480_v53 = vsub.f32 1.5, %v2479_v13  ;;  %vm1851_vm10 = vweird.f32 %v5305_v31  ;;  %vm1850_vm12 = vweird.f32 %v5264_v37 }
 0x2d5   :  { %v2561_v28 = vmul.f32 %v2475_v49, %v2177_v58  ;;  %v3382_v40 = vpop.eup %3381  ;;  %v2116_v38 = vsub.f32 %v2052_v1, %v2084_v7  ;;  %v2021_v52 = vmul.f32 %v1989_v61, %v5234_v56  ;;  %v5384_v5 = vmul.f32 %v1925_v46, %v1411_v27  ;;  %vm1852_vm13 = vmor %vm1850_vm12, %vm1851_vm10 }
 0x2d6   :  { %v2481_v45 = vmul.f32 %v5313_v26, %v2480_v53  ;;  %v2487_v18 = vmul.f32 %v3382_v40, %v5321_v12  ;;  %v1849_v9 = vmul.f32 %v5305_v31, %v1848_v3  ;;  %v2664_v58 = vmax.f32 %v2632_v42, 0.0 }
 0x2d7   :  { %v2597_v10 = vmul.f32 %v5361_v55, %v2561_v28  ;;  %v2148_v20 = vmax.f32 %v2116_v38, 0.0  ;;  %v2053_v39 = vmul.f32 0.03125, %v2021_v52  ;;  %v2085_v37 = vmul.f32 %v5384_v5, %v5384_v5 }
 0x2d8   :  { %v2485_v47 = vsel %vm5371_vm11, %v5313_v26, %v2481_v45  ;;  %v2488_v41 = vmul.f32 %v3382_v40, %v2487_v18  ;;  %v5392_v34 = vsel %vm1852_vm13, %v5305_v31, %v1849_v9  ;;  %v5395_v26 = vmax.f32 %v5378_v2, 1e-24 }
 0x2d9   :  { %v2633_v50 = vadd.f32 %v5351_v29, %v2597_v10  ;;  %v2562_v63 = vmul.f32 %v2485_v47, %v2178_v23  ;;  %v2212_v15 = vadd.f32 1e-05, %v2148_v20  ;;  %v2117_v48 = vsub.f32 %v2053_v39, %v2085_v37 }
 0x2da   :  { %v2489_v19 = vmul.f32 0.5, %v2488_v41  ;;  %v1926_v17 = vmul.f32 0.03125, %v5392_v34  ;;  %v1990_v27 = vmul.f32 %v5392_v34, %v5392_v34  ;;  %v1891_v31 = vmul.f32 %v5268_v36, %v4451_v0 }
 0x2db   :  { %v2665_v56 = vmax.f32 %v2633_v50, 0.0  ;;  %vm2493_vm14 = vweird.f32 %v3382_v40  ;;  %3383 = vrsqrt.f32 %v2212_v15  ;;  %v2149_v6 = vmax.f32 %v2117_v48, 0.0 }
 0x2dc   :  { %v2490_v51 = vsub.f32 1.5, %v2489_v19  ;;  %v5405_v4 = vmul.f32 %v1926_v17, %v1413_v14  ;;  %v2022_v43 = vmul.f32 %v1990_v27, %v5258_v22  ;;  %3385 = vrsqrt.f32 %v5395_v26  ;;  %v1415_v27 = vpop.xlane.xlu1 %1414 }
 0x2dd   :  { %v3221_v32 = vpack.c.bf16 %v2665_v56, %v2664_v58  ;;  %v2179_v23 = vsub.f32 %v1891_v31, %v5277_v54  ;;  %vm2492_vm15 = vweird.f32 %v5321_v12  ;;  %v2598_v8 = vmul.f32 %v5361_v55, %v2562_v63 }
 0x2de   :  { %v2491_v44 = vmul.f32 %v3382_v40, %v2490_v51  ;;  %vm2494_vm0 = vmor %vm2492_vm15, %vm2493_vm14  ;;  %v2213_v0 = vadd.f32 1e-05, %v2149_v6  ;;  %v2054_v36 = vmul.f32 0.03125, %v2022_v43  ;;  %v2086_v35 = vmul.f32 %v5405_v4, %v5405_v4 }
 0x2df   :  { %3249 = vst [vmem:[#allocation7 + $0x60] sm:$0xff] %v3221_v32   ;;  %v2634_v25 = vadd.f32 %v5351_v29, %v2598_v8  ;;  %v1892_v52 = vmul.f32 %v5324_v21, %v4515_v16  ;;  %vm2502_vm2 = vweird.f32 %v2212_v15  ;;  %vm1860_vm5 = vweird.f32 %v5395_v26 }
 0x2e0   :  { %v2495_v13 = vsel %vm2494_vm0, %v3382_v40, %v2491_v44  ;;  %3387 = vrsqrt.f32 %v2213_v0  ;;  %v2118_v57 = vsub.f32 %v2054_v36, %v2086_v35  ;;  %v1893_v16 = vmul.f32 %v5346_v30, %v4566_v59 }
 0x2e1   :  { %v2563_v33 = vmul.f32 %v2495_v13, %v2179_v23  ;;  %v3384_v22 = vpop.eup %3383  ;;  %v2666_v40 = vmax.f32 %v2634_v25, 0.0  ;;  %v2180_v58 = vsub.f32 %v1892_v52, %v5341_v60  ;;  %vm2512_vm8 = vweird.f32 %v2213_v0 }
 0x2e2   :  { %v3386_v49 = vpop.eup %3385  ;;  %v2497_v28 = vmul.f32 %v3384_v22, %v2212_v15  ;;  %v2150_v12 = vmax.f32 %v2118_v57, 0.0  ;;  %vm2503_vm1 = vweird.f32 %v3384_v22  ;;  %v2181_v60 = vsub.f32 %v1893_v16, %v5384_v5 }
 0x2e3   :  { %v2599_v54 = vmul.f32 %v5361_v55, %v2563_v33  ;;  %v1855_v53 = vmul.f32 %v3386_v49, %v5395_v26  ;;  %vm1861_vm3 = vweird.f32 %v3386_v49  ;;  %vm2504_vm4 = vmor %vm2502_vm2, %vm2503_vm1  ;;  %v1894_v25 = vmul.f32 %v5392_v34, %v4641_v11 }
 0x2e4   :  { %v2498_v42 = vmul.f32 %v3384_v22, %v2497_v28  ;;  %v5418_v1 = vadd.f32 1e-05, %v2150_v12  ;;  %vm1862_vm7 = vmor %vm1860_vm5, %vm1861_vm3 }
 0x2e5   :  { %v2635_v3 = vadd.f32 %v5351_v29, %v2599_v54  ;;  %v1856_v7 = vmul.f32 %v3386_v49, %v1855_v53  ;;  %v2182_v12 = vsub.f32 %v1894_v25, %v5405_v4 }
 0x2e6   :  { %v3388_v61 = vpop.eup %3387  ;;  %v2499_v45 = vmul.f32 0.5, %v2498_v42  ;;  %3389 = vrsqrt.f32 %v5418_v1  ;;  %vm2522_vm11 = vweird.f32 %v5418_v1 }
 0x2e7   :  { %v2667_v10 = vmax.f32 %v2635_v3, 0.0  ;;  %v2507_v46 = vmul.f32 %v3388_v61, %v2213_v0  ;;  %v1857_v62 = vmul.f32 0.5, %v1856_v7  ;;  %vm2513_vm6 = vweird.f32 %v3388_v61 }
 0x2e8   :  { %v2500_v38 = vsub.f32 1.5, %v2499_v45  ;;  %vm2514_vm9 = vmor %vm2512_vm8, %vm2513_vm6 }
 0x2e9   :  { %v3226_v18 = vpack.c.bf16 %v2667_v10, %v2666_v40  ;;  %v2508_v50 = vmul.f32 %v3388_v61, %v2507_v46  ;;  %v1858_v47 = vsub.f32 1.5, %v1857_v62 }
 0x2ea   :  { %v2501_v9 = vmul.f32 %v3384_v22, %v2500_v38 }
 0x2eb   :  { %3250 = vst [vmem:[#allocation7 + $0x68] sm:$0xff] %v3226_v18   ;;  %v2509_v41 = vmul.f32 0.5, %v2508_v50  ;;  %v1859_v20 = vmul.f32 %v3386_v49, %v1858_v47 }
 0x2ec   :  { %v2505_v39 = vsel %vm2504_vm4, %v3384_v22, %v2501_v9  ;;  %v3390_v63 = vpop.eup %3389 }
 0x2ed   :  { %v2564_v56 = vmul.f32 %v2505_v39, %v2180_v58  ;;  %v2510_v37 = vsub.f32 1.5, %v2509_v41  ;;  %v1863_v21 = vsel %vm1862_vm7, %v3386_v49, %v1859_v20  ;;  %v2517_v26 = vmul.f32 %v3390_v63, %v5418_v1 }
 0x2ee   :  { %v1927_v32 = vmul.f32 0.03125, %v1863_v21  ;;  %v1991_v48 = vmul.f32 %v1863_v21, %v1863_v21  ;;  %vm2523_vm10 = vweird.f32 %v3390_v63  ;;  %v1895_v7 = vmul.f32 %v1863_v21, %v4710_v24 }
 0x2ef   :  { %v2511_v19 = vmul.f32 %v3388_v61, %v2510_v37  ;;  %v2600_v15 = vmul.f32 %v5361_v55, %v2564_v56  ;;  %v2518_v23 = vmul.f32 %v3390_v63, %v2517_v26  ;;  %vm2524_vm12 = vmor %vm2522_vm11, %vm2523_vm10 }
 0x2f0   :  { %v1959_v51 = vmul.f32 %v1927_v32, %v1415_v27  ;;  %v2023_v14 = vmul.f32 %v1991_v48, %v5378_v2 }
 0x2f1   :  { %v2515_v17 = vsel %vm2514_vm9, %v3388_v61, %v2511_v19  ;;  %v2636_v59 = vadd.f32 %v5351_v29, %v2600_v15  ;;  %v2519_v35 = vmul.f32 0.5, %v2518_v23 }
 0x2f2   :  { %v2565_v31 = vmul.f32 %v2515_v17, %v2181_v60  ;;  %v2055_v6 = vmul.f32 0.03125, %v2023_v14  ;;  %v2087_v43 = vmul.f32 %v1959_v51, %v1959_v51  ;;  %v2183_v1 = vsub.f32 %v1895_v7, %v1959_v51 }
 0x2f3   :  { %v2668_v8 = vmax.f32 %v2636_v59, 0.0  ;;  %v2520_v57 = vsub.f32 1.5, %v2519_v35 }
 0x2f4   :  { %v2601_v30 = vmul.f32 %v5361_v55, %v2565_v31  ;;  %v2119_v44 = vsub.f32 %v2055_v6, %v2087_v43 }
 0x2f5   :  { %v2521_v2 = vmul.f32 %v3390_v63, %v2520_v57 }
 0x2f6   :  { %v2637_v5 = vadd.f32 %v5351_v29, %v2601_v30  ;;  %v2151_v36 = vmax.f32 %v2119_v44, 0.0 }
 0x2f7   :  { %v2525_v54 = vsel %vm2524_vm12, %v3390_v63, %v2521_v2 }
 0x2f8   :  { %v2669_v0 = vmax.f32 %v2637_v5, 0.0  ;;  %v2215_v33 = vadd.f32 1e-05, %v2151_v36  ;;  %v2566_v3 = vmul.f32 %v2525_v54, %v2182_v12 }
 0x2fa   :  { %v3231_v13 = vpack.c.bf16 %v2669_v0, %v2668_v8  ;;  %3391 = vrsqrt.f32 %v2215_v33  ;;  %vm2532_vm14 = vweird.f32 %v2215_v33  ;;  %v2602_v40 = vmul.f32 %v5361_v55, %v2566_v3 }
 0x2fc   :  { %3251 = vst [vmem:[#allocation7 + $0x70] sm:$0xff] %v3231_v13   ;;  %v2638_v11 = vadd.f32 %v5351_v29, %v2602_v40 }
 0x2fe   :  { %v2670_v24 = vmax.f32 %v2638_v11, 0.0 }
 0x300   :  { %v3392_v22 = vpop.eup %3391 }
 0x301   :  { %v2527_v49 = vmul.f32 %v3392_v22, %v2215_v33  ;;  %vm2533_vm13 = vweird.f32 %v3392_v22 }
 0x302   :  { %vm2534_vm15 = vmor %vm2532_vm14, %vm2533_vm13 }
 0x303   :  { %v2528_v28 = vmul.f32 %v3392_v22, %v2527_v49 }
 0x305   :  { %v2529_v53 = vmul.f32 0.5, %v2528_v28 }
 0x307   :  { %v2530_v42 = vsub.f32 1.5, %v2529_v53 }
 0x309   :  { %v2531_v61 = vmul.f32 %v3392_v22, %v2530_v42 }
 0x30b   :  { %v2535_v10 = vsel %vm2534_vm15, %v3392_v22, %v2531_v61 }
 0x30c   :  { %v2567_v45 = vmul.f32 %v2535_v10, %v2183_v1 }
 0x30e   :  { %v2603_v34 = vmul.f32 %v5361_v55, %v2567_v45 }
 0x310   :  { %v2639_v4 = vadd.f32 %v5351_v29, %v2603_v34 }
 0x312   :  { %v2671_v46 = vmax.f32 %v2639_v4, 0.0 }
 0x314   :  { %v3236_v62 = vpack.c.bf16 %v2671_v46, %v2670_v24 }
 0x316   :  { %3252 = vst [vmem:[#allocation7 + $0x78] sm:$0xff] %v3236_v62  }
 0x317   :  { %2748 = dma.vmem_to_hbm [thread:$0]  %s2741_s6, 2048, %s2743_s30, [#allocation4], %s3477_s9, %s3477_s9, %s3478_s10  }
 0x318   :  { %3474 = dma.done.wait [#allocation4], 2048  }
 0x319   :  { %3475 = vsyncadd [#allocation4], 4294965248 }
 0x31a   :  { %2753 = vsyncpa [#allocation3], 1 }
 0x31b   :  { %2754 = vsyncpa [#allocation6], 1 }
 0x31c   :  { %2755 = vsyncpa [#allocation4], 1 }

</bundles_post_ra>
